<compile_context>
chip_gen: v6e
topology: v6e:2x2x1
jax: 0.10.0
libtpu: 0.0.40
codegen_flags: <defaults>
</compile_context>

<pallas_src>
import functools

import jax
import jax.numpy as jnp
import numpy as np
from jax.experimental import pallas as pl
from jax.experimental.pallas import tpu as pltpu

EPS = 1e-6  # transvae LayerNorm eps

# bf16 matmul operands on every generation (MXU is bf16-native on v5e/v6e/v7x).
# All gate / LayerNorm / elementwise math stays f32; accumulation is f32.
MATMUL_DTYPE = jnp.bfloat16


def _layernorm(x, a2, b2):
    # transvae LayerNorm: a2 * (x - mean) / (std + eps) + b2 with UNBIASED std
    d = x.shape[-1]
    mean = jnp.mean(x, axis=-1, keepdims=True)
    var = jnp.sum((x - mean) ** 2, axis=-1, keepdims=True) / (d - 1)
    return a2 * (x - mean) / (jnp.sqrt(var) + EPS) + b2


def _make_rnn_decoder_kernel(n_layers, max_length, size, teacher_force):
    s3 = 3 * size
    T = max_length

    def kernel(tgt_ref, mem_ref, wu_t_ref, bu_ref, a2_ref, b2_ref, *rest):
        # ---- unpack parameter / output / scratch refs --------------------------
        idx = 0
        if teacher_force:
            wx0_ref = rest[idx]
            idx += 1
        wm0_ref, whh0_ref, bih0_ref, bhh0_ref = rest[idx:idx + 4]
        idx += 4
        upper = []
        for _ in range(1, n_layers):
            upper.append(tuple(rest[idx:idx + 4]))   # (wih_t, whh_t, bih, bhh)
            idx += 4
        x_out_ref = rest[idx]
        h_out_ref = rest[idx + 1]
        idx += 2
        gi0_scr = rest[idx] if teacher_force else None

        B = mem_ref.shape[0]
        a2 = a2_ref[...]
        b2 = b2_ref[...]

        def mdot(a, b):
            # MXU matmul: operands cast to the bf16 weight dtype, f32 accumulation.
            return jnp.dot(a.astype(b.dtype), b, preferred_element_type=jnp.float32)

        # ---- unbottleneck: LayerNorm(relu(Linear(mem))) (hoisted) --------------
        mem = mdot(mem_ref[...], wu_t_ref[...])
        mem = jnp.maximum(mem + bu_ref[...], 0.0)
        mem_n = _layernorm(mem, a2, b2)                       # (B, size)

        # ---- hoisted layer-0 input projection -----------------------------------
        # mem part is time-invariant; tgt part is one big (T*B, size) matmul.
        gi0_mem = mdot(mem_n, wm0_ref[...]) + bih0_ref[...]   # (B, 3*size), f32
        if teacher_force:
            proj = mdot(tgt_ref[...].reshape(T * B, size), wx0_ref[...])
            # Park in VMEM (not registers) so a (T,B,3*size) tensor is not live
            # across the whole unrolled loop.
            gi0_scr[...] = proj.reshape(T, B, s3) + gi0_mem[None]
        else:
            gi0_const = gi0_mem

        # ---- hoisted weights / broadcast biases ---------------------------------
        whh0 = whh0_ref[...]
        bhh0_b = jnp.broadcast_to(bhh0_ref[...], (B, s3))
        ups = [(wih_ref[...], whh_ref[...],
                jnp.broadcast_to(bih_ref[...], (B, s3)),
                jnp.broadcast_to(bhh_ref[...], (B, s3)))
               for (wih_ref, whh_ref, bih_ref, bhh_ref) in upper]

        def gru_gates(gi, gh):
            # one EUP sigmoid call on the fused r|z lanes, tanh on n lanes
            # TODO(synk): A/B a gate-column reordering so r and gh_n share lane
            # offsets (saves a couple of lane rotates per step).
            rz = jax.nn.sigmoid(gi[:, :2 * size] + gh[:, :2 * size])
            r = rz[:, :size]
            z = rz[:, size:]
            n = jnp.tanh(gi[:, 2 * size:] + r * gh[:, 2 * size:])
            return n, z

        # ---- statically unrolled sequential GRU (h carried in registers) --------
        h = [jnp.zeros((B, size), jnp.float32) for _ in range(n_layers)]
        # Software pipeline: gh0 for step t is issued while the upper layers of
        # step t-1 are still in flight (it only depends on h[0](t-1)).
        gh0 = mdot(h[0], whh0) + bhh0_b
        for t in range(T):
            gi0 = gi0_scr[t] if teacher_force else gi0_const
            n0, z0 = gru_gates(gi0, gh0)
            h[0] = n0 + z0 * (h[0] - n0)          # == (1-z)*n + z*h_prev
            if t + 1 < T:
                gh0 = mdot(h[0], whh0) + bhh0_b   # next step's gh0, overlaps below
            inp = h[0]
            for li, (wih_t, whh_t, bih_b, bhh_b) in enumerate(ups):
                l = li + 1
                gi = mdot(inp, wih_t) + bih_b     # two independent MXU pushes,
                gh = mdot(h[l], whh_t) + bhh_b    # they pipeline back-to-back
                n_, z_ = gru_gates(gi, gh)
                h[l] = n_ + z_ * (h[l] - n_)
                inp = h[l]
            # stream raw step output straight to VMEM (no T-deep register live range)
            x_out_ref[t] = inp

        # ---- batched output LayerNorm over the whole slab (off the serial path) -
        # TODO(synk): a lane-dense (T, B*size) output layout would avoid masked
        #             vst on the 32-lane store; slab is ~9 KB so skipped here.
        x_out_ref[...] = _layernorm(x_out_ref[...], a2, b2)
        for l in range(n_layers):
            h_out_ref[l] = h[l]

    return kernel


def pack_rnn_decoder_params(params, *, size, n_layers, teacher_force=True):
    """One-time weight packing (transposes + bf16 casts), hoisted off the
    per-inference path: call once, reuse the packed pytree for every forward."""
    wdt = MATMUL_DTYPE
    f32 = jnp.float32
    p = {
        'wu_t': params['wu'].T.astype(wdt),
        'bu': params['bu'][None, :].astype(f32),
        'a2': params['a2'][None, :].astype(f32),
        'b2': params['b2'][None, :].astype(f32),
    }
    wih0 = params['wih0']
    if teacher_force:
        p['wx0'] = wih0[:, :size].T.astype(wdt)      # (size, 3*size)
        p['wm0'] = wih0[:, size:].T.astype(wdt)      # (size, 3*size)
    else:
        p['wm0'] = wih0.T.astype(wdt)
    p['whh0'] = params['whh0'].T.astype(wdt)         # (size, 3*size)
    p['bih0'] = params['bih0'][None, :].astype(f32)
    p['bhh0'] = params['bhh0'][None, :].astype(f32)
    for l in range(1, n_layers):
        p[f'wih{l}_t'] = params[f'wih{l}'].T.astype(wdt)
        p[f'whh{l}_t'] = params[f'whh{l}'].T.astype(wdt)
        p[f'bih{l}'] = params[f'bih{l}'][None, :].astype(f32)
        p[f'bhh{l}'] = params[f'bhh{l}'][None, :].astype(f32)
    return p


@functools.partial(jax.jit, static_argnames=("size", "n_layers", "max_length",
                                             "teacher_force", "bypass_bottleneck"))
def rnn_decoder_forward(tgt, mem, packed, *, size, n_layers, max_length,
                        teacher_force=True, bypass_bottleneck=False):
    """tgt: (B, max_length, size), mem: (B, d_latent) -> (x (B,T,size), h (N,B,size))."""
    # TODO(synk): bypass_bottleneck=True branch (mem already sequence-shaped) not implemented.
    assert not bypass_bottleneck
    B = tgt.shape[0]
    T = max_length
    s3 = 3 * size

    # pad batch to a multiple of 8 sublanes (rows are independent -> exact);
    # replicate the last real row so LayerNorm never sees a zero-variance row.
    B_pad = max(8, ((B + 7) // 8) * 8)
    tgt32 = tgt.astype(jnp.float32)
    mem32 = mem.astype(jnp.float32)
    if B_pad != B:
        tgt32 = jnp.pad(tgt32, ((0, B_pad - B), (0, 0), (0, 0)), mode='edge')
        mem32 = jnp.pad(mem32, ((0, B_pad - B), (0, 0)), mode='edge')
    tgt_tm = jnp.transpose(tgt32, (1, 0, 2))               # (T, B_pad, size)

    args = [tgt_tm, mem32, packed['wu_t'], packed['bu'], packed['a2'], packed['b2']]
    if teacher_force:
        args.append(packed['wx0'])
    args += [packed['wm0'], packed['whh0'], packed['bih0'], packed['bhh0']]
    for l in range(1, n_layers):
        args += [packed[f'wih{l}_t'], packed[f'whh{l}_t'],
                 packed[f'bih{l}'], packed[f'bhh{l}']]

    scratch = []
    if teacher_force:
        scratch.append(pltpu.VMEM((T, B_pad, s3), jnp.float32))

    kernel = _make_rnn_decoder_kernel(n_layers, T, size, teacher_force)
    x_tm, h = pl.pallas_call(
        kernel,
        out_shape=(jax.ShapeDtypeStruct((T, B_pad, size), jnp.float32),
                   jax.ShapeDtypeStruct((n_layers, B_pad, size), jnp.float32)),
        in_specs=[pl.BlockSpec(memory_space=pltpu.MemorySpace.VMEM)] * len(args),
        out_specs=(pl.BlockSpec(memory_space=pltpu.MemorySpace.VMEM),
                   pl.BlockSpec(memory_space=pltpu.MemorySpace.VMEM)),
        scratch_shapes=scratch,
        compiler_params=pltpu.CompilerParams(vmem_limit_bytes=32 * 1024 * 1024),
    )(*args)
    # TODO(synk): on v7x, split B_pad across the two TensorCores (grid over batch +
    #             dimension_semantics=("parallel",)) once real batch sizes exceed 8.

    x = jnp.transpose(x_tm, (1, 0, 2))[:B]                 # back to (B, T, size)
    return x, h[:, :B]


# ----------------------- pure-JAX reference (for validation) -------------------
def reference_forward(tgt, mem, params, *, size, n_layers, max_length, teacher_force=True):
    def ln(x, a2, b2):
        d = x.shape[-1]
        mean = x.mean(-1, keepdims=True)
        var = ((x - mean) ** 2).sum(-1, keepdims=True) / (d - 1)
        return a2 * (x - mean) / (jnp.sqrt(var) + EPS) + b2

    B = tgt.shape[0]
    m = jax.nn.relu(mem @ params['wu'].T + params['bu'])
    m = jnp.repeat(m[:, None, :], max_length, axis=1)
    m = ln(m, params['a2'], params['b2'])
    g_in = jnp.concatenate([tgt, m], axis=2) if teacher_force else m
    g_tm = jnp.transpose(g_in, (1, 0, 2))
    h = jnp.zeros((n_layers, B, size), jnp.float32)
    outs = []
    for t in range(max_length):
        inp = g_tm[t]
        new_h = []
        for l in range(n_layers):
            wih, whh = params[f'wih{l}'], params[f'whh{l}']
            bih, bhh = params[f'bih{l}'], params[f'bhh{l}']
            gi = inp @ wih.T + bih
            gh = h[l] @ whh.T + bhh
            r = jax.nn.sigmoid(gi[:, :size] + gh[:, :size])
            z = jax.nn.sigmoid(gi[:, size:2 * size] + gh[:, size:2 * size])
            n = jnp.tanh(gi[:, 2 * size:] + r * gh[:, 2 * size:])
            hn = (1.0 - z) * n + z * h[l]
            new_h.append(hn)
            inp = hn
        h = jnp.stack(new_h)
        outs.append(inp)
    x = jnp.stack(outs, axis=1)            # (B, T, size)
    x = ln(x, params['a2'], params['b2'])
    return x, h


if __name__ == "__main__":
    # module config: size=32, d_latent=16, N=2, dropout=0.1, tgt_length=8,
    # teacher_force=True, bypass_bottleneck=False
    size, d_latent, n_layers, tgt_length = 32, 16, 2, 8
    teacher_force = True
    max_length = tgt_length + 1
    gru_size = 2 * size if teacher_force else size
    B = 2

    key = jax.random.PRNGKey(0)
    keys = jax.random.split(key, 4 + 4 * n_layers)
    ki = iter(keys)
    scale = jnp.float32(0.2)

    params = {
        'wu': scale * jax.random.normal(next(ki), (size, d_latent), jnp.float32),
        'bu': scale * jax.random.normal(next(ki), (size,), jnp.float32),
        'a2': jnp.ones((size,), jnp.float32),
        'b2': jnp.zeros((size,), jnp.float32),
    }
    for l in range(n_layers):
        in_dim = gru_size if l == 0 else size
        params[f'wih{l}'] = scale * jax.random.normal(next(ki), (3 * size, in_dim), jnp.float32)
        params[f'whh{l}'] = scale * jax.random.normal(next(ki), (3 * size, size), jnp.float32)
        kb = jax.random.split(next(ki), 2)
        params[f'bih{l}'] = scale * jax.random.normal(kb[0], (3 * size,), jnp.float32)
        params[f'bhh{l}'] = scale * jax.random.normal(kb[1], (3 * size,), jnp.float32)

    kt, km = jax.random.split(next(ki), 2)
    tgt = jax.random.normal(kt, (B, max_length, size), jnp.float32)
    mem = jax.random.normal(km, (B, d_latent), jnp.float32)

    packed = pack_rnn_decoder_params(params, size=size, n_layers=n_layers,
                                     teacher_force=teacher_force)
    x, h = rnn_decoder_forward(tgt, mem, packed, size=size, n_layers=n_layers,
                               max_length=max_length, teacher_force=teacher_force,
                               bypass_bottleneck=False)
    jax.block_until_ready((x, h))

    x_ref, h_ref = reference_forward(tgt, mem, params, size=size, n_layers=n_layers,
                                     max_length=max_length, teacher_force=teacher_force)
    # bf16 MXU operands: ~2^-8 rounding per matmul accumulates over the T=9-step
    # recurrence (2 layers) and is amplified by the final LayerNorm, so validate
    # against the f32 reference with a bf16-appropriate tolerance.
    np.testing.assert_allclose(np.asarray(x), np.asarray(x_ref), rtol=5e-2, atol=5e-2)
    np.testing.assert_allclose(np.asarray(h), np.asarray(h_ref), rtol=5e-2, atol=5e-2)

    print("KERNEL_OK")
</pallas_src>

<mosaic_0001>
module attributes {stable_mosaic.version = 11 : i64} {
  func.func @kernel(%arg0: memref<9x8x32xf32, #tpu.memory_space<vmem>>, %arg1: memref<8x16xf32, #tpu.memory_space<vmem>>, %arg2: memref<16x32xbf16, #tpu.memory_space<vmem>>, %arg3: memref<1x32xf32, #tpu.memory_space<vmem>>, %arg4: memref<1x32xf32, #tpu.memory_space<vmem>>, %arg5: memref<1x32xf32, #tpu.memory_space<vmem>>, %arg6: memref<32x96xbf16, #tpu.memory_space<vmem>>, %arg7: memref<32x96xbf16, #tpu.memory_space<vmem>>, %arg8: memref<32x96xbf16, #tpu.memory_space<vmem>>, %arg9: memref<1x96xf32, #tpu.memory_space<vmem>>, %arg10: memref<1x96xf32, #tpu.memory_space<vmem>>, %arg11: memref<32x96xbf16, #tpu.memory_space<vmem>>, %arg12: memref<32x96xbf16, #tpu.memory_space<vmem>>, %arg13: memref<1x96xf32, #tpu.memory_space<vmem>>, %arg14: memref<1x96xf32, #tpu.memory_space<vmem>>, %arg15: memref<9x8x32xf32, #tpu.memory_space<vmem>>, %arg16: memref<2x8x32xf32, #tpu.memory_space<vmem>>, %arg17: memref<9x8x96xf32, #tpu.memory_space<vmem>>) attributes {dimension_semantics = [], scalar_prefetch = 0 : i64, scratch_operands = 1 : i64, tpu.core_type = #tpu.core_type<tc>} {
    %c0 = arith.constant 0 : index
    %c0_0 = arith.constant 0 : index
    %0 = vector.load %arg4[%c0, %c0_0] : memref<1x32xf32, #tpu.memory_space<vmem>>, vector<1x32xf32>
    %c0_1 = arith.constant 0 : index
    %c0_2 = arith.constant 0 : index
    %1 = vector.load %arg5[%c0_1, %c0_2] : memref<1x32xf32, #tpu.memory_space<vmem>>, vector<1x32xf32>
    %c0_3 = arith.constant 0 : index
    %c0_4 = arith.constant 0 : index
    %2 = vector.load %arg1[%c0_3, %c0_4] : memref<8x16xf32, #tpu.memory_space<vmem>>, vector<8x16xf32>
    %c0_5 = arith.constant 0 : index
    %c0_6 = arith.constant 0 : index
    %3 = vector.load %arg2[%c0_5, %c0_6] : memref<16x32xbf16, #tpu.memory_space<vmem>>, vector<16x32xbf16>
    %4 = arith.truncf %2 : vector<8x16xf32> to vector<8x16xbf16>
    %cst = arith.constant dense<0.000000e+00> : vector<8x32xf32>
    %5 = tpu.matmul %4, %3, %cst {dimension_numbers = #tpu.dot_dimension_numbers<[1], [0], [0], [1], [0, 0, 1, 1], [], []>} : vector<8x16xbf16>, vector<16x32xbf16>, vector<8x32xf32> -> vector<8x32xf32>
    %c0_7 = arith.constant 0 : index
    %c0_8 = arith.constant 0 : index
    %6 = vector.load %arg3[%c0_7, %c0_8] : memref<1x32xf32, #tpu.memory_space<vmem>>, vector<1x32xf32>
    %7 = vector.broadcast %6 : vector<1x32xf32> to vector<8x32xf32>
    %8 = arith.addf %5, %7 : vector<8x32xf32>
    %cst_9 = arith.constant 0.000000e+00 : f32
    %9 = vector.broadcast %cst_9 : f32 to vector<8x32xf32>
    %10 = arith.maximumf %8, %9 : vector<8x32xf32>
    %cst_10 = arith.constant dense<0.000000e+00> : vector<8xf32>
    %11 = vector.multi_reduction <add>, %10, %cst_10 [1] : vector<8x32xf32> to vector<8xf32>
    %12 = vector.shape_cast %11 : vector<8xf32> to vector<8x1xf32>
    %cst_11 = arith.constant 3.200000e+01 : f32
    %13 = vector.broadcast %cst_11 : f32 to vector<8x1xf32>
    %14 = arith.divf %12, %13 : vector<8x1xf32>
    %15 = vector.broadcast %14 : vector<8x1xf32> to vector<8x32xf32>
    %16 = arith.subf %10, %15 : vector<8x32xf32>
    %17 = arith.mulf %16, %16 : vector<8x32xf32>
    %cst_12 = arith.constant dense<0.000000e+00> : vector<8xf32>
    %18 = vector.multi_reduction <add>, %17, %cst_12 [1] : vector<8x32xf32> to vector<8xf32>
    %19 = vector.shape_cast %18 : vector<8xf32> to vector<8x1xf32>
    %cst_13 = arith.constant 3.100000e+01 : f32
    %20 = vector.broadcast %cst_13 : f32 to vector<8x1xf32>
    %21 = arith.divf %19, %20 : vector<8x1xf32>
    %22 = vector.broadcast %14 : vector<8x1xf32> to vector<8x32xf32>
    %23 = arith.subf %10, %22 : vector<8x32xf32>
    %24 = vector.broadcast %0 : vector<1x32xf32> to vector<8x32xf32>
    %25 = arith.mulf %24, %23 : vector<8x32xf32>
    %26 = math.sqrt %21 : vector<8x1xf32>
    %cst_14 = arith.constant 9.99999997E-7 : f32
    %27 = vector.broadcast %cst_14 : f32 to vector<8x1xf32>
    %28 = arith.addf %26, %27 : vector<8x1xf32>
    %29 = vector.broadcast %28 : vector<8x1xf32> to vector<8x32xf32>
    %30 = arith.divf %25, %29 : vector<8x32xf32>
    %31 = vector.broadcast %1 : vector<1x32xf32> to vector<8x32xf32>
    %32 = arith.addf %30, %31 : vector<8x32xf32>
    %c0_15 = arith.constant 0 : index
    %c0_16 = arith.constant 0 : index
    %33 = vector.load %arg7[%c0_15, %c0_16] : memref<32x96xbf16, #tpu.memory_space<vmem>>, vector<32x96xbf16>
    %34 = arith.truncf %32 : vector<8x32xf32> to vector<8x32xbf16>
    %cst_17 = arith.constant dense<0.000000e+00> : vector<8x96xf32>
    %35 = tpu.matmul %34, %33, %cst_17 {dimension_numbers = #tpu.dot_dimension_numbers<[1], [0], [0], [1], [0, 0, 1, 1], [], []>} : vector<8x32xbf16>, vector<32x96xbf16>, vector<8x96xf32> -> vector<8x96xf32>
    %c0_18 = arith.constant 0 : index
    %c0_19 = arith.constant 0 : index
    %36 = vector.load %arg9[%c0_18, %c0_19] : memref<1x96xf32, #tpu.memory_space<vmem>>, vector<1x96xf32>
    %37 = vector.broadcast %36 : vector<1x96xf32> to vector<8x96xf32>
    %38 = arith.addf %35, %37 : vector<8x96xf32>
    %c0_20 = arith.constant 0 : index
    %c0_21 = arith.constant 0 : index
    %c0_22 = arith.constant 0 : index
    %39 = vector.load %arg0[%c0_20, %c0_21, %c0_22] : memref<9x8x32xf32, #tpu.memory_space<vmem>>, vector<9x8x32xf32>
    %40 = vector.shape_cast %39 : vector<9x8x32xf32> to vector<72x32xf32>
    %c0_23 = arith.constant 0 : index
    %c0_24 = arith.constant 0 : index
    %41 = vector.load %arg6[%c0_23, %c0_24] : memref<32x96xbf16, #tpu.memory_space<vmem>>, vector<32x96xbf16>
    %42 = arith.truncf %40 : vector<72x32xf32> to vector<72x32xbf16>
    %cst_25 = arith.constant dense<0.000000e+00> : vector<72x96xf32>
    %43 = tpu.matmul %42, %41, %cst_25 {dimension_numbers = #tpu.dot_dimension_numbers<[1], [0], [0], [1], [0, 0, 1, 1], [], []>} : vector<72x32xbf16>, vector<32x96xbf16>, vector<72x96xf32> -> vector<72x96xf32>
    %44 = vector.shape_cast %43 : vector<72x96xf32> to vector<9x8x96xf32>
    %45 = vector.shape_cast %38 : vector<8x96xf32> to vector<1x8x96xf32>
    %46 = vector.broadcast %45 : vector<1x8x96xf32> to vector<9x8x96xf32>
    %47 = arith.addf %44, %46 : vector<9x8x96xf32>
    %c0_26 = arith.constant 0 : index
    %c0_27 = arith.constant 0 : index
    %c0_28 = arith.constant 0 : index
    %48 = vector.load %arg17[%c0_26, %c0_27, %c0_28] : memref<9x8x96xf32, #tpu.memory_space<vmem>>, vector<9x8x96xf32>
    tpu.vector_store %arg17[%c0_26, %c0_27, %c0_28], %47 {strides = array<i32>} : memref<9x8x96xf32, #tpu.memory_space<vmem>>, vector<9x8x96xf32>,
    %c0_29 = arith.constant 0 : index
    %c0_30 = arith.constant 0 : index
    %49 = vector.load %arg8[%c0_29, %c0_30] : memref<32x96xbf16, #tpu.memory_space<vmem>>, vector<32x96xbf16>
    %c0_31 = arith.constant 0 : index
    %c0_32 = arith.constant 0 : index
    %50 = vector.load %arg10[%c0_31, %c0_32] : memref<1x96xf32, #tpu.memory_space<vmem>>, vector<1x96xf32>
    %51 = vector.shape_cast %50 : vector<1x96xf32> to vector<1x96xf32>
    %52 = vector.broadcast %51 : vector<1x96xf32> to vector<8x96xf32>
    %c0_33 = arith.constant 0 : index
    %c0_34 = arith.constant 0 : index
    %53 = vector.load %arg11[%c0_33, %c0_34] : memref<32x96xbf16, #tpu.memory_space<vmem>>, vector<32x96xbf16>
    %c0_35 = arith.constant 0 : index
    %c0_36 = arith.constant 0 : index
    %54 = vector.load %arg12[%c0_35, %c0_36] : memref<32x96xbf16, #tpu.memory_space<vmem>>, vector<32x96xbf16>
    %c0_37 = arith.constant 0 : index
    %c0_38 = arith.constant 0 : index
    %55 = vector.load %arg13[%c0_37, %c0_38] : memref<1x96xf32, #tpu.memory_space<vmem>>, vector<1x96xf32>
    %56 = vector.shape_cast %55 : vector<1x96xf32> to vector<1x96xf32>
    %57 = vector.broadcast %56 : vector<1x96xf32> to vector<8x96xf32>
    %c0_39 = arith.constant 0 : index
    %c0_40 = arith.constant 0 : index
    %58 = vector.load %arg14[%c0_39, %c0_40] : memref<1x96xf32, #tpu.memory_space<vmem>>, vector<1x96xf32>
    %59 = vector.shape_cast %58 : vector<1x96xf32> to vector<1x96xf32>
    %60 = vector.broadcast %59 : vector<1x96xf32> to vector<8x96xf32>
    %cst_41 = arith.constant 0.000000e+00 : f32
    %61 = vector.broadcast %cst_41 : f32 to vector<8x32xf32>
    %cst_42 = arith.constant 0.000000e+00 : f32
    %62 = vector.broadcast %cst_42 : f32 to vector<8x32xf32>
    %63 = arith.truncf %61 : vector<8x32xf32> to vector<8x32xbf16>
    %cst_43 = arith.constant dense<0.000000e+00> : vector<8x96xf32>
    %64 = tpu.matmul %63, %49, %cst_43 {dimension_numbers = #tpu.dot_dimension_numbers<[1], [0], [0], [1], [0, 0, 1, 1], [], []>} : vector<8x32xbf16>, vector<32x96xbf16>, vector<8x96xf32> -> vector<8x96xf32>
    %65 = arith.addf %64, %52 : vector<8x96xf32>
    %c0_44 = arith.constant 0 : index
    %c0_45 = arith.constant 0 : index
    %c0_46 = arith.constant 0 : index
    %66 = vector.load %arg17[%c0_44, %c0_45, %c0_46] : memref<9x8x96xf32, #tpu.memory_space<vmem>>, vector<1x8x96xf32>
    %67 = vector.shape_cast %66 : vector<1x8x96xf32> to vector<8x96xf32>
    %68 = vector.extract_strided_slice %67 {offsets = [0, 0], sizes = [8, 64], strides = [1, 1]} : vector<8x96xf32> to vector<8x64xf32>
    %69 = vector.extract_strided_slice %65 {offsets = [0, 0], sizes = [8, 64], strides = [1, 1]} : vector<8x96xf32> to vector<8x64xf32>
    %70 = arith.addf %68, %69 : vector<8x64xf32>
    %71 = arith.negf %70 : vector<8x64xf32>
    %72 = math.exp %71 : vector<8x64xf32>
    %cst_47 = arith.constant 1.000000e+00 : f32
    %73 = vector.broadcast %cst_47 : f32 to vector<8x64xf32>
    %74 = arith.addf %73, %72 : vector<8x64xf32>
    %75 = arith.divf %73, %74 : vector<8x64xf32>
    %76 = vector.extract_strided_slice %75 {offsets = [0, 0], sizes = [8, 32], strides = [1, 1]} : vector<8x64xf32> to vector<8x32xf32>
    %77 = vector.extract_strided_slice %75 {offsets = [0, 32], sizes = [8, 32], strides = [1, 1]} : vector<8x64xf32> to vector<8x32xf32>
    %78 = vector.extract_strided_slice %67 {offsets = [0, 64], sizes = [8, 32], strides = [1, 1]} : vector<8x96xf32> to vector<8x32xf32>
    %79 = vector.extract_strided_slice %65 {offsets = [0, 64], sizes = [8, 32], strides = [1, 1]} : vector<8x96xf32> to vector<8x32xf32>
    %80 = arith.mulf %76, %79 : vector<8x32xf32>
    %81 = arith.addf %78, %80 : vector<8x32xf32>
    %82 = math.tanh %81 : vector<8x32xf32>
    %83 = arith.subf %61, %82 : vector<8x32xf32>
    %84 = arith.mulf %77, %83 : vector<8x32xf32>
    %85 = arith.addf %82, %84 : vector<8x32xf32>
    %86 = arith.truncf %85 : vector<8x32xf32> to vector<8x32xbf16>
    %cst_48 = arith.constant dense<0.000000e+00> : vector<8x96xf32>
    %87 = tpu.matmul %86, %49, %cst_48 {dimension_numbers = #tpu.dot_dimension_numbers<[1], [0], [0], [1], [0, 0, 1, 1], [], []>} : vector<8x32xbf16>, vector<32x96xbf16>, vector<8x96xf32> -> vector<8x96xf32>
    %88 = arith.addf %87, %52 : vector<8x96xf32>
    %89 = arith.truncf %85 : vector<8x32xf32> to vector<8x32xbf16>
    %cst_49 = arith.constant dense<0.000000e+00> : vector<8x96xf32>
    %90 = tpu.matmul %89, %53, %cst_49 {dimension_numbers = #tpu.dot_dimension_numbers<[1], [0], [0], [1], [0, 0, 1, 1], [], []>} : vector<8x32xbf16>, vector<32x96xbf16>, vector<8x96xf32> -> vector<8x96xf32>
    %91 = arith.addf %90, %57 : vector<8x96xf32>
    %92 = arith.truncf %62 : vector<8x32xf32> to vector<8x32xbf16>
    %cst_50 = arith.constant dense<0.000000e+00> : vector<8x96xf32>
    %93 = tpu.matmul %92, %54, %cst_50 {dimension_numbers = #tpu.dot_dimension_numbers<[1], [0], [0], [1], [0, 0, 1, 1], [], []>} : vector<8x32xbf16>, vector<32x96xbf16>, vector<8x96xf32> -> vector<8x96xf32>
    %94 = arith.addf %93, %60 : vector<8x96xf32>
    %95 = vector.extract_strided_slice %91 {offsets = [0, 0], sizes = [8, 64], strides = [1, 1]} : vector<8x96xf32> to vector<8x64xf32>
    %96 = vector.extract_strided_slice %94 {offsets = [0, 0], sizes = [8, 64], strides = [1, 1]} : vector<8x96xf32> to vector<8x64xf32>
    %97 = arith.addf %95, %96 : vector<8x64xf32>
    %98 = arith.negf %97 : vector<8x64xf32>
    %99 = math.exp %98 : vector<8x64xf32>
    %cst_51 = arith.constant 1.000000e+00 : f32
    %100 = vector.broadcast %cst_51 : f32 to vector<8x64xf32>
    %101 = arith.addf %100, %99 : vector<8x64xf32>
    %102 = arith.divf %100, %101 : vector<8x64xf32>
    %103 = vector.extract_strided_slice %102 {offsets = [0, 0], sizes = [8, 32], strides = [1, 1]} : vector<8x64xf32> to vector<8x32xf32>
    %104 = vector.extract_strided_slice %102 {offsets = [0, 32], sizes = [8, 32], strides = [1, 1]} : vector<8x64xf32> to vector<8x32xf32>
    %105 = vector.extract_strided_slice %91 {offsets = [0, 64], sizes = [8, 32], strides = [1, 1]} : vector<8x96xf32> to vector<8x32xf32>
    %106 = vector.extract_strided_slice %94 {offsets = [0, 64], sizes = [8, 32], strides = [1, 1]} : vector<8x96xf32> to vector<8x32xf32>
    %107 = arith.mulf %103, %106 : vector<8x32xf32>
    %108 = arith.addf %105, %107 : vector<8x32xf32>
    %109 = math.tanh %108 : vector<8x32xf32>
    %110 = arith.subf %62, %109 : vector<8x32xf32>
    %111 = arith.mulf %104, %110 : vector<8x32xf32>
    %112 = arith.addf %109, %111 : vector<8x32xf32>
    %c0_52 = arith.constant 0 : index
    %c0_53 = arith.constant 0 : index
    %c0_54 = arith.constant 0 : index
    %113 = vector.load %arg15[%c0_52, %c0_53, %c0_54] : memref<9x8x32xf32, #tpu.memory_space<vmem>>, vector<1x8x32xf32>
    %114 = vector.shape_cast %113 : vector<1x8x32xf32> to vector<8x32xf32>
    %115 = vector.shape_cast %112 : vector<8x32xf32> to vector<1x8x32xf32>
    tpu.vector_store %arg15[%c0_52, %c0_53, %c0_54], %115 {strides = array<i32>} : memref<9x8x32xf32, #tpu.memory_space<vmem>>, vector<1x8x32xf32>,
    %c1 = arith.constant 1 : index
    %c0_55 = arith.constant 0 : index
    %c0_56 = arith.constant 0 : index
    %116 = vector.load %arg17[%c1, %c0_55, %c0_56] : memref<9x8x96xf32, #tpu.memory_space<vmem>>, vector<1x8x96xf32>
    %117 = vector.shape_cast %116 : vector<1x8x96xf32> to vector<8x96xf32>
    %118 = vector.extract_strided_slice %117 {offsets = [0, 0], sizes = [8, 64], strides = [1, 1]} : vector<8x96xf32> to vector<8x64xf32>
    %119 = vector.extract_strided_slice %88 {offsets = [0, 0], sizes = [8, 64], strides = [1, 1]} : vector<8x96xf32> to vector<8x64xf32>
    %120 = arith.addf %118, %119 : vector<8x64xf32>
    %121 = arith.negf %120 : vector<8x64xf32>
    %122 = math.exp %121 : vector<8x64xf32>
    %cst_57 = arith.constant 1.000000e+00 : f32
    %123 = vector.broadcast %cst_57 : f32 to vector<8x64xf32>
    %124 = arith.addf %123, %122 : vector<8x64xf32>
    %125 = arith.divf %123, %124 : vector<8x64xf32>
    %126 = vector.extract_strided_slice %125 {offsets = [0, 0], sizes = [8, 32], strides = [1, 1]} : vector<8x64xf32> to vector<8x32xf32>
    %127 = vector.extract_strided_slice %125 {offsets = [0, 32], sizes = [8, 32], strides = [1, 1]} : vector<8x64xf32> to vector<8x32xf32>
    %128 = vector.extract_strided_slice %117 {offsets = [0, 64], sizes = [8, 32], strides = [1, 1]} : vector<8x96xf32> to vector<8x32xf32>
    %129 = vector.extract_strided_slice %88 {offsets = [0, 64], sizes = [8, 32], strides = [1, 1]} : vector<8x96xf32> to vector<8x32xf32>
    %130 = arith.mulf %126, %129 : vector<8x32xf32>
    %131 = arith.addf %128, %130 : vector<8x32xf32>
    %132 = math.tanh %131 : vector<8x32xf32>
    %133 = arith.subf %85, %132 : vector<8x32xf32>
    %134 = arith.mulf %127, %133 : vector<8x32xf32>
    %135 = arith.addf %132, %134 : vector<8x32xf32>
    %136 = arith.truncf %135 : vector<8x32xf32> to vector<8x32xbf16>
    %cst_58 = arith.constant dense<0.000000e+00> : vector<8x96xf32>
    %137 = tpu.matmul %136, %49, %cst_58 {dimension_numbers = #tpu.dot_dimension_numbers<[1], [0], [0], [1], [0, 0, 1, 1], [], []>} : vector<8x32xbf16>, vector<32x96xbf16>, vector<8x96xf32> -> vector<8x96xf32>
    %138 = arith.addf %137, %52 : vector<8x96xf32>
    %139 = arith.truncf %135 : vector<8x32xf32> to vector<8x32xbf16>
    %cst_59 = arith.constant dense<0.000000e+00> : vector<8x96xf32>
    %140 = tpu.matmul %139, %53, %cst_59 {dimension_numbers = #tpu.dot_dimension_numbers<[1], [0], [0], [1], [0, 0, 1, 1], [], []>} : vector<8x32xbf16>, vector<32x96xbf16>, vector<8x96xf32> -> vector<8x96xf32>
    %141 = arith.addf %140, %57 : vector<8x96xf32>
    %142 = arith.truncf %112 : vector<8x32xf32> to vector<8x32xbf16>
    %cst_60 = arith.constant dense<0.000000e+00> : vector<8x96xf32>
    %143 = tpu.matmul %142, %54, %cst_60 {dimension_numbers = #tpu.dot_dimension_numbers<[1], [0], [0], [1], [0, 0, 1, 1], [], []>} : vector<8x32xbf16>, vector<32x96xbf16>, vector<8x96xf32> -> vector<8x96xf32>
    %144 = arith.addf %143, %60 : vector<8x96xf32>
    %145 = vector.extract_strided_slice %141 {offsets = [0, 0], sizes = [8, 64], strides = [1, 1]} : vector<8x96xf32> to vector<8x64xf32>
    %146 = vector.extract_strided_slice %144 {offsets = [0, 0], sizes = [8, 64], strides = [1, 1]} : vector<8x96xf32> to vector<8x64xf32>
    %147 = arith.addf %145, %146 : vector<8x64xf32>
    %148 = arith.negf %147 : vector<8x64xf32>
    %149 = math.exp %148 : vector<8x64xf32>
    %cst_61 = arith.constant 1.000000e+00 : f32
    %150 = vector.broadcast %cst_61 : f32 to vector<8x64xf32>
    %151 = arith.addf %150, %149 : vector<8x64xf32>
    %152 = arith.divf %150, %151 : vector<8x64xf32>
    %153 = vector.extract_strided_slice %152 {offsets = [0, 0], sizes = [8, 32], strides = [1, 1]} : vector<8x64xf32> to vector<8x32xf32>
    %154 = vector.extract_strided_slice %152 {offsets = [0, 32], sizes = [8, 32], strides = [1, 1]} : vector<8x64xf32> to vector<8x32xf32>
    %155 = vector.extract_strided_slice %141 {offsets = [0, 64], sizes = [8, 32], strides = [1, 1]} : vector<8x96xf32> to vector<8x32xf32>
    %156 = vector.extract_strided_slice %144 {offsets = [0, 64], sizes = [8, 32], strides = [1, 1]} : vector<8x96xf32> to vector<8x32xf32>
    %157 = arith.mulf %153, %156 : vector<8x32xf32>
    %158 = arith.addf %155, %157 : vector<8x32xf32>
    %159 = math.tanh %158 : vector<8x32xf32>
    %160 = arith.subf %112, %159 : vector<8x32xf32>
    %161 = arith.mulf %154, %160 : vector<8x32xf32>
    %162 = arith.addf %159, %161 : vector<8x32xf32>
    %c1_62 = arith.constant 1 : index
    %c0_63 = arith.constant 0 : index
    %c0_64 = arith.constant 0 : index
    %163 = vector.load %arg15[%c1_62, %c0_63, %c0_64] : memref<9x8x32xf32, #tpu.memory_space<vmem>>, vector<1x8x32xf32>
    %164 = vector.shape_cast %163 : vector<1x8x32xf32> to vector<8x32xf32>
    %165 = vector.shape_cast %162 : vector<8x32xf32> to vector<1x8x32xf32>
    tpu.vector_store %arg15[%c1_62, %c0_63, %c0_64], %165 {strides = array<i32>} : memref<9x8x32xf32, #tpu.memory_space<vmem>>, vector<1x8x32xf32>,
    %c2 = arith.constant 2 : index
    %c0_65 = arith.constant 0 : index
    %c0_66 = arith.constant 0 : index
    %166 = vector.load %arg17[%c2, %c0_65, %c0_66] : memref<9x8x96xf32, #tpu.memory_space<vmem>>, vector<1x8x96xf32>
    %167 = vector.shape_cast %166 : vector<1x8x96xf32> to vector<8x96xf32>
    %168 = vector.extract_strided_slice %167 {offsets = [0, 0], sizes = [8, 64], strides = [1, 1]} : vector<8x96xf32> to vector<8x64xf32>
    %169 = vector.extract_strided_slice %138 {offsets = [0, 0], sizes = [8, 64], strides = [1, 1]} : vector<8x96xf32> to vector<8x64xf32>
    %170 = arith.addf %168, %169 : vector<8x64xf32>
    %171 = arith.negf %170 : vector<8x64xf32>
    %172 = math.exp %171 : vector<8x64xf32>
    %cst_67 = arith.constant 1.000000e+00 : f32
    %173 = vector.broadcast %cst_67 : f32 to vector<8x64xf32>
    %174 = arith.addf %173, %172 : vector<8x64xf32>
    %175 = arith.divf %173, %174 : vector<8x64xf32>
    %176 = vector.extract_strided_slice %175 {offsets = [0, 0], sizes = [8, 32], strides = [1, 1]} : vector<8x64xf32> to vector<8x32xf32>
    %177 = vector.extract_strided_slice %175 {offsets = [0, 32], sizes = [8, 32], strides = [1, 1]} : vector<8x64xf32> to vector<8x32xf32>
    %178 = vector.extract_strided_slice %167 {offsets = [0, 64], sizes = [8, 32], strides = [1, 1]} : vector<8x96xf32> to vector<8x32xf32>
    %179 = vector.extract_strided_slice %138 {offsets = [0, 64], sizes = [8, 32], strides = [1, 1]} : vector<8x96xf32> to vector<8x32xf32>
    %180 = arith.mulf %176, %179 : vector<8x32xf32>
    %181 = arith.addf %178, %180 : vector<8x32xf32>
    %182 = math.tanh %181 : vector<8x32xf32>
    %183 = arith.subf %135, %182 : vector<8x32xf32>
    %184 = arith.mulf %177, %183 : vector<8x32xf32>
    %185 = arith.addf %182, %184 : vector<8x32xf32>
    %186 = arith.truncf %185 : vector<8x32xf32> to vector<8x32xbf16>
    %cst_68 = arith.constant dense<0.000000e+00> : vector<8x96xf32>
    %187 = tpu.matmul %186, %49, %cst_68 {dimension_numbers = #tpu.dot_dimension_numbers<[1], [0], [0], [1], [0, 0, 1, 1], [], []>} : vector<8x32xbf16>, vector<32x96xbf16>, vector<8x96xf32> -> vector<8x96xf32>
    %188 = arith.addf %187, %52 : vector<8x96xf32>
    %189 = arith.truncf %185 : vector<8x32xf32> to vector<8x32xbf16>
    %cst_69 = arith.constant dense<0.000000e+00> : vector<8x96xf32>
    %190 = tpu.matmul %189, %53, %cst_69 {dimension_numbers = #tpu.dot_dimension_numbers<[1], [0], [0], [1], [0, 0, 1, 1], [], []>} : vector<8x32xbf16>, vector<32x96xbf16>, vector<8x96xf32> -> vector<8x96xf32>
    %191 = arith.addf %190, %57 : vector<8x96xf32>
    %192 = arith.truncf %162 : vector<8x32xf32> to vector<8x32xbf16>
    %cst_70 = arith.constant dense<0.000000e+00> : vector<8x96xf32>
    %193 = tpu.matmul %192, %54, %cst_70 {dimension_numbers = #tpu.dot_dimension_numbers<[1], [0], [0], [1], [0, 0, 1, 1], [], []>} : vector<8x32xbf16>, vector<32x96xbf16>, vector<8x96xf32> -> vector<8x96xf32>
    %194 = arith.addf %193, %60 : vector<8x96xf32>
    %195 = vector.extract_strided_slice %191 {offsets = [0, 0], sizes = [8, 64], strides = [1, 1]} : vector<8x96xf32> to vector<8x64xf32>
    %196 = vector.extract_strided_slice %194 {offsets = [0, 0], sizes = [8, 64], strides = [1, 1]} : vector<8x96xf32> to vector<8x64xf32>
    %197 = arith.addf %195, %196 : vector<8x64xf32>
    %198 = arith.negf %197 : vector<8x64xf32>
    %199 = math.exp %198 : vector<8x64xf32>
    %cst_71 = arith.constant 1.000000e+00 : f32
    %200 = vector.broadcast %cst_71 : f32 to vector<8x64xf32>
    %201 = arith.addf %200, %199 : vector<8x64xf32>
    %202 = arith.divf %200, %201 : vector<8x64xf32>
    %203 = vector.extract_strided_slice %202 {offsets = [0, 0], sizes = [8, 32], strides = [1, 1]} : vector<8x64xf32> to vector<8x32xf32>
    %204 = vector.extract_strided_slice %202 {offsets = [0, 32], sizes = [8, 32], strides = [1, 1]} : vector<8x64xf32> to vector<8x32xf32>
    %205 = vector.extract_strided_slice %191 {offsets = [0, 64], sizes = [8, 32], strides = [1, 1]} : vector<8x96xf32> to vector<8x32xf32>
    %206 = vector.extract_strided_slice %194 {offsets = [0, 64], sizes = [8, 32], strides = [1, 1]} : vector<8x96xf32> to vector<8x32xf32>
    %207 = arith.mulf %203, %206 : vector<8x32xf32>
    %208 = arith.addf %205, %207 : vector<8x32xf32>
    %209 = math.tanh %208 : vector<8x32xf32>
    %210 = arith.subf %162, %209 : vector<8x32xf32>
    %211 = arith.mulf %204, %210 : vector<8x32xf32>
    %212 = arith.addf %209, %211 : vector<8x32xf32>
    %c2_72 = arith.constant 2 : index
    %c0_73 = arith.constant 0 : index
    %c0_74 = arith.constant 0 : index
    %213 = vector.load %arg15[%c2_72, %c0_73, %c0_74] : memref<9x8x32xf32, #tpu.memory_space<vmem>>, vector<1x8x32xf32>
    %214 = vector.shape_cast %213 : vector<1x8x32xf32> to vector<8x32xf32>
    %215 = vector.shape_cast %212 : vector<8x32xf32> to vector<1x8x32xf32>
    tpu.vector_store %arg15[%c2_72, %c0_73, %c0_74], %215 {strides = array<i32>} : memref<9x8x32xf32, #tpu.memory_space<vmem>>, vector<1x8x32xf32>,
    %c3 = arith.constant 3 : index
    %c0_75 = arith.constant 0 : index
    %c0_76 = arith.constant 0 : index
    %216 = vector.load %arg17[%c3, %c0_75, %c0_76] : memref<9x8x96xf32, #tpu.memory_space<vmem>>, vector<1x8x96xf32>
    %217 = vector.shape_cast %216 : vector<1x8x96xf32> to vector<8x96xf32>
    %218 = vector.extract_strided_slice %217 {offsets = [0, 0], sizes = [8, 64], strides = [1, 1]} : vector<8x96xf32> to vector<8x64xf32>
    %219 = vector.extract_strided_slice %188 {offsets = [0, 0], sizes = [8, 64], strides = [1, 1]} : vector<8x96xf32> to vector<8x64xf32>
    %220 = arith.addf %218, %219 : vector<8x64xf32>
    %221 = arith.negf %220 : vector<8x64xf32>
    %222 = math.exp %221 : vector<8x64xf32>
    %cst_77 = arith.constant 1.000000e+00 : f32
    %223 = vector.broadcast %cst_77 : f32 to vector<8x64xf32>
    %224 = arith.addf %223, %222 : vector<8x64xf32>
    %225 = arith.divf %223, %224 : vector<8x64xf32>
    %226 = vector.extract_strided_slice %225 {offsets = [0, 0], sizes = [8, 32], strides = [1, 1]} : vector<8x64xf32> to vector<8x32xf32>
    %227 = vector.extract_strided_slice %225 {offsets = [0, 32], sizes = [8, 32], strides = [1, 1]} : vector<8x64xf32> to vector<8x32xf32>
    %228 = vector.extract_strided_slice %217 {offsets = [0, 64], sizes = [8, 32], strides = [1, 1]} : vector<8x96xf32> to vector<8x32xf32>
    %229 = vector.extract_strided_slice %188 {offsets = [0, 64], sizes = [8, 32], strides = [1, 1]} : vector<8x96xf32> to vector<8x32xf32>
    %230 = arith.mulf %226, %229 : vector<8x32xf32>
    %231 = arith.addf %228, %230 : vector<8x32xf32>
    %232 = math.tanh %231 : vector<8x32xf32>
    %233 = arith.subf %185, %232 : vector<8x32xf32>
    %234 = arith.mulf %227, %233 : vector<8x32xf32>
    %235 = arith.addf %232, %234 : vector<8x32xf32>
    %236 = arith.truncf %235 : vector<8x32xf32> to vector<8x32xbf16>
    %cst_78 = arith.constant dense<0.000000e+00> : vector<8x96xf32>
    %237 = tpu.matmul %236, %49, %cst_78 {dimension_numbers = #tpu.dot_dimension_numbers<[1], [0], [0], [1], [0, 0, 1, 1], [], []>} : vector<8x32xbf16>, vector<32x96xbf16>, vector<8x96xf32> -> vector<8x96xf32>
    %238 = arith.addf %237, %52 : vector<8x96xf32>
    %239 = arith.truncf %235 : vector<8x32xf32> to vector<8x32xbf16>
    %cst_79 = arith.constant dense<0.000000e+00> : vector<8x96xf32>
    %240 = tpu.matmul %239, %53, %cst_79 {dimension_numbers = #tpu.dot_dimension_numbers<[1], [0], [0], [1], [0, 0, 1, 1], [], []>} : vector<8x32xbf16>, vector<32x96xbf16>, vector<8x96xf32> -> vector<8x96xf32>
    %241 = arith.addf %240, %57 : vector<8x96xf32>
    %242 = arith.truncf %212 : vector<8x32xf32> to vector<8x32xbf16>
    %cst_80 = arith.constant dense<0.000000e+00> : vector<8x96xf32>
    %243 = tpu.matmul %242, %54, %cst_80 {dimension_numbers = #tpu.dot_dimension_numbers<[1], [0], [0], [1], [0, 0, 1, 1], [], []>} : vector<8x32xbf16>, vector<32x96xbf16>, vector<8x96xf32> -> vector<8x96xf32>
    %244 = arith.addf %243, %60 : vector<8x96xf32>
    %245 = vector.extract_strided_slice %241 {offsets = [0, 0], sizes = [8, 64], strides = [1, 1]} : vector<8x96xf32> to vector<8x64xf32>
    %246 = vector.extract_strided_slice %244 {offsets = [0, 0], sizes = [8, 64], strides = [1, 1]} : vector<8x96xf32> to vector<8x64xf32>
    %247 = arith.addf %245, %246 : vector<8x64xf32>
    %248 = arith.negf %247 : vector<8x64xf32>
    %249 = math.exp %248 : vector<8x64xf32>
    %cst_81 = arith.constant 1.000000e+00 : f32
    %250 = vector.broadcast %cst_81 : f32 to vector<8x64xf32>
    %251 = arith.addf %250, %249 : vector<8x64xf32>
    %252 = arith.divf %250, %251 : vector<8x64xf32>
    %253 = vector.extract_strided_slice %252 {offsets = [0, 0], sizes = [8, 32], strides = [1, 1]} : vector<8x64xf32> to vector<8x32xf32>
    %254 = vector.extract_strided_slice %252 {offsets = [0, 32], sizes = [8, 32], strides = [1, 1]} : vector<8x64xf32> to vector<8x32xf32>
    %255 = vector.extract_strided_slice %241 {offsets = [0, 64], sizes = [8, 32], strides = [1, 1]} : vector<8x96xf32> to vector<8x32xf32>
    %256 = vector.extract_strided_slice %244 {offsets = [0, 64], sizes = [8, 32], strides = [1, 1]} : vector<8x96xf32> to vector<8x32xf32>
    %257 = arith.mulf %253, %256 : vector<8x32xf32>
    %258 = arith.addf %255, %257 : vector<8x32xf32>
    %259 = math.tanh %258 : vector<8x32xf32>
    %260 = arith.subf %212, %259 : vector<8x32xf32>
    %261 = arith.mulf %254, %260 : vector<8x32xf32>
    %262 = arith.addf %259, %261 : vector<8x32xf32>
    %c3_82 = arith.constant 3 : index
    %c0_83 = arith.constant 0 : index
    %c0_84 = arith.constant 0 : index
    %263 = vector.load %arg15[%c3_82, %c0_83, %c0_84] : memref<9x8x32xf32, #tpu.memory_space<vmem>>, vector<1x8x32xf32>
    %264 = vector.shape_cast %263 : vector<1x8x32xf32> to vector<8x32xf32>
    %265 = vector.shape_cast %262 : vector<8x32xf32> to vector<1x8x32xf32>
    tpu.vector_store %arg15[%c3_82, %c0_83, %c0_84], %265 {strides = array<i32>} : memref<9x8x32xf32, #tpu.memory_space<vmem>>, vector<1x8x32xf32>,
    %c4 = arith.constant 4 : index
    %c0_85 = arith.constant 0 : index
    %c0_86 = arith.constant 0 : index
    %266 = vector.load %arg17[%c4, %c0_85, %c0_86] : memref<9x8x96xf32, #tpu.memory_space<vmem>>, vector<1x8x96xf32>
    %267 = vector.shape_cast %266 : vector<1x8x96xf32> to vector<8x96xf32>
    %268 = vector.extract_strided_slice %267 {offsets = [0, 0], sizes = [8, 64], strides = [1, 1]} : vector<8x96xf32> to vector<8x64xf32>
    %269 = vector.extract_strided_slice %238 {offsets = [0, 0], sizes = [8, 64], strides = [1, 1]} : vector<8x96xf32> to vector<8x64xf32>
    %270 = arith.addf %268, %269 : vector<8x64xf32>
    %271 = arith.negf %270 : vector<8x64xf32>
    %272 = math.exp %271 : vector<8x64xf32>
    %cst_87 = arith.constant 1.000000e+00 : f32
    %273 = vector.broadcast %cst_87 : f32 to vector<8x64xf32>
    %274 = arith.addf %273, %272 : vector<8x64xf32>
    %275 = arith.divf %273, %274 : vector<8x64xf32>
    %276 = vector.extract_strided_slice %275 {offsets = [0, 0], sizes = [8, 32], strides = [1, 1]} : vector<8x64xf32> to vector<8x32xf32>
    %277 = vector.extract_strided_slice %275 {offsets = [0, 32], sizes = [8, 32], strides = [1, 1]} : vector<8x64xf32> to vector<8x32xf32>
    %278 = vector.extract_strided_slice %267 {offsets = [0, 64], sizes = [8, 32], strides = [1, 1]} : vector<8x96xf32> to vector<8x32xf32>
    %279 = vector.extract_strided_slice %238 {offsets = [0, 64], sizes = [8, 32], strides = [1, 1]} : vector<8x96xf32> to vector<8x32xf32>
    %280 = arith.mulf %276, %279 : vector<8x32xf32>
    %281 = arith.addf %278, %280 : vector<8x32xf32>
    %282 = math.tanh %281 : vector<8x32xf32>
    %283 = arith.subf %235, %282 : vector<8x32xf32>
    %284 = arith.mulf %277, %283 : vector<8x32xf32>
    %285 = arith.addf %282, %284 : vector<8x32xf32>
    %286 = arith.truncf %285 : vector<8x32xf32> to vector<8x32xbf16>
    %cst_88 = arith.constant dense<0.000000e+00> : vector<8x96xf32>
    %287 = tpu.matmul %286, %49, %cst_88 {dimension_numbers = #tpu.dot_dimension_numbers<[1], [0], [0], [1], [0, 0, 1, 1], [], []>} : vector<8x32xbf16>, vector<32x96xbf16>, vector<8x96xf32> -> vector<8x96xf32>
    %288 = arith.addf %287, %52 : vector<8x96xf32>
    %289 = arith.truncf %285 : vector<8x32xf32> to vector<8x32xbf16>
    %cst_89 = arith.constant dense<0.000000e+00> : vector<8x96xf32>
    %290 = tpu.matmul %289, %53, %cst_89 {dimension_numbers = #tpu.dot_dimension_numbers<[1], [0], [0], [1], [0, 0, 1, 1], [], []>} : vector<8x32xbf16>, vector<32x96xbf16>, vector<8x96xf32> -> vector<8x96xf32>
    %291 = arith.addf %290, %57 : vector<8x96xf32>
    %292 = arith.truncf %262 : vector<8x32xf32> to vector<8x32xbf16>
    %cst_90 = arith.constant dense<0.000000e+00> : vector<8x96xf32>
    %293 = tpu.matmul %292, %54, %cst_90 {dimension_numbers = #tpu.dot_dimension_numbers<[1], [0], [0], [1], [0, 0, 1, 1], [], []>} : vector<8x32xbf16>, vector<32x96xbf16>, vector<8x96xf32> -> vector<8x96xf32>
    %294 = arith.addf %293, %60 : vector<8x96xf32>
    %295 = vector.extract_strided_slice %291 {offsets = [0, 0], sizes = [8, 64], strides = [1, 1]} : vector<8x96xf32> to vector<8x64xf32>
    %296 = vector.extract_strided_slice %294 {offsets = [0, 0], sizes = [8, 64], strides = [1, 1]} : vector<8x96xf32> to vector<8x64xf32>
    %297 = arith.addf %295, %296 : vector<8x64xf32>
    %298 = arith.negf %297 : vector<8x64xf32>
    %299 = math.exp %298 : vector<8x64xf32>
    %cst_91 = arith.constant 1.000000e+00 : f32
    %300 = vector.broadcast %cst_91 : f32 to vector<8x64xf32>
    %301 = arith.addf %300, %299 : vector<8x64xf32>
    %302 = arith.divf %300, %301 : vector<8x64xf32>
    %303 = vector.extract_strided_slice %302 {offsets = [0, 0], sizes = [8, 32], strides = [1, 1]} : vector<8x64xf32> to vector<8x32xf32>
    %304 = vector.extract_strided_slice %302 {offsets = [0, 32], sizes = [8, 32], strides = [1, 1]} : vector<8x64xf32> to vector<8x32xf32>
    %305 = vector.extract_strided_slice %291 {offsets = [0, 64], sizes = [8, 32], strides = [1, 1]} : vector<8x96xf32> to vector<8x32xf32>
    %306 = vector.extract_strided_slice %294 {offsets = [0, 64], sizes = [8, 32], strides = [1, 1]} : vector<8x96xf32> to vector<8x32xf32>
    %307 = arith.mulf %303, %306 : vector<8x32xf32>
    %308 = arith.addf %305, %307 : vector<8x32xf32>
    %309 = math.tanh %308 : vector<8x32xf32>
    %310 = arith.subf %262, %309 : vector<8x32xf32>
    %311 = arith.mulf %304, %310 : vector<8x32xf32>
    %312 = arith.addf %309, %311 : vector<8x32xf32>
    %c4_92 = arith.constant 4 : index
    %c0_93 = arith.constant 0 : index
    %c0_94 = arith.constant 0 : index
    %313 = vector.load %arg15[%c4_92, %c0_93, %c0_94] : memref<9x8x32xf32, #tpu.memory_space<vmem>>, vector<1x8x32xf32>
    %314 = vector.shape_cast %313 : vector<1x8x32xf32> to vector<8x32xf32>
    %315 = vector.shape_cast %312 : vector<8x32xf32> to vector<1x8x32xf32>
    tpu.vector_store %arg15[%c4_92, %c0_93, %c0_94], %315 {strides = array<i32>} : memref<9x8x32xf32, #tpu.memory_space<vmem>>, vector<1x8x32xf32>,
    %c5 = arith.constant 5 : index
    %c0_95 = arith.constant 0 : index
    %c0_96 = arith.constant 0 : index
    %316 = vector.load %arg17[%c5, %c0_95, %c0_96] : memref<9x8x96xf32, #tpu.memory_space<vmem>>, vector<1x8x96xf32>
    %317 = vector.shape_cast %316 : vector<1x8x96xf32> to vector<8x96xf32>
    %318 = vector.extract_strided_slice %317 {offsets = [0, 0], sizes = [8, 64], strides = [1, 1]} : vector<8x96xf32> to vector<8x64xf32>
    %319 = vector.extract_strided_slice %288 {offsets = [0, 0], sizes = [8, 64], strides = [1, 1]} : vector<8x96xf32> to vector<8x64xf32>
    %320 = arith.addf %318, %319 : vector<8x64xf32>
    %321 = arith.negf %320 : vector<8x64xf32>
    %322 = math.exp %321 : vector<8x64xf32>
    %cst_97 = arith.constant 1.000000e+00 : f32
    %323 = vector.broadcast %cst_97 : f32 to vector<8x64xf32>
    %324 = arith.addf %323, %322 : vector<8x64xf32>
    %325 = arith.divf %323, %324 : vector<8x64xf32>
    %326 = vector.extract_strided_slice %325 {offsets = [0, 0], sizes = [8, 32], strides = [1, 1]} : vector<8x64xf32> to vector<8x32xf32>
    %327 = vector.extract_strided_slice %325 {offsets = [0, 32], sizes = [8, 32], strides = [1, 1]} : vector<8x64xf32> to vector<8x32xf32>
    %328 = vector.extract_strided_slice %317 {offsets = [0, 64], sizes = [8, 32], strides = [1, 1]} : vector<8x96xf32> to vector<8x32xf32>
    %329 = vector.extract_strided_slice %288 {offsets = [0, 64], sizes = [8, 32], strides = [1, 1]} : vector<8x96xf32> to vector<8x32xf32>
    %330 = arith.mulf %326, %329 : vector<8x32xf32>
    %331 = arith.addf %328, %330 : vector<8x32xf32>
    %332 = math.tanh %331 : vector<8x32xf32>
    %333 = arith.subf %285, %332 : vector<8x32xf32>
    %334 = arith.mulf %327, %333 : vector<8x32xf32>
    %335 = arith.addf %332, %334 : vector<8x32xf32>
    %336 = arith.truncf %335 : vector<8x32xf32> to vector<8x32xbf16>
    %cst_98 = arith.constant dense<0.000000e+00> : vector<8x96xf32>
    %337 = tpu.matmul %336, %49, %cst_98 {dimension_numbers = #tpu.dot_dimension_numbers<[1], [0], [0], [1], [0, 0, 1, 1], [], []>} : vector<8x32xbf16>, vector<32x96xbf16>, vector<8x96xf32> -> vector<8x96xf32>
    %338 = arith.addf %337, %52 : vector<8x96xf32>
    %339 = arith.truncf %335 : vector<8x32xf32> to vector<8x32xbf16>
    %cst_99 = arith.constant dense<0.000000e+00> : vector<8x96xf32>
    %340 = tpu.matmul %339, %53, %cst_99 {dimension_numbers = #tpu.dot_dimension_numbers<[1], [0], [0], [1], [0, 0, 1, 1], [], []>} : vector<8x32xbf16>, vector<32x96xbf16>, vector<8x96xf32> -> vector<8x96xf32>
    %341 = arith.addf %340, %57 : vector<8x96xf32>
    %342 = arith.truncf %312 : vector<8x32xf32> to vector<8x32xbf16>
    %cst_100 = arith.constant dense<0.000000e+00> : vector<8x96xf32>
    %343 = tpu.matmul %342, %54, %cst_100 {dimension_numbers = #tpu.dot_dimension_numbers<[1], [0], [0], [1], [0, 0, 1, 1], [], []>} : vector<8x32xbf16>, vector<32x96xbf16>, vector<8x96xf32> -> vector<8x96xf32>
    %344 = arith.addf %343, %60 : vector<8x96xf32>
    %345 = vector.extract_strided_slice %341 {offsets = [0, 0], sizes = [8, 64], strides = [1, 1]} : vector<8x96xf32> to vector<8x64xf32>
    %346 = vector.extract_strided_slice %344 {offsets = [0, 0], sizes = [8, 64], strides = [1, 1]} : vector<8x96xf32> to vector<8x64xf32>
    %347 = arith.addf %345, %346 : vector<8x64xf32>
    %348 = arith.negf %347 : vector<8x64xf32>
    %349 = math.exp %348 : vector<8x64xf32>
    %cst_101 = arith.constant 1.000000e+00 : f32
    %350 = vector.broadcast %cst_101 : f32 to vector<8x64xf32>
    %351 = arith.addf %350, %349 : vector<8x64xf32>
    %352 = arith.divf %350, %351 : vector<8x64xf32>
    %353 = vector.extract_strided_slice %352 {offsets = [0, 0], sizes = [8, 32], strides = [1, 1]} : vector<8x64xf32> to vector<8x32xf32>
    %354 = vector.extract_strided_slice %352 {offsets = [0, 32], sizes = [8, 32], strides = [1, 1]} : vector<8x64xf32> to vector<8x32xf32>
    %355 = vector.extract_strided_slice %341 {offsets = [0, 64], sizes = [8, 32], strides = [1, 1]} : vector<8x96xf32> to vector<8x32xf32>
    %356 = vector.extract_strided_slice %344 {offsets = [0, 64], sizes = [8, 32], strides = [1, 1]} : vector<8x96xf32> to vector<8x32xf32>
    %357 = arith.mulf %353, %356 : vector<8x32xf32>
    %358 = arith.addf %355, %357 : vector<8x32xf32>
    %359 = math.tanh %358 : vector<8x32xf32>
    %360 = arith.subf %312, %359 : vector<8x32xf32>
    %361 = arith.mulf %354, %360 : vector<8x32xf32>
    %362 = arith.addf %359, %361 : vector<8x32xf32>
    %c5_102 = arith.constant 5 : index
    %c0_103 = arith.constant 0 : index
    %c0_104 = arith.constant 0 : index
    %363 = vector.load %arg15[%c5_102, %c0_103, %c0_104] : memref<9x8x32xf32, #tpu.memory_space<vmem>>, vector<1x8x32xf32>
    %364 = vector.shape_cast %363 : vector<1x8x32xf32> to vector<8x32xf32>
    %365 = vector.shape_cast %362 : vector<8x32xf32> to vector<1x8x32xf32>
    tpu.vector_store %arg15[%c5_102, %c0_103, %c0_104], %365 {strides = array<i32>} : memref<9x8x32xf32, #tpu.memory_space<vmem>>, vector<1x8x32xf32>,
    %c6 = arith.constant 6 : index
    %c0_105 = arith.constant 0 : index
    %c0_106 = arith.constant 0 : index
    %366 = vector.load %arg17[%c6, %c0_105, %c0_106] : memref<9x8x96xf32, #tpu.memory_space<vmem>>, vector<1x8x96xf32>
    %367 = vector.shape_cast %366 : vector<1x8x96xf32> to vector<8x96xf32>
    %368 = vector.extract_strided_slice %367 {offsets = [0, 0], sizes = [8, 64], strides = [1, 1]} : vector<8x96xf32> to vector<8x64xf32>
    %369 = vector.extract_strided_slice %338 {offsets = [0, 0], sizes = [8, 64], strides = [1, 1]} : vector<8x96xf32> to vector<8x64xf32>
    %370 = arith.addf %368, %369 : vector<8x64xf32>
    %371 = arith.negf %370 : vector<8x64xf32>
    %372 = math.exp %371 : vector<8x64xf32>
    %cst_107 = arith.constant 1.000000e+00 : f32
    %373 = vector.broadcast %cst_107 : f32 to vector<8x64xf32>
    %374 = arith.addf %373, %372 : vector<8x64xf32>
    %375 = arith.divf %373, %374 : vector<8x64xf32>
    %376 = vector.extract_strided_slice %375 {offsets = [0, 0], sizes = [8, 32], strides = [1, 1]} : vector<8x64xf32> to vector<8x32xf32>
    %377 = vector.extract_strided_slice %375 {offsets = [0, 32], sizes = [8, 32], strides = [1, 1]} : vector<8x64xf32> to vector<8x32xf32>
    %378 = vector.extract_strided_slice %367 {offsets = [0, 64], sizes = [8, 32], strides = [1, 1]} : vector<8x96xf32> to vector<8x32xf32>
    %379 = vector.extract_strided_slice %338 {offsets = [0, 64], sizes = [8, 32], strides = [1, 1]} : vector<8x96xf32> to vector<8x32xf32>
    %380 = arith.mulf %376, %379 : vector<8x32xf32>
    %381 = arith.addf %378, %380 : vector<8x32xf32>
    %382 = math.tanh %381 : vector<8x32xf32>
    %383 = arith.subf %335, %382 : vector<8x32xf32>
    %384 = arith.mulf %377, %383 : vector<8x32xf32>
    %385 = arith.addf %382, %384 : vector<8x32xf32>
    %386 = arith.truncf %385 : vector<8x32xf32> to vector<8x32xbf16>
    %cst_108 = arith.constant dense<0.000000e+00> : vector<8x96xf32>
    %387 = tpu.matmul %386, %49, %cst_108 {dimension_numbers = #tpu.dot_dimension_numbers<[1], [0], [0], [1], [0, 0, 1, 1], [], []>} : vector<8x32xbf16>, vector<32x96xbf16>, vector<8x96xf32> -> vector<8x96xf32>
    %388 = arith.addf %387, %52 : vector<8x96xf32>
    %389 = arith.truncf %385 : vector<8x32xf32> to vector<8x32xbf16>
    %cst_109 = arith.constant dense<0.000000e+00> : vector<8x96xf32>
    %390 = tpu.matmul %389, %53, %cst_109 {dimension_numbers = #tpu.dot_dimension_numbers<[1], [0], [0], [1], [0, 0, 1, 1], [], []>} : vector<8x32xbf16>, vector<32x96xbf16>, vector<8x96xf32> -> vector<8x96xf32>
    %391 = arith.addf %390, %57 : vector<8x96xf32>
    %392 = arith.truncf %362 : vector<8x32xf32> to vector<8x32xbf16>
    %cst_110 = arith.constant dense<0.000000e+00> : vector<8x96xf32>
    %393 = tpu.matmul %392, %54, %cst_110 {dimension_numbers = #tpu.dot_dimension_numbers<[1], [0], [0], [1], [0, 0, 1, 1], [], []>} : vector<8x32xbf16>, vector<32x96xbf16>, vector<8x96xf32> -> vector<8x96xf32>
    %394 = arith.addf %393, %60 : vector<8x96xf32>
    %395 = vector.extract_strided_slice %391 {offsets = [0, 0], sizes = [8, 64], strides = [1, 1]} : vector<8x96xf32> to vector<8x64xf32>
    %396 = vector.extract_strided_slice %394 {offsets = [0, 0], sizes = [8, 64], strides = [1, 1]} : vector<8x96xf32> to vector<8x64xf32>
    %397 = arith.addf %395, %396 : vector<8x64xf32>
    %398 = arith.negf %397 : vector<8x64xf32>
    %399 = math.exp %398 : vector<8x64xf32>
    %cst_111 = arith.constant 1.000000e+00 : f32
    %400 = vector.broadcast %cst_111 : f32 to vector<8x64xf32>
    %401 = arith.addf %400, %399 : vector<8x64xf32>
    %402 = arith.divf %400, %401 : vector<8x64xf32>
    %403 = vector.extract_strided_slice %402 {offsets = [0, 0], sizes = [8, 32], strides = [1, 1]} : vector<8x64xf32> to vector<8x32xf32>
    %404 = vector.extract_strided_slice %402 {offsets = [0, 32], sizes = [8, 32], strides = [1, 1]} : vector<8x64xf32> to vector<8x32xf32>
    %405 = vector.extract_strided_slice %391 {offsets = [0, 64], sizes = [8, 32], strides = [1, 1]} : vector<8x96xf32> to vector<8x32xf32>
    %406 = vector.extract_strided_slice %394 {offsets = [0, 64], sizes = [8, 32], strides = [1, 1]} : vector<8x96xf32> to vector<8x32xf32>
    %407 = arith.mulf %403, %406 : vector<8x32xf32>
    %408 = arith.addf %405, %407 : vector<8x32xf32>
    %409 = math.tanh %408 : vector<8x32xf32>
    %410 = arith.subf %362, %409 : vector<8x32xf32>
    %411 = arith.mulf %404, %410 : vector<8x32xf32>
    %412 = arith.addf %409, %411 : vector<8x32xf32>
    %c6_112 = arith.constant 6 : index
    %c0_113 = arith.constant 0 : index
    %c0_114 = arith.constant 0 : index
    %413 = vector.load %arg15[%c6_112, %c0_113, %c0_114] : memref<9x8x32xf32, #tpu.memory_space<vmem>>, vector<1x8x32xf32>
    %414 = vector.shape_cast %413 : vector<1x8x32xf32> to vector<8x32xf32>
    %415 = vector.shape_cast %412 : vector<8x32xf32> to vector<1x8x32xf32>
    tpu.vector_store %arg15[%c6_112, %c0_113, %c0_114], %415 {strides = array<i32>} : memref<9x8x32xf32, #tpu.memory_space<vmem>>, vector<1x8x32xf32>,
    %c7 = arith.constant 7 : index
    %c0_115 = arith.constant 0 : index
    %c0_116 = arith.constant 0 : index
    %416 = vector.load %arg17[%c7, %c0_115, %c0_116] : memref<9x8x96xf32, #tpu.memory_space<vmem>>, vector<1x8x96xf32>
    %417 = vector.shape_cast %416 : vector<1x8x96xf32> to vector<8x96xf32>
    %418 = vector.extract_strided_slice %417 {offsets = [0, 0], sizes = [8, 64], strides = [1, 1]} : vector<8x96xf32> to vector<8x64xf32>
    %419 = vector.extract_strided_slice %388 {offsets = [0, 0], sizes = [8, 64], strides = [1, 1]} : vector<8x96xf32> to vector<8x64xf32>
    %420 = arith.addf %418, %419 : vector<8x64xf32>
    %421 = arith.negf %420 : vector<8x64xf32>
    %422 = math.exp %421 : vector<8x64xf32>
    %cst_117 = arith.constant 1.000000e+00 : f32
    %423 = vector.broadcast %cst_117 : f32 to vector<8x64xf32>
    %424 = arith.addf %423, %422 : vector<8x64xf32>
    %425 = arith.divf %423, %424 : vector<8x64xf32>
    %426 = vector.extract_strided_slice %425 {offsets = [0, 0], sizes = [8, 32], strides = [1, 1]} : vector<8x64xf32> to vector<8x32xf32>
    %427 = vector.extract_strided_slice %425 {offsets = [0, 32], sizes = [8, 32], strides = [1, 1]} : vector<8x64xf32> to vector<8x32xf32>
    %428 = vector.extract_strided_slice %417 {offsets = [0, 64], sizes = [8, 32], strides = [1, 1]} : vector<8x96xf32> to vector<8x32xf32>
    %429 = vector.extract_strided_slice %388 {offsets = [0, 64], sizes = [8, 32], strides = [1, 1]} : vector<8x96xf32> to vector<8x32xf32>
    %430 = arith.mulf %426, %429 : vector<8x32xf32>
    %431 = arith.addf %428, %430 : vector<8x32xf32>
    %432 = math.tanh %431 : vector<8x32xf32>
    %433 = arith.subf %385, %432 : vector<8x32xf32>
    %434 = arith.mulf %427, %433 : vector<8x32xf32>
    %435 = arith.addf %432, %434 : vector<8x32xf32>
    %436 = arith.truncf %435 : vector<8x32xf32> to vector<8x32xbf16>
    %cst_118 = arith.constant dense<0.000000e+00> : vector<8x96xf32>
    %437 = tpu.matmul %436, %49, %cst_118 {dimension_numbers = #tpu.dot_dimension_numbers<[1], [0], [0], [1], [0, 0, 1, 1], [], []>} : vector<8x32xbf16>, vector<32x96xbf16>, vector<8x96xf32> -> vector<8x96xf32>
    %438 = arith.addf %437, %52 : vector<8x96xf32>
    %439 = arith.truncf %435 : vector<8x32xf32> to vector<8x32xbf16>
    %cst_119 = arith.constant dense<0.000000e+00> : vector<8x96xf32>
    %440 = tpu.matmul %439, %53, %cst_119 {dimension_numbers = #tpu.dot_dimension_numbers<[1], [0], [0], [1], [0, 0, 1, 1], [], []>} : vector<8x32xbf16>, vector<32x96xbf16>, vector<8x96xf32> -> vector<8x96xf32>
    %441 = arith.addf %440, %57 : vector<8x96xf32>
    %442 = arith.truncf %412 : vector<8x32xf32> to vector<8x32xbf16>
    %cst_120 = arith.constant dense<0.000000e+00> : vector<8x96xf32>
    %443 = tpu.matmul %442, %54, %cst_120 {dimension_numbers = #tpu.dot_dimension_numbers<[1], [0], [0], [1], [0, 0, 1, 1], [], []>} : vector<8x32xbf16>, vector<32x96xbf16>, vector<8x96xf32> -> vector<8x96xf32>
    %444 = arith.addf %443, %60 : vector<8x96xf32>
    %445 = vector.extract_strided_slice %441 {offsets = [0, 0], sizes = [8, 64], strides = [1, 1]} : vector<8x96xf32> to vector<8x64xf32>
    %446 = vector.extract_strided_slice %444 {offsets = [0, 0], sizes = [8, 64], strides = [1, 1]} : vector<8x96xf32> to vector<8x64xf32>
    %447 = arith.addf %445, %446 : vector<8x64xf32>
    %448 = arith.negf %447 : vector<8x64xf32>
    %449 = math.exp %448 : vector<8x64xf32>
    %cst_121 = arith.constant 1.000000e+00 : f32
    %450 = vector.broadcast %cst_121 : f32 to vector<8x64xf32>
    %451 = arith.addf %450, %449 : vector<8x64xf32>
    %452 = arith.divf %450, %451 : vector<8x64xf32>
    %453 = vector.extract_strided_slice %452 {offsets = [0, 0], sizes = [8, 32], strides = [1, 1]} : vector<8x64xf32> to vector<8x32xf32>
    %454 = vector.extract_strided_slice %452 {offsets = [0, 32], sizes = [8, 32], strides = [1, 1]} : vector<8x64xf32> to vector<8x32xf32>
    %455 = vector.extract_strided_slice %441 {offsets = [0, 64], sizes = [8, 32], strides = [1, 1]} : vector<8x96xf32> to vector<8x32xf32>
    %456 = vector.extract_strided_slice %444 {offsets = [0, 64], sizes = [8, 32], strides = [1, 1]} : vector<8x96xf32> to vector<8x32xf32>
    %457 = arith.mulf %453, %456 : vector<8x32xf32>
    %458 = arith.addf %455, %457 : vector<8x32xf32>
    %459 = math.tanh %458 : vector<8x32xf32>
    %460 = arith.subf %412, %459 : vector<8x32xf32>
    %461 = arith.mulf %454, %460 : vector<8x32xf32>
    %462 = arith.addf %459, %461 : vector<8x32xf32>
    %c7_122 = arith.constant 7 : index
    %c0_123 = arith.constant 0 : index
    %c0_124 = arith.constant 0 : index
    %463 = vector.load %arg15[%c7_122, %c0_123, %c0_124] : memref<9x8x32xf32, #tpu.memory_space<vmem>>, vector<1x8x32xf32>
    %464 = vector.shape_cast %463 : vector<1x8x32xf32> to vector<8x32xf32>
    %465 = vector.shape_cast %462 : vector<8x32xf32> to vector<1x8x32xf32>
    tpu.vector_store %arg15[%c7_122, %c0_123, %c0_124], %465 {strides = array<i32>} : memref<9x8x32xf32, #tpu.memory_space<vmem>>, vector<1x8x32xf32>,
    %c8 = arith.constant 8 : index
    %c0_125 = arith.constant 0 : index
    %c0_126 = arith.constant 0 : index
    %466 = vector.load %arg17[%c8, %c0_125, %c0_126] : memref<9x8x96xf32, #tpu.memory_space<vmem>>, vector<1x8x96xf32>
    %467 = vector.shape_cast %466 : vector<1x8x96xf32> to vector<8x96xf32>
    %468 = vector.extract_strided_slice %467 {offsets = [0, 0], sizes = [8, 64], strides = [1, 1]} : vector<8x96xf32> to vector<8x64xf32>
    %469 = vector.extract_strided_slice %438 {offsets = [0, 0], sizes = [8, 64], strides = [1, 1]} : vector<8x96xf32> to vector<8x64xf32>
    %470 = arith.addf %468, %469 : vector<8x64xf32>
    %471 = arith.negf %470 : vector<8x64xf32>
    %472 = math.exp %471 : vector<8x64xf32>
    %cst_127 = arith.constant 1.000000e+00 : f32
    %473 = vector.broadcast %cst_127 : f32 to vector<8x64xf32>
    %474 = arith.addf %473, %472 : vector<8x64xf32>
    %475 = arith.divf %473, %474 : vector<8x64xf32>
    %476 = vector.extract_strided_slice %475 {offsets = [0, 0], sizes = [8, 32], strides = [1, 1]} : vector<8x64xf32> to vector<8x32xf32>
    %477 = vector.extract_strided_slice %475 {offsets = [0, 32], sizes = [8, 32], strides = [1, 1]} : vector<8x64xf32> to vector<8x32xf32>
    %478 = vector.extract_strided_slice %467 {offsets = [0, 64], sizes = [8, 32], strides = [1, 1]} : vector<8x96xf32> to vector<8x32xf32>
    %479 = vector.extract_strided_slice %438 {offsets = [0, 64], sizes = [8, 32], strides = [1, 1]} : vector<8x96xf32> to vector<8x32xf32>
    %480 = arith.mulf %476, %479 : vector<8x32xf32>
    %481 = arith.addf %478, %480 : vector<8x32xf32>
    %482 = math.tanh %481 : vector<8x32xf32>
    %483 = arith.subf %435, %482 : vector<8x32xf32>
    %484 = arith.mulf %477, %483 : vector<8x32xf32>
    %485 = arith.addf %482, %484 : vector<8x32xf32>
    %486 = arith.truncf %485 : vector<8x32xf32> to vector<8x32xbf16>
    %cst_128 = arith.constant dense<0.000000e+00> : vector<8x96xf32>
    %487 = tpu.matmul %486, %53, %cst_128 {dimension_numbers = #tpu.dot_dimension_numbers<[1], [0], [0], [1], [0, 0, 1, 1], [], []>} : vector<8x32xbf16>, vector<32x96xbf16>, vector<8x96xf32> -> vector<8x96xf32>
    %488 = arith.addf %487, %57 : vector<8x96xf32>
    %489 = arith.truncf %462 : vector<8x32xf32> to vector<8x32xbf16>
    %cst_129 = arith.constant dense<0.000000e+00> : vector<8x96xf32>
    %490 = tpu.matmul %489, %54, %cst_129 {dimension_numbers = #tpu.dot_dimension_numbers<[1], [0], [0], [1], [0, 0, 1, 1], [], []>} : vector<8x32xbf16>, vector<32x96xbf16>, vector<8x96xf32> -> vector<8x96xf32>
    %491 = arith.addf %490, %60 : vector<8x96xf32>
    %492 = vector.extract_strided_slice %488 {offsets = [0, 0], sizes = [8, 64], strides = [1, 1]} : vector<8x96xf32> to vector<8x64xf32>
    %493 = vector.extract_strided_slice %491 {offsets = [0, 0], sizes = [8, 64], strides = [1, 1]} : vector<8x96xf32> to vector<8x64xf32>
    %494 = arith.addf %492, %493 : vector<8x64xf32>
    %495 = arith.negf %494 : vector<8x64xf32>
    %496 = math.exp %495 : vector<8x64xf32>
    %cst_130 = arith.constant 1.000000e+00 : f32
    %497 = vector.broadcast %cst_130 : f32 to vector<8x64xf32>
    %498 = arith.addf %497, %496 : vector<8x64xf32>
    %499 = arith.divf %497, %498 : vector<8x64xf32>
    %500 = vector.extract_strided_slice %499 {offsets = [0, 0], sizes = [8, 32], strides = [1, 1]} : vector<8x64xf32> to vector<8x32xf32>
    %501 = vector.extract_strided_slice %499 {offsets = [0, 32], sizes = [8, 32], strides = [1, 1]} : vector<8x64xf32> to vector<8x32xf32>
    %502 = vector.extract_strided_slice %488 {offsets = [0, 64], sizes = [8, 32], strides = [1, 1]} : vector<8x96xf32> to vector<8x32xf32>
    %503 = vector.extract_strided_slice %491 {offsets = [0, 64], sizes = [8, 32], strides = [1, 1]} : vector<8x96xf32> to vector<8x32xf32>
    %504 = arith.mulf %500, %503 : vector<8x32xf32>
    %505 = arith.addf %502, %504 : vector<8x32xf32>
    %506 = math.tanh %505 : vector<8x32xf32>
    %507 = arith.subf %462, %506 : vector<8x32xf32>
    %508 = arith.mulf %501, %507 : vector<8x32xf32>
    %509 = arith.addf %506, %508 : vector<8x32xf32>
    %c8_131 = arith.constant 8 : index
    %c0_132 = arith.constant 0 : index
    %c0_133 = arith.constant 0 : index
    %510 = vector.load %arg15[%c8_131, %c0_132, %c0_133] : memref<9x8x32xf32, #tpu.memory_space<vmem>>, vector<1x8x32xf32>
    %511 = vector.shape_cast %510 : vector<1x8x32xf32> to vector<8x32xf32>
    %512 = vector.shape_cast %509 : vector<8x32xf32> to vector<1x8x32xf32>
    tpu.vector_store %arg15[%c8_131, %c0_132, %c0_133], %512 {strides = array<i32>} : memref<9x8x32xf32, #tpu.memory_space<vmem>>, vector<1x8x32xf32>,
    %c0_134 = arith.constant 0 : index
    %c0_135 = arith.constant 0 : index
    %c0_136 = arith.constant 0 : index
    %513 = vector.load %arg15[%c0_134, %c0_135, %c0_136] : memref<9x8x32xf32, #tpu.memory_space<vmem>>, vector<9x8x32xf32>
    %cst_137 = arith.constant dense<0.000000e+00> : vector<9x8xf32>
    %514 = vector.multi_reduction <add>, %513, %cst_137 [2] : vector<9x8x32xf32> to vector<9x8xf32>
    %515 = vector.shape_cast %514 : vector<9x8xf32> to vector<9x8x1xf32>
    %cst_138 = arith.constant 3.200000e+01 : f32
    %516 = vector.broadcast %cst_138 : f32 to vector<9x8x1xf32>
    %517 = arith.divf %515, %516 : vector<9x8x1xf32>
    %518 = vector.broadcast %517 : vector<9x8x1xf32> to vector<9x8x32xf32>
    %519 = arith.subf %513, %518 : vector<9x8x32xf32>
    %520 = arith.mulf %519, %519 : vector<9x8x32xf32>
    %cst_139 = arith.constant dense<0.000000e+00> : vector<9x8xf32>
    %521 = vector.multi_reduction <add>, %520, %cst_139 [2] : vector<9x8x32xf32> to vector<9x8xf32>
    %522 = vector.shape_cast %521 : vector<9x8xf32> to vector<9x8x1xf32>
    %cst_140 = arith.constant 3.100000e+01 : f32
    %523 = vector.broadcast %cst_140 : f32 to vector<9x8x1xf32>
    %524 = arith.divf %522, %523 : vector<9x8x1xf32>
    %525 = vector.broadcast %517 : vector<9x8x1xf32> to vector<9x8x32xf32>
    %526 = arith.subf %513, %525 : vector<9x8x32xf32>
    %527 = vector.shape_cast %0 : vector<1x32xf32> to vector<1x1x32xf32>
    %528 = vector.broadcast %527 : vector<1x1x32xf32> to vector<9x8x32xf32>
    %529 = arith.mulf %528, %526 : vector<9x8x32xf32>
    %530 = math.sqrt %524 : vector<9x8x1xf32>
    %cst_141 = arith.constant 9.99999997E-7 : f32
    %531 = vector.broadcast %cst_141 : f32 to vector<9x8x1xf32>
    %532 = arith.addf %530, %531 : vector<9x8x1xf32>
    %533 = vector.broadcast %532 : vector<9x8x1xf32> to vector<9x8x32xf32>
    %534 = arith.divf %529, %533 : vector<9x8x32xf32>
    %535 = vector.shape_cast %1 : vector<1x32xf32> to vector<1x1x32xf32>
    %536 = vector.broadcast %535 : vector<1x1x32xf32> to vector<9x8x32xf32>
    %537 = arith.addf %534, %536 : vector<9x8x32xf32>
    %c0_142 = arith.constant 0 : index
    %c0_143 = arith.constant 0 : index
    %c0_144 = arith.constant 0 : index
    %538 = vector.load %arg15[%c0_142, %c0_143, %c0_144] : memref<9x8x32xf32, #tpu.memory_space<vmem>>, vector<9x8x32xf32>
    tpu.vector_store %arg15[%c0_142, %c0_143, %c0_144], %537 {strides = array<i32>} : memref<9x8x32xf32, #tpu.memory_space<vmem>>, vector<9x8x32xf32>,
    %c0_145 = arith.constant 0 : index
    %c0_146 = arith.constant 0 : index
    %c0_147 = arith.constant 0 : index
    %539 = vector.load %arg16[%c0_145, %c0_146, %c0_147] : memref<2x8x32xf32, #tpu.memory_space<vmem>>, vector<1x8x32xf32>
    %540 = vector.shape_cast %539 : vector<1x8x32xf32> to vector<8x32xf32>
    %541 = vector.shape_cast %485 : vector<8x32xf32> to vector<1x8x32xf32>
    tpu.vector_store %arg16[%c0_145, %c0_146, %c0_147], %541 {strides = array<i32>} : memref<2x8x32xf32, #tpu.memory_space<vmem>>, vector<1x8x32xf32>,
    %c1_148 = arith.constant 1 : index
    %c0_149 = arith.constant 0 : index
    %c0_150 = arith.constant 0 : index
    %542 = vector.load %arg16[%c1_148, %c0_149, %c0_150] : memref<2x8x32xf32, #tpu.memory_space<vmem>>, vector<1x8x32xf32>
    %543 = vector.shape_cast %542 : vector<1x8x32xf32> to vector<8x32xf32>
    %544 = vector.shape_cast %509 : vector<8x32xf32> to vector<1x8x32xf32>
    tpu.vector_store %arg16[%c1_148, %c0_149, %c0_150], %544 {strides = array<i32>} : memref<2x8x32xf32, #tpu.memory_space<vmem>>, vector<1x8x32xf32>,
    return
  }
}

</mosaic_0001>

<bundles_post_ra>
// kernel: rnn_decoder_forward.1
= control target key start
LH: loop header
LB: loop body
LE: loop exit
PB: predicated region body
PF: predicated region fallthrough
CT: control target
= control target key end

     0   :  { %v3051_v0 = vmov 0.0   ;;  %vm3052_vm0 = vmmov 0   ;;  %vm72_vm1 = vcmask 130048   ;;  %vm117_vm2 = vcmask 261120   ;;  %s3054_s27 = smov 64   ;;  %s3056_s28 = smov 32   ;;  %s3933_s2 = inlined_call_operand.vmem [shape: bf16[16,32], index: 2, kind: input, shape index: {}]   ;;  %s3934_s1 = inlined_call_operand.vmem [shape: f32[8,16], index: 1, kind: input, shape index: {}]   ;;  %s3935_s3 = inlined_call_operand.vmem [shape: f32[1,32], index: 3, kind: input, shape index: {}]   ;;  %s3936_s6 = inlined_call_operand.vmem [shape: bf16[32,96], index: 6, kind: input, shape index: {}]   ;;  %s3937_s0 = inlined_call_operand.vmem [shape: f32[9,8,32], index: 0, kind: input, shape index: {}]   ;;  %s3938_s7 = inlined_call_operand.vmem [shape: bf16[32,96], index: 7, kind: input, shape index: {}]   ;;  %s3939_s8 = inlined_call_operand.vmem [shape: bf16[32,96], index: 8, kind: input, shape index: {}]   ;;  %s3940_s4 = inlined_call_operand.vmem [shape: f32[1,32], index: 4, kind: input, shape index: {}]   ;;  %s3941_s5 = inlined_call_operand.vmem [shape: f32[1,32], index: 5, kind: input, shape index: {}]   ;;  %s3942_s9 = inlined_call_operand.vmem [shape: f32[1,96], index: 9, kind: input, shape index: {}]   ;;  %s3943_s10 = inlined_call_operand.vmem [shape: f32[1,96], index: 10, kind: input, shape index: {}]   ;;  %s3944_s11 = inlined_call_operand.vmem [shape: bf16[32,96], index: 11, kind: input, shape index: {}]   ;;  %s3945_s12 = inlined_call_operand.vmem [shape: bf16[32,96], index: 12, kind: input, shape index: {}]   ;;  %s3946_s14 = inlined_call_operand.vmem [shape: f32[1,96], index: 14, kind: input, shape index: {}]   ;;  %s3947_s13 = inlined_call_operand.vmem [shape: f32[1,96], index: 13, kind: input, shape index: {}]   ;;  %s3948_s15 = inlined_call_operand.vmem [shape: f32[9,8,32], index: 15, kind: output, shape index: {0}]   ;;  %s3949_s16 = inlined_call_operand.vmem [shape: f32[2,8,32], index: 16, kind: output, shape index: {1}]  }
   0x1   :  { %3950 = sst [smem:[#allocation3_spill]] %s3933_s2  ;;  %2621 = vmatprep.subr.bf16.mxu0 %v3051_v0  ;;  %2623 = vmatprep.mubr.msk.bf16.mxu0 %vm3052_vm0, %v3051_v0  ;;  %v55_v2 = vld [vmem:[%s3934_s1] sm:$0xff]  ;;  %v2882_v17 = vld [vmem:[%s3936_s6 + $0x8] sm:$0xff]   ;;  %v223_v22 = vld [vmem:[%s3937_s0 + $0x10] sm:$0xff]  ;;  %v3053_v52 = vmov 0   ;;  %vm347_vm5 = vcmask 785408  }
   0x2   :  { %s3951_s23 = sld [smem:[#allocation3_spill]]  ;;  %2627 = vmatprep.subr.bf16.mxu1 %v3051_v0  ;;  %2631 = vmatprep.mubr.msk.bf16.mxu1 %vm3052_vm0, %v3051_v0  ;;  %v58_v3 = vpack.c.bf16 %v55_v2, %v55_v2  ;;  %v2451_v4 = vld [vmem:[%s3935_s3] ss:$0 sm:$0xff]  ;;  %v222_v20 = vld [vmem:[%s3937_s0 + $0x8] sm:$0xff]  ;;  %v224_v23 = vld [vmem:[%s3937_s0 + $0x18] sm:$0xff]  ;;  %s3055_s1 = smov 96  }
   0x3   :  { %v2883_v18 = vld [vmem:[%s3936_s6] sm:$0xff]   ;;  %v235_v24 = vpack.c.bf16 %v224_v23, %v223_v22  ;;  %v226_v26 = vld [vmem:[%s3937_s0 + $0x28] sm:$0xff]  ;;  %v227_v30 = vld [vmem:[%s3937_s0 + $0x30] sm:$0xff] }
   0x4   :  { %v221_v19 = vld [vmem:[%s3937_s0] sm:$0xff]  ;;  %v2884_v27 = vld [vmem:[%s3938_s7 + $0x8] sm:$0xff]   ;;  %v228_v31 = vld [vmem:[%s3937_s0 + $0x38] sm:$0xff] }
   0x5   :  { %v234_v21 = vpack.c.bf16 %v222_v20, %v221_v19  ;;  %v225_v25 = vld [vmem:[%s3937_s0 + $0x20] sm:$0xff]  ;;  %2628 = vmatpush3.bf16.msra.mxu1 %v2884_v27  ;;  %v237_v32 = vpack.c.bf16 %v228_v31, %v227_v30  ;;  %v3229_v49 = vld [vmem:[%s3939_s8 + $0x8] sm:$0xff]  }
   0x6   :  { %v236_v28 = vpack.c.bf16 %v226_v26, %v225_v25  ;;  %v2885_v29 = vld [vmem:[%s3938_s7] sm:$0xff]   ;;  %2629 = vmatprep.subr.bf16.mxu1 %v3051_v0 }
   0x7   :  { %v229_v33 = vld [vmem:[%s3937_s0 + $0x40] sm:$0xff] }
   0x8   :  { %v2881_v1 = vld [vmem:[%s3951_s23] sm:$0xff]   ;;  %v238_v34 = vpack.c.bf16 %v229_v33, %v229_v33 }
   0x9   :  { %2622 = vmatpush3.bf16.msra.mxu0 %v2881_v1  ;;  %2630 = vmatpush3.bf16.msra.mxu1 %v2885_v29  ;;  %v2454_v43 = vld [vmem:[%s3940_s4] ss:$0 sm:$0xff] }
   0xa   :  { %2635 = vmatprep.subr.bf16.mxu0 %v3051_v0  ;;  %2659 = vmatprep.subr.bf16.mxu1 %v3051_v0  ;;  %v2455_v46 = vld [vmem:[%s3941_s5] ss:$0 sm:$0xff] }
   0xb   :  { %v3236_v51 = vld [vmem:[%s3939_s8] sm:$0xff]  }
   0xc   :  { %2624 = vmatmul.mubr.msk.bf16.vlgmr.msra.gmra.mxu0 %vm72_vm1, %v58_v3  ;;  %v3260_v25 = vld [vmem:[%s3943_s10] ss:$0 sm:$0xff] }
   0xd   :  { %2639 = vmatprep.mubr.msk.bf16.mxu0 %vm3052_vm0, %v3051_v0  ;;  %2636 = vmatpush3.bf16.msra.mxu0 %v2882_v17 }
   0xe   :  { %2637 = vmatprep.subr.bf16.mxu0 %v3051_v0 }
  0x11   :  { %2638 = vmatpush3.bf16.msra.mxu0 %v2883_v18 }
  0x12   :  { %2699 = vmatprep.subr.bf16.mxu0 %v3051_v0 }
  0x14   :  { %2640 = vmatmul.mubr.msk.bf16.vlgmr.msra.gmra.mxu0 %vm117_vm2, %v234_v21 }
  0x15   :  { %2643 = vmatprep.mubr.msk.bf16.mxu0 %vm3052_vm0, %v3051_v0 }
  0x1c   :  { %2644 = vmatmul.mubr.msk.bf16.gmra.mxu0 %vm117_vm2, %v235_v24 }
  0x1d   :  { %2647 = vmatprep.mubr.msk.bf16.mxu0 %vm3052_vm0, %v3051_v0 }
  0x24   :  { %2648 = vmatmul.mubr.msk.bf16.gmra.mxu0 %vm117_vm2, %v236_v28 }
  0x25   :  { %2651 = vmatprep.mubr.msk.bf16.mxu0 %vm3052_vm0, %v3051_v0 }
  0x2c   :  { %2652 = vmatmul.mubr.msk.bf16.gmra.mxu0 %vm117_vm2, %v237_v32 }
  0x2d   :  { %2655 = vmatprep.mubr.msk.bf16.mxu0 %vm3052_vm0, %v3051_v0 }
  0x34   :  { %2656 = vmatmul.mubr.msk.bf16.gmra.mxu0 %vm117_vm2, %v238_v34 }
  0x35   :  { %2703 = vmatprep.mubr.msk.bf16.mxu0 %vm3052_vm0, %v3051_v0 }
  0xcc   :  { %v110_v5 = vpop.f32.mrf.mxu0 }
  0xcd   :  { %v111_v6 = vadd.f32 %v2451_v4, %v110_v5 }
  0xce   :  { %v2625_v7 = vpop.f32.mrf.mxu0 }
  0xcf   :  { %v116_v8 = vmax.f32 %v111_v6, 0.0 }
  0xd0   :  { %v113_v9 = vpop.f32.mrf.mxu0 }
  0xd1   :  { %v118_v10 = vsel %vm117_vm2, %v116_v8, 0.0 }
  0xd2   :  { %119 = vadd.xlane.f32.xlu0 %v118_v10  ;;  %v2626_v11 = vpop.f32.mrf.mxu0  ;;  %v2456_v10 = vld [vmem:[%s3942_s9] ss:$0 sm:$0xff] }
  0xd4   :  { %v300_v53 = vpop.f32.mrf.mxu0 }
  0xd6   :  { %v2641_v54 = vpop.f32.mrf.mxu0 }
  0xd7   :  { %v3300_v54 = vld [vmem:[%s3945_s12 + $0x8] sm:$0xff]  }
  0xd8   :  { %v303_v55 = vpop.f32.mrf.mxu0 }
  0xda   :  { %v2642_v56 = vpop.f32.mrf.mxu0 }
  0xdc   :  { %v308_v57 = vpop.f32.mrf.mxu0 }
  0xde   :  { %v2645_v58 = vpop.f32.mrf.mxu0 }
  0xe0   :  { %v311_v59 = vpop.f32.mrf.mxu0 }
  0xe2   :  { %v2646_v60 = vpop.f32.mrf.mxu0 }
  0xe4   :  { %v316_v61 = vpop.f32.mrf.mxu0 }
  0xe6   :  { %v2649_v62 = vpop.f32.mrf.mxu0 }
  0xe8   :  { %v319_v63 = vpop.f32.mrf.mxu0 }
  0xea   :  { %v2650_v1 = vpop.f32.mrf.mxu0 }
  0xeb   :  { %v3327_v1 = vld [vmem:[%s3946_s14] ss:$0 sm:$0xff] }
  0xec   :  { %v324_v2 = vpop.f32.mrf.mxu0 }
  0xee   :  { %v2653_v3 = vpop.f32.mrf.mxu0 }
  0xf0   :  { %v327_v4 = vpop.f32.mrf.mxu0 }
  0xf2   :  { %v2654_v5 = vpop.f32.mrf.mxu0 }
  0xf4   :  { %v332_v6 = vpop.f32.mrf.mxu0 }
  0xf6   :  { %v2657_v7 = vpop.f32.mrf.mxu0 }
 0x15b   :  { %v120_v12 = vpop.xlane.xlu0 %119 }
 0x15c   :  { %v122_v13 = vmul.f32 0.03125, %v120_v12 }
 0x15e   :  { %v123_v14 = vsub.f32 %v116_v8, %v122_v13  ;;  %v335_v8 = vpop.f32.mrf.mxu0 }
 0x160   :  { %v124_v15 = vmul.f32 %v123_v14, %v123_v14  ;;  %v136_v44 = vmul.f32 %v2454_v43, %v123_v14  ;;  %v2658_v9 = vpop.f32.mrf.mxu0 }
 0x162   :  { %v125_v16 = vsel %vm117_vm2, %v124_v15, 0.0 }
 0x163   :  { %126 = vadd.xlane.f32.xlu0 %v125_v16 }
 0x1ec   :  { %v127_v35 = vpop.xlane.xlu0 %126 }
 0x1ed   :  { %v129_v36 = vmul.f32 0.032258064, %v127_v35 }
 0x1ef   :  { %2892 = vrsqrt.f32 %v129_v36  ;;  %vm139_vm3 = vcmp.eq.f32.partialorder %v129_v36, inf  ;;  %v142_v39 = vand.u32 2147483648, %v129_v36  ;;  %vm141_vm4 = vcmp.eq.f32.partialorder %v129_v36, 0.0 }
 0x1fc   :  { %v2893_v37 = vpop.eup %2892 }
 0x1fd   :  { %v138_v38 = vmul.f32 %v2893_v37, %v129_v36 }
 0x1ff   :  { %v140_v40 = vsel %vm139_vm3, %v129_v36, %v138_v38 }
 0x200   :  { %v143_v41 = vsel %vm141_vm4, %v142_v39, %v140_v40 }
 0x201   :  { %v144_v42 = vadd.f32 1e-06, %v143_v41 }
 0x203   :  { %2894 = vrcp.f32 %v144_v42 }
 0x210   :  { %v2895_v45 = vpop.eup %2894 }
 0x211   :  { %v146_v47 = vmul.f32 %v2895_v45, %v136_v44  ;;  %v3275_v45 = vld [vmem:[%s3944_s11 + $0x8] sm:$0xff]  }
 0x212   :  { %2700 = vmatpush3.bf16.msra.mxu0 %v3275_v45 }
 0x213   :  { %v153_v48 = vadd.f32 %v2455_v46, %v146_v47  ;;  %2701 = vmatprep.subr.bf16.mxu0 %v3051_v0  ;;  %v3282_v46 = vld [vmem:[%s3944_s11] sm:$0xff]  }
 0x215   :  { %v158_v50 = vpack.c.bf16 %v153_v48, %v153_v48 }
 0x216   :  { %2702 = vmatpush3.bf16.msra.mxu0 %v3282_v46 }
 0x217   :  { %2632 = vmatmul.mubr.msk.bf16.vlgmr.msra.gmra.mxu1 %vm117_vm2, %v158_v50  ;;  %2715 = vmatprep.subr.bf16.mxu0 %v3051_v0 }
 0x218   :  { %2660 = vmatpush3.bf16.msra.mxu1 %v3229_v49  ;;  %2663 = vmatprep.mubr.msk.bf16.mxu1 %vm3052_vm0, %v3051_v0 }
 0x219   :  { %2661 = vmatprep.subr.bf16.mxu1 %v3051_v0 }
 0x21c   :  { %2662 = vmatpush3.bf16.msra.mxu1 %v3236_v51 }
 0x21d   :  { %2667 = vmatprep.subr.bf16.mxu1 %v3051_v0 }
 0x21f   :  { %2664 = vmatmul.mubr.bf16.vlgmr.msra.gmra.mxu1 %v3053_v52 }
 0x220   :  { %2668 = vmatpush3.bf16.msra.mxu1 %v3229_v49  ;;  %2671 = vmatprep.mubr.msk.bf16.mxu1 %vm3052_vm0, %v3051_v0 }
 0x221   :  { %2669 = vmatprep.subr.bf16.mxu1 %v3051_v0 }
 0x224   :  { %2670 = vmatpush3.bf16.msra.mxu1 %v3236_v51 }
 0x225   :  { %2675 = vmatprep.subr.bf16.mxu1 %v3051_v0 }
 0x2d7   :  { %v215_v11 = vpop.f32.mrf.mxu1 }
 0x2d8   :  { %v216_v12 = vadd.f32 %v2456_v10, %v215_v11  ;;  %v3334_v10 = vld [vmem:[%s3947_s13] ss:$0 sm:$0xff] }
 0x2d9   :  { %v2633_v13 = vpop.f32.mrf.mxu1 }
 0x2da   :  { %v346_v14 = vadd.f32 %v332_v6, %v216_v12  ;;  %v338_v15 = vadd.f32 %v300_v53, %v216_v12  ;;  %v339_v16 = vadd.f32 %v303_v55, %v216_v12  ;;  %v340_v17 = vadd.f32 %v308_v57, %v216_v12  ;;  %v3308_v55 = vld [vmem:[%s3945_s12] sm:$0xff]  }
 0x2db   :  { %v218_v18 = vpop.f32.mrf.mxu1  ;;  %v341_v19 = vadd.f32 %v311_v59, %v216_v12  ;;  %v342_v20 = vadd.f32 %v316_v61, %v216_v12  ;;  %v343_v21 = vadd.f32 %v319_v63, %v216_v12  ;;  %v344_v22 = vadd.f32 %v324_v2, %v216_v12 }
 0x2dc   :  { %356 = vst.msk [vmem:[#allocation2 + $0x40] sm:$0xff] %vm347_vm5, %v346_v14  ;;  %348 = vst.msk [vmem:[#allocation2] sm:$0xff] %vm347_vm5, %v338_v15  ;;  %v345_v23 = vadd.f32 %v327_v4, %v216_v12 }
 0x2dd   :  { %349 = vst.msk [vmem:[#allocation2 + $0x8] sm:$0xff] %vm347_vm5, %v339_v16  ;;  %350 = vst.msk [vmem:[#allocation2 + $0x10] sm:$0xff] %vm347_vm5, %v340_v17  ;;  %v2634_v24 = vpop.f32.mrf.mxu1 }
 0x2de   :  { %351 = vst.msk [vmem:[#allocation2 + $0x18] sm:$0xff] %vm347_vm5, %v341_v19  ;;  %352 = vst.msk [vmem:[#allocation2 + $0x20] sm:$0xff] %vm347_vm5, %v342_v20 }
 0x2df   :  { %353 = vst.msk [vmem:[#allocation2 + $0x28] sm:$0xff] %vm347_vm5, %v343_v21  ;;  %354 = vst.msk [vmem:[#allocation2 + $0x30] sm:$0xff] %vm347_vm5, %v344_v22  ;;  %v439_v26 = vpop.f32.mrf.mxu1 }
 0x2e0   :  { %355 = vst.msk [vmem:[#allocation2 + $0x38] sm:$0xff] %vm347_vm5, %v345_v23  ;;  %v440_v27 = vadd.f32 %v3260_v25, %v439_v26 }
 0x2e1   :  { %v2665_v28 = vpop.f32.mrf.mxu1 }
 0x2e2   :  { %454 = vrot.lane.b32.xlu1 %v440_v27, %s3054_s27 }
 0x2e3   :  { %v442_v29 = vpop.f32.mrf.mxu1  ;;  %v445_v31 = vld [vmem:[#allocation2] sm:$0xff] }
 0x2e4   :  { %v446_v32 = vadd.f32 %v445_v31, %v440_v27  ;;  %v661_v7 = vld [vmem:[#allocation2 + $0x8] sm:$0xff] }
 0x2e5   :  { %v2666_v30 = vpop.f32.mrf.mxu1 }
 0x2e6   :  { %v2472_v33 = vmul.f32 -1.442695, %v446_v32 }
 0x2e8   :  { %2896 = vpow2.f32 %v2472_v33 }
 0x2f5   :  { %v2897_v34 = vpop.eup %2896 }
 0x2f6   :  { %v450_v35 = vadd.f32 1.0, %v2897_v34 }
 0x2f8   :  { %2898 = vrcp.f32 %v450_v35 }
 0x305   :  { %v2899_v36 = vpop.eup %2898 }
 0x354   :  { %v455_v37 = vpop.permute.xlu1 %454 }
 0x355   :  { %v457_v38 = vmul.f32 %v2899_v36, %v455_v37 }
 0x357   :  { %459 = vrot.lane.b32.xlu1 %v457_v38, %s3054_s27 }
 0x3c9   :  { %v460_v39 = vpop.permute.xlu1 %459 }
 0x3ca   :  { %v462_v40 = vadd.f32 %v460_v39, %v445_v31 }
 0x3cc   :  { %2900 = vtanh.f32 %v462_v40 }
 0x3d9   :  { %v2901_v41 = vpop.eup %2900 }
 0x3da   :  { %v464_v42 = vsub.f32 0.0, %v2901_v41 }
 0x3dc   :  { %466 = vrot.lane.b32.xlu0 %v464_v42, %s3055_s1 }
 0x44e   :  { %v467_v43 = vpop.permute.xlu0 %466 }
 0x44f   :  { %v469_v44 = vmul.f32 %v2899_v36, %v467_v43 }
 0x451   :  { %471 = vrot.lane.b32.xlu1 %v469_v44, %s3056_s28 }
 0x4c3   :  { %v472_v47 = vpop.permute.xlu1 %471 }
 0x4c4   :  { %v3286_v48 = vadd.f32 %v2901_v41, %v472_v47 }
 0x4c6   :  { %v475_v50 = vpack.c.bf16 %v3286_v48, %v3286_v48 }
 0x4c8   :  { %477 = vrot.lane.b32.xlu1 %v475_v50, %s3054_s27 }
 0x53a   :  { %v478_v53 = vpop.permute.xlu1 %477 }
 0x53b   :  { %2672 = vmatmul.mubr.msk.bf16.vlgmr.msra.gmra.mxu1 %vm117_vm2, %v478_v53 }
 0x53c   :  { %2676 = vmatpush3.bf16.msra.mxu1 %v3275_v45  ;;  %2679 = vmatprep.mubr.msk.bf16.mxu1 %vm3052_vm0, %v3051_v0 }
 0x53d   :  { %2677 = vmatprep.subr.bf16.mxu1 %v3051_v0 }
 0x540   :  { %2678 = vmatpush3.bf16.msra.mxu1 %v3282_v46 }
 0x541   :  { %2683 = vmatprep.subr.bf16.mxu1 %v3051_v0 }
 0x543   :  { %2680 = vmatmul.mubr.msk.bf16.vlgmr.msra.gmra.mxu1 %vm117_vm2, %v478_v53 }
 0x544   :  { %2684 = vmatpush3.bf16.msra.mxu1 %v3300_v54  ;;  %2687 = vmatprep.mubr.msk.bf16.mxu1 %vm3052_vm0, %v3051_v0 }
 0x545   :  { %2685 = vmatprep.subr.bf16.mxu1 %v3051_v0 }
 0x548   :  { %2686 = vmatpush3.bf16.msra.mxu1 %v3308_v55 }
 0x549   :  { %2691 = vmatprep.subr.bf16.mxu1 %v3051_v0 }
 0x54b   :  { %2688 = vmatmul.mubr.bf16.vlgmr.msra.gmra.mxu1 %v3053_v52 }
 0x54c   :  { %2692 = vmatpush3.bf16.msra.mxu1 %v3229_v49  ;;  %2695 = vmatprep.mubr.msk.bf16.mxu1 %vm3052_vm0, %v3051_v0 }
 0x54d   :  { %2693 = vmatprep.subr.bf16.mxu1 %v3051_v0 }
 0x550   :  { %2694 = vmatpush3.bf16.msra.mxu1 %v3236_v51 }
 0x551   :  { %2707 = vmatprep.subr.bf16.mxu1 %v3051_v0 }
 0x5fb   :  { %v516_v56 = vpop.f32.mrf.mxu1 }
 0x5fc   :  { %v517_v57 = vadd.f32 %v3260_v25, %v516_v56 }
 0x5fd   :  { %v2673_v58 = vpop.f32.mrf.mxu1 }
 0x5fe   :  { %670 = vrot.lane.b32.xlu1 %v517_v57, %s3054_s27  ;;  %v662_v8 = vadd.f32 %v661_v7, %v517_v57 }
 0x5ff   :  { %v519_v59 = vpop.f32.mrf.mxu1 }
 0x600   :  { %v2480_v9 = vmul.f32 -1.442695, %v662_v8 }
 0x601   :  { %v2674_v60 = vpop.f32.mrf.mxu1 }
 0x602   :  { %2902 = vpow2.f32 %v2480_v9 }
 0x603   :  { %v568_v52 = vpop.f32.mrf.mxu1 }
 0x604   :  { %v569_v11 = vadd.f32 %v3334_v10, %v568_v52 }
 0x605   :  { %v2681_v61 = vpop.f32.mrf.mxu1 }
 0x607   :  { %v571_v62 = vpop.f32.mrf.mxu1 }
 0x609   :  { %v2682_v63 = vpop.f32.mrf.mxu1 }
 0x60b   :  { %v620_v2 = vpop.f32.mrf.mxu1 }
 0x60c   :  { %v621_v3 = vadd.f32 %v3327_v1, %v620_v2 }
 0x60d   :  { %v2689_v4 = vpop.f32.mrf.mxu1 }
 0x60e   :  { %634 = vrot.lane.b32.xlu1 %v621_v3, %s3054_s27  ;;  %v626_v12 = vadd.f32 %v621_v3, %v569_v11  ;;  %v861_v3 = vld [vmem:[#allocation2 + $0x10] sm:$0xff] }
 0x60f   :  { %v623_v5 = vpop.f32.mrf.mxu1  ;;  %v2903_v14 = vpop.eup %2902 }
 0x610   :  { %v2479_v13 = vmul.f32 -1.442695, %v626_v12  ;;  %v666_v15 = vadd.f32 1.0, %v2903_v14 }
 0x611   :  { %v2690_v6 = vpop.f32.mrf.mxu1 }
 0x612   :  { %2904 = vpow2.f32 %v2479_v13 }
 0x613   :  { %2906 = vrcp.f32 %v666_v15 }
 0x61f   :  { %v2905_v16 = vpop.eup %2904 }
 0x620   :  { %v630_v17 = vadd.f32 1.0, %v2905_v16  ;;  %v2907_v18 = vpop.eup %2906 }
 0x622   :  { %2908 = vrcp.f32 %v630_v17 }
 0x62f   :  { %v2909_v21 = vpop.eup %2908 }
 0x670   :  { %v671_v19 = vpop.permute.xlu1 %670 }
 0x671   :  { %v673_v20 = vmul.f32 %v2907_v18, %v671_v19 }
 0x673   :  { %675 = vrot.lane.b32.xlu1 %v673_v20, %s3054_s27 }
 0x680   :  { %v635_v22 = vpop.permute.xlu1 %634 }
 0x681   :  { %v637_v23 = vmul.f32 %v2909_v21, %v635_v22 }
 0x683   :  { %639 = vrot.lane.b32.xlu1 %v637_v23, %s3054_s27 }
 0x6e5   :  { %v676_v24 = vpop.permute.xlu1 %675 }
 0x6e6   :  { %v678_v26 = vadd.f32 %v676_v24, %v661_v7 }
 0x6e8   :  { %2910 = vtanh.f32 %v678_v26 }
 0x6f5   :  { %v2911_v27 = vpop.eup %2910  ;;  %v640_v28 = vpop.permute.xlu1 %639 }
 0x6f6   :  { %v642_v29 = vadd.f32 %v640_v28, %v569_v11  ;;  %v680_v30 = vsub.f32 %v3286_v48, %v2911_v27 }
 0x6f8   :  { %2912 = vtanh.f32 %v642_v29  ;;  %682 = vrot.lane.b32.xlu0 %v680_v30, %s3055_s1 }
 0x705   :  { %v2913_v31 = vpop.eup %2912 }
 0x706   :  { %v644_v32 = vsub.f32 0.0, %v2913_v31 }
 0x708   :  { %646 = vrot.lane.b32.xlu1 %v644_v32, %s3055_s1 }
 0x76a   :  { %v683_v33 = vpop.permute.xlu0 %682 }
 0x76b   :  { %v685_v34 = vmul.f32 %v2907_v18, %v683_v33 }
 0x76d   :  { %687 = vrot.lane.b32.xlu0 %v685_v34, %s3056_s28 }
 0x77a   :  { %v647_v35 = vpop.permute.xlu1 %646 }
 0x77b   :  { %v649_v36 = vmul.f32 %v2909_v21, %v647_v35 }
 0x77d   :  { %651 = vrot.lane.b32.xlu1 %v649_v36, %s3056_s28 }
 0x7df   :  { %v688_v37 = vpop.permute.xlu0 %687 }
 0x7e0   :  { %v3344_v38 = vadd.f32 %v2911_v27, %v688_v37 }
 0x7e2   :  { %v691_v39 = vpack.c.bf16 %v3344_v38, %v3344_v38 }
 0x7e4   :  { %693 = vrot.lane.b32.xlu0 %v691_v39, %s3054_s27 }
 0x7ef   :  { %v652_v40 = vpop.permute.xlu1 %651 }
 0x7f0   :  { %v3349_v41 = vadd.f32 %v2913_v31, %v652_v40 }
 0x7f2   :  { %v778_v42 = vpack.c.bf16 %v3349_v41, %v3349_v41 }
 0x7f4   :  { %780 = vrot.lane.b32.xlu1 %v778_v42, %s3054_s27 }
 0x856   :  { %v694_v43 = vpop.permute.xlu0 %693 }
 0x857   :  { %2696 = vmatmul.mubr.msk.bf16.vlgmr.msra.gmra.mxu1 %vm117_vm2, %v694_v43  ;;  %2704 = vmatmul.mubr.msk.bf16.vlgmr.msra.gmra.mxu0 %vm117_vm2, %v694_v43 }
 0x858   :  { %2708 = vmatpush3.bf16.msra.mxu1 %v3300_v54  ;;  %2711 = vmatprep.mubr.msk.bf16.mxu1 %vm3052_vm0, %v3051_v0 }
 0x859   :  { %2709 = vmatprep.subr.bf16.mxu1 %v3051_v0  ;;  %2716 = vmatpush3.bf16.msra.mxu0 %v3229_v49 }
 0x85a   :  { %2717 = vmatprep.subr.bf16.mxu0 %v3051_v0  ;;  %2719 = vmatprep.mubr.msk.bf16.mxu0 %vm3052_vm0, %v3051_v0 }
 0x85c   :  { %2710 = vmatpush3.bf16.msra.mxu1 %v3308_v55 }
 0x85d   :  { %2723 = vmatprep.subr.bf16.mxu1 %v3051_v0  ;;  %2718 = vmatpush3.bf16.msra.mxu0 %v3236_v51 }
 0x85e   :  { %2731 = vmatprep.subr.bf16.mxu0 %v3051_v0 }
 0x866   :  { %v781_v44 = vpop.permute.xlu1 %780 }
 0x867   :  { %2712 = vmatmul.mubr.msk.bf16.vlgmr.msra.gmra.mxu1 %vm117_vm2, %v781_v44 }
 0x868   :  { %2724 = vmatpush3.bf16.msra.mxu1 %v3275_v45  ;;  %2727 = vmatprep.mubr.msk.bf16.mxu1 %vm3052_vm0, %v3051_v0 }
 0x869   :  { %2725 = vmatprep.subr.bf16.mxu1 %v3051_v0 }
 0x86c   :  { %2726 = vmatpush3.bf16.msra.mxu1 %v3282_v46 }
 0x86d   :  { %2739 = vmatprep.subr.bf16.mxu1 %v3051_v0 }
 0x917   :  { %v732_v47 = vpop.f32.mrf.mxu1  ;;  %v772_v48 = vpop.f32.mrf.mxu0 }
 0x918   :  { %v733_v50 = vadd.f32 %v3260_v25, %v732_v47  ;;  %v773_v6 = vadd.f32 %v3334_v10, %v772_v48 }
 0x919   :  { %v2697_v53 = vpop.f32.mrf.mxu1  ;;  %v2705_v56 = vpop.f32.mrf.mxu0 }
 0x91a   :  { %870 = vrot.lane.b32.xlu0 %v733_v50, %s3054_s27  ;;  %v862_v4 = vadd.f32 %v861_v3, %v733_v50 }
 0x91b   :  { %v735_v57 = vpop.f32.mrf.mxu1  ;;  %v775_v58 = vpop.f32.mrf.mxu0 }
 0x91c   :  { %v2486_v5 = vmul.f32 -1.442695, %v862_v4 }
 0x91d   :  { %v2698_v59 = vpop.f32.mrf.mxu1  ;;  %v2706_v60 = vpop.f32.mrf.mxu0 }
 0x91e   :  { %2914 = vpow2.f32 %v2486_v5 }
 0x927   :  { %v819_v52 = vpop.f32.mrf.mxu1 }
 0x928   :  { %v820_v61 = vadd.f32 %v3327_v1, %v819_v52 }
 0x929   :  { %v2713_v62 = vpop.f32.mrf.mxu1 }
 0x92a   :  { %833 = vrot.lane.b32.xlu1 %v820_v61, %s3054_s27  ;;  %v825_v7 = vadd.f32 %v820_v61, %v773_v6  ;;  %v1061_v62 = vld [vmem:[#allocation2 + $0x18] sm:$0xff] }
 0x92b   :  { %v822_v63 = vpop.f32.mrf.mxu1  ;;  %v2915_v9 = vpop.eup %2914 }
 0x92c   :  { %v2484_v8 = vmul.f32 -1.442695, %v825_v7  ;;  %v866_v11 = vadd.f32 1.0, %v2915_v9 }
 0x92d   :  { %v2714_v2 = vpop.f32.mrf.mxu1 }
 0x92e   :  { %2916 = vpow2.f32 %v2484_v8 }
 0x92f   :  { %2918 = vrcp.f32 %v866_v11 }
 0x93b   :  { %v2917_v12 = vpop.eup %2916 }
 0x93c   :  { %v829_v13 = vadd.f32 1.0, %v2917_v12  ;;  %v2919_v14 = vpop.eup %2918 }
 0x93e   :  { %2920 = vrcp.f32 %v829_v13 }
 0x94b   :  { %v2921_v17 = vpop.eup %2920 }
 0x98c   :  { %v871_v15 = vpop.permute.xlu0 %870 }
 0x98d   :  { %v873_v16 = vmul.f32 %v2919_v14, %v871_v15 }
 0x98f   :  { %875 = vrot.lane.b32.xlu0 %v873_v16, %s3054_s27 }
 0x99c   :  { %v834_v18 = vpop.permute.xlu1 %833 }
 0x99d   :  { %v836_v19 = vmul.f32 %v2921_v17, %v834_v18 }
 0x99f   :  { %838 = vrot.lane.b32.xlu1 %v836_v19, %s3054_s27 }
 0xa01   :  { %v876_v20 = vpop.permute.xlu0 %875 }
 0xa02   :  { %v878_v21 = vadd.f32 %v876_v20, %v861_v3 }
 0xa04   :  { %2922 = vtanh.f32 %v878_v21 }
 0xa11   :  { %v2923_v22 = vpop.eup %2922  ;;  %v839_v23 = vpop.permute.xlu1 %838 }
 0xa12   :  { %v841_v24 = vadd.f32 %v839_v23, %v773_v6  ;;  %v880_v26 = vsub.f32 %v3344_v38, %v2923_v22 }
 0xa14   :  { %2924 = vtanh.f32 %v841_v24  ;;  %882 = vrot.lane.b32.xlu0 %v880_v26, %s3055_s1 }
 0xa21   :  { %v2925_v27 = vpop.eup %2924 }
 0xa22   :  { %v843_v28 = vsub.f32 %v3349_v41, %v2925_v27 }
 0xa24   :  { %845 = vrot.lane.b32.xlu1 %v843_v28, %s3055_s1 }
 0xa86   :  { %v883_v29 = vpop.permute.xlu0 %882 }
 0xa87   :  { %v885_v30 = vmul.f32 %v2919_v14, %v883_v29 }
 0xa89   :  { %887 = vrot.lane.b32.xlu0 %v885_v30, %s3056_s28 }
 0xa96   :  { %v846_v31 = vpop.permute.xlu1 %845 }
 0xa97   :  { %v848_v32 = vmul.f32 %v2921_v17, %v846_v31 }
 0xa99   :  { %850 = vrot.lane.b32.xlu1 %v848_v32, %s3056_s28 }
 0xafb   :  { %v888_v33 = vpop.permute.xlu0 %887 }
 0xafc   :  { %v3388_v34 = vadd.f32 %v2923_v22, %v888_v33 }
 0xafe   :  { %v891_v35 = vpack.c.bf16 %v3388_v34, %v3388_v34 }
 0xb00   :  { %893 = vrot.lane.b32.xlu0 %v891_v35, %s3054_s27 }
 0xb0b   :  { %v851_v36 = vpop.permute.xlu1 %850 }
 0xb0c   :  { %v3393_v37 = vadd.f32 %v2925_v27, %v851_v36 }
 0xb0e   :  { %v978_v38 = vpack.c.bf16 %v3393_v37, %v3393_v37 }
 0xb10   :  { %980 = vrot.lane.b32.xlu1 %v978_v38, %s3054_s27 }
 0xb72   :  { %v894_v39 = vpop.permute.xlu0 %893 }
 0xb73   :  { %2720 = vmatmul.mubr.msk.bf16.vlgmr.msra.gmra.mxu0 %vm117_vm2, %v894_v39  ;;  %2728 = vmatmul.mubr.msk.bf16.vlgmr.msra.gmra.mxu1 %vm117_vm2, %v894_v39 }
 0xb74   :  { %2732 = vmatpush3.bf16.msra.mxu0 %v3300_v54  ;;  %2735 = vmatprep.mubr.msk.bf16.mxu0 %vm3052_vm0, %v3051_v0 }
 0xb75   :  { %2733 = vmatprep.subr.bf16.mxu0 %v3051_v0  ;;  %2740 = vmatpush3.bf16.msra.mxu1 %v3229_v49 }
 0xb76   :  { %2741 = vmatprep.subr.bf16.mxu1 %v3051_v0  ;;  %2743 = vmatprep.mubr.msk.bf16.mxu1 %vm3052_vm0, %v3051_v0 }
 0xb78   :  { %2734 = vmatpush3.bf16.msra.mxu0 %v3308_v55 }
 0xb79   :  { %2747 = vmatprep.subr.bf16.mxu0 %v3051_v0  ;;  %2742 = vmatpush3.bf16.msra.mxu1 %v3236_v51 }
 0xb7a   :  { %2755 = vmatprep.subr.bf16.mxu1 %v3051_v0 }
 0xb82   :  { %v981_v40 = vpop.permute.xlu1 %980 }
 0xb83   :  { %2736 = vmatmul.mubr.msk.bf16.vlgmr.msra.gmra.mxu0 %vm117_vm2, %v981_v40 }
 0xb84   :  { %2748 = vmatpush3.bf16.msra.mxu0 %v3275_v45  ;;  %2751 = vmatprep.mubr.msk.bf16.mxu0 %vm3052_vm0, %v3051_v0 }
 0xb85   :  { %2749 = vmatprep.subr.bf16.mxu0 %v3051_v0 }
 0xb88   :  { %2750 = vmatpush3.bf16.msra.mxu0 %v3282_v46 }
 0xb89   :  { %2763 = vmatprep.subr.bf16.mxu0 %v3051_v0 }
 0xc33   :  { %v932_v42 = vpop.f32.mrf.mxu0  ;;  %v972_v43 = vpop.f32.mrf.mxu1 }
 0xc34   :  { %v933_v44 = vadd.f32 %v3260_v25, %v932_v42  ;;  %v973_v3 = vadd.f32 %v3334_v10, %v972_v43 }
 0xc35   :  { %v2721_v47 = vpop.f32.mrf.mxu0  ;;  %v2729_v48 = vpop.f32.mrf.mxu1 }
 0xc36   :  { %1070 = vrot.lane.b32.xlu0 %v933_v44, %s3054_s27  ;;  %v1062_v63 = vadd.f32 %v1061_v62, %v933_v44 }
 0xc37   :  { %v935_v50 = vpop.f32.mrf.mxu0  ;;  %v975_v53 = vpop.f32.mrf.mxu1 }
 0xc38   :  { %v2492_v2 = vmul.f32 -1.442695, %v1062_v63 }
 0xc39   :  { %v2722_v56 = vpop.f32.mrf.mxu0  ;;  %v2730_v57 = vpop.f32.mrf.mxu1 }
 0xc3a   :  { %2926 = vpow2.f32 %v2492_v2 }
 0xc43   :  { %v1019_v58 = vpop.f32.mrf.mxu0 }
 0xc44   :  { %v1020_v59 = vadd.f32 %v3327_v1, %v1019_v58 }
 0xc45   :  { %v2737_v60 = vpop.f32.mrf.mxu0 }
 0xc46   :  { %1033 = vrot.lane.b32.xlu1 %v1020_v59, %s3054_s27  ;;  %v1025_v4 = vadd.f32 %v1020_v59, %v973_v3 }
 0xc47   :  { %v1022_v52 = vpop.f32.mrf.mxu0  ;;  %v2927_v6 = vpop.eup %2926 }
 0xc48   :  { %v2490_v5 = vmul.f32 -1.442695, %v1025_v4  ;;  %v1066_v7 = vadd.f32 1.0, %v2927_v6  ;;  %v1261_v52 = vld [vmem:[#allocation2 + $0x20] sm:$0xff] }
 0xc49   :  { %v2738_v61 = vpop.f32.mrf.mxu0 }
 0xc4a   :  { %2928 = vpow2.f32 %v2490_v5 }
 0xc4b   :  { %2930 = vrcp.f32 %v1066_v7 }
 0xc57   :  { %v2929_v8 = vpop.eup %2928 }
 0xc58   :  { %v1029_v9 = vadd.f32 1.0, %v2929_v8  ;;  %v2931_v11 = vpop.eup %2930 }
 0xc5a   :  { %2932 = vrcp.f32 %v1029_v9 }
 0xc67   :  { %v2933_v14 = vpop.eup %2932 }
 0xca8   :  { %v1071_v12 = vpop.permute.xlu0 %1070 }
 0xca9   :  { %v1073_v13 = vmul.f32 %v2931_v11, %v1071_v12 }
 0xcab   :  { %1075 = vrot.lane.b32.xlu0 %v1073_v13, %s3054_s27 }
 0xcb8   :  { %v1034_v15 = vpop.permute.xlu1 %1033 }
 0xcb9   :  { %v1036_v16 = vmul.f32 %v2933_v14, %v1034_v15 }
 0xcbb   :  { %1038 = vrot.lane.b32.xlu1 %v1036_v16, %s3054_s27 }
 0xd1d   :  { %v1076_v17 = vpop.permute.xlu0 %1075 }
 0xd1e   :  { %v1078_v18 = vadd.f32 %v1076_v17, %v1061_v62 }
 0xd20   :  { %2934 = vtanh.f32 %v1078_v18 }
 0xd2d   :  { %v2935_v19 = vpop.eup %2934  ;;  %v1039_v20 = vpop.permute.xlu1 %1038 }
 0xd2e   :  { %v1041_v21 = vadd.f32 %v1039_v20, %v973_v3  ;;  %v1080_v22 = vsub.f32 %v3388_v34, %v2935_v19 }
 0xd30   :  { %2936 = vtanh.f32 %v1041_v21  ;;  %1082 = vrot.lane.b32.xlu0 %v1080_v22, %s3055_s1 }
 0xd3d   :  { %v2937_v23 = vpop.eup %2936 }
 0xd3e   :  { %v1043_v24 = vsub.f32 %v3393_v37, %v2937_v23 }
 0xd40   :  { %1045 = vrot.lane.b32.xlu1 %v1043_v24, %s3055_s1 }
 0xda2   :  { %v1083_v26 = vpop.permute.xlu0 %1082 }
 0xda3   :  { %v1085_v27 = vmul.f32 %v2931_v11, %v1083_v26 }
 0xda5   :  { %1087 = vrot.lane.b32.xlu0 %v1085_v27, %s3056_s28 }
 0xdb2   :  { %v1046_v28 = vpop.permute.xlu1 %1045 }
 0xdb3   :  { %v1048_v29 = vmul.f32 %v2933_v14, %v1046_v28 }
 0xdb5   :  { %1050 = vrot.lane.b32.xlu1 %v1048_v29, %s3056_s28 }
 0xe17   :  { %v1088_v30 = vpop.permute.xlu0 %1087 }
 0xe18   :  { %v3432_v31 = vadd.f32 %v2935_v19, %v1088_v30 }
 0xe1a   :  { %v1091_v32 = vpack.c.bf16 %v3432_v31, %v3432_v31 }
 0xe1c   :  { %1093 = vrot.lane.b32.xlu0 %v1091_v32, %s3054_s27 }
 0xe27   :  { %v1051_v33 = vpop.permute.xlu1 %1050 }
 0xe28   :  { %v3437_v34 = vadd.f32 %v2937_v23, %v1051_v33 }
 0xe2a   :  { %v1178_v35 = vpack.c.bf16 %v3437_v34, %v3437_v34 }
 0xe2c   :  { %1180 = vrot.lane.b32.xlu1 %v1178_v35, %s3054_s27 }
 0xe8e   :  { %v1094_v36 = vpop.permute.xlu0 %1093 }
 0xe8f   :  { %2744 = vmatmul.mubr.msk.bf16.vlgmr.msra.gmra.mxu1 %vm117_vm2, %v1094_v36  ;;  %2752 = vmatmul.mubr.msk.bf16.vlgmr.msra.gmra.mxu0 %vm117_vm2, %v1094_v36 }
 0xe90   :  { %2756 = vmatpush3.bf16.msra.mxu1 %v3300_v54  ;;  %2759 = vmatprep.mubr.msk.bf16.mxu1 %vm3052_vm0, %v3051_v0 }
 0xe91   :  { %2757 = vmatprep.subr.bf16.mxu1 %v3051_v0  ;;  %2764 = vmatpush3.bf16.msra.mxu0 %v3229_v49 }
 0xe92   :  { %2765 = vmatprep.subr.bf16.mxu0 %v3051_v0  ;;  %2767 = vmatprep.mubr.msk.bf16.mxu0 %vm3052_vm0, %v3051_v0 }
 0xe94   :  { %2758 = vmatpush3.bf16.msra.mxu1 %v3308_v55 }
 0xe95   :  { %2771 = vmatprep.subr.bf16.mxu1 %v3051_v0  ;;  %2766 = vmatpush3.bf16.msra.mxu0 %v3236_v51 }
 0xe96   :  { %2779 = vmatprep.subr.bf16.mxu0 %v3051_v0 }
 0xe9e   :  { %v1181_v38 = vpop.permute.xlu1 %1180 }
 0xe9f   :  { %2760 = vmatmul.mubr.msk.bf16.vlgmr.msra.gmra.mxu1 %vm117_vm2, %v1181_v38 }
 0xea0   :  { %2772 = vmatpush3.bf16.msra.mxu1 %v3275_v45  ;;  %2775 = vmatprep.mubr.msk.bf16.mxu1 %vm3052_vm0, %v3051_v0 }
 0xea1   :  { %2773 = vmatprep.subr.bf16.mxu1 %v3051_v0 }
 0xea4   :  { %2774 = vmatpush3.bf16.msra.mxu1 %v3282_v46 }
 0xea5   :  { %2787 = vmatprep.subr.bf16.mxu1 %v3051_v0 }
 0xf4f   :  { %v1132_v39 = vpop.f32.mrf.mxu1  ;;  %v1172_v40 = vpop.f32.mrf.mxu0 }
 0xf50   :  { %v1133_v42 = vadd.f32 %v3260_v25, %v1132_v39  ;;  %v1173_v63 = vadd.f32 %v3334_v10, %v1172_v40 }
 0xf51   :  { %v2745_v43 = vpop.f32.mrf.mxu1  ;;  %v2753_v44 = vpop.f32.mrf.mxu0 }
 0xf52   :  { %1270 = vrot.lane.b32.xlu0 %v1133_v42, %s3054_s27  ;;  %v1262_v61 = vadd.f32 %v1261_v52, %v1133_v42 }
 0xf53   :  { %v1135_v47 = vpop.f32.mrf.mxu1  ;;  %v1175_v48 = vpop.f32.mrf.mxu0 }
 0xf54   :  { %v2498_v62 = vmul.f32 -1.442695, %v1262_v61 }
 0xf55   :  { %v2746_v50 = vpop.f32.mrf.mxu1  ;;  %v2754_v53 = vpop.f32.mrf.mxu0 }
 0xf56   :  { %2938 = vpow2.f32 %v2498_v62 }
 0xf5f   :  { %v1219_v56 = vpop.f32.mrf.mxu1 }
 0xf60   :  { %v1220_v57 = vadd.f32 %v3327_v1, %v1219_v56 }
 0xf61   :  { %v2761_v58 = vpop.f32.mrf.mxu1 }
 0xf62   :  { %1233 = vrot.lane.b32.xlu1 %v1220_v57, %s3054_s27  ;;  %v1225_v2 = vadd.f32 %v1220_v57, %v1173_v63  ;;  %v1461_v58 = vld [vmem:[#allocation2 + $0x28] sm:$0xff] }
 0xf63   :  { %v1222_v59 = vpop.f32.mrf.mxu1  ;;  %v2939_v4 = vpop.eup %2938 }
 0xf64   :  { %v2496_v3 = vmul.f32 -1.442695, %v1225_v2  ;;  %v1266_v5 = vadd.f32 1.0, %v2939_v4 }
 0xf65   :  { %v2762_v60 = vpop.f32.mrf.mxu1 }
 0xf66   :  { %2940 = vpow2.f32 %v2496_v3 }
 0xf67   :  { %2942 = vrcp.f32 %v1266_v5 }
 0xf73   :  { %v2941_v6 = vpop.eup %2940 }
 0xf74   :  { %v1229_v7 = vadd.f32 1.0, %v2941_v6  ;;  %v2943_v8 = vpop.eup %2942 }
 0xf76   :  { %2944 = vrcp.f32 %v1229_v7 }
 0xf83   :  { %v2945_v12 = vpop.eup %2944 }
 0xfc4   :  { %v1271_v9 = vpop.permute.xlu0 %1270 }
 0xfc5   :  { %v1273_v11 = vmul.f32 %v2943_v8, %v1271_v9 }
 0xfc7   :  { %1275 = vrot.lane.b32.xlu0 %v1273_v11, %s3054_s27 }
 0xfd4   :  { %v1234_v13 = vpop.permute.xlu1 %1233 }
 0xfd5   :  { %v1236_v14 = vmul.f32 %v2945_v12, %v1234_v13 }
 0xfd7   :  { %1238 = vrot.lane.b32.xlu1 %v1236_v14, %s3054_s27 }
0x1039   :  { %v1276_v15 = vpop.permute.xlu0 %1275 }
0x103a   :  { %v1278_v16 = vadd.f32 %v1276_v15, %v1261_v52 }
0x103c   :  { %2946 = vtanh.f32 %v1278_v16 }
0x1049   :  { %v2947_v17 = vpop.eup %2946  ;;  %v1239_v18 = vpop.permute.xlu1 %1238 }
0x104a   :  { %v1241_v19 = vadd.f32 %v1239_v18, %v1173_v63  ;;  %v1280_v20 = vsub.f32 %v3432_v31, %v2947_v17 }
0x104c   :  { %2948 = vtanh.f32 %v1241_v19  ;;  %1282 = vrot.lane.b32.xlu0 %v1280_v20, %s3055_s1 }
0x1059   :  { %v2949_v21 = vpop.eup %2948 }
0x105a   :  { %v1243_v22 = vsub.f32 %v3437_v34, %v2949_v21 }
0x105c   :  { %1245 = vrot.lane.b32.xlu1 %v1243_v22, %s3055_s1 }
0x10be   :  { %v1283_v23 = vpop.permute.xlu0 %1282 }
0x10bf   :  { %v1285_v24 = vmul.f32 %v2943_v8, %v1283_v23 }
0x10c1   :  { %1287 = vrot.lane.b32.xlu0 %v1285_v24, %s3056_s28 }
0x10ce   :  { %v1246_v26 = vpop.permute.xlu1 %1245 }
0x10cf   :  { %v1248_v27 = vmul.f32 %v2945_v12, %v1246_v26 }
0x10d1   :  { %1250 = vrot.lane.b32.xlu1 %v1248_v27, %s3056_s28 }
0x1133   :  { %v1288_v28 = vpop.permute.xlu0 %1287 }
0x1134   :  { %v3476_v29 = vadd.f32 %v2947_v17, %v1288_v28 }
0x1136   :  { %v1291_v30 = vpack.c.bf16 %v3476_v29, %v3476_v29 }
0x1138   :  { %1293 = vrot.lane.b32.xlu0 %v1291_v30, %s3054_s27 }
0x1143   :  { %v1251_v31 = vpop.permute.xlu1 %1250 }
0x1144   :  { %v3481_v32 = vadd.f32 %v2949_v21, %v1251_v31 }
0x1146   :  { %v1378_v33 = vpack.c.bf16 %v3481_v32, %v3481_v32 }
0x1148   :  { %1380 = vrot.lane.b32.xlu1 %v1378_v33, %s3054_s27  ;;  %v3539_v33 = vld [vmem:[%s3939_s8 + $0x8] sm:$0xff]  }
0x11aa   :  { %v1294_v35 = vpop.permute.xlu0 %1293 }
0x11ab   :  { %2768 = vmatmul.mubr.msk.bf16.vlgmr.msra.gmra.mxu0 %vm117_vm2, %v1294_v35  ;;  %2776 = vmatmul.mubr.msk.bf16.vlgmr.msra.gmra.mxu1 %vm117_vm2, %v1294_v35  ;;  %v3550_v35 = vld [vmem:[%s3939_s8] sm:$0xff]  }
0x11ac   :  { %2780 = vmatpush3.bf16.msra.mxu0 %v3300_v54  ;;  %2783 = vmatprep.mubr.msk.bf16.mxu0 %vm3052_vm0, %v3051_v0 }
0x11ad   :  { %2781 = vmatprep.subr.bf16.mxu0 %v3051_v0  ;;  %2788 = vmatpush3.bf16.msra.mxu1 %v3229_v49 }
0x11ae   :  { %2789 = vmatprep.subr.bf16.mxu1 %v3051_v0  ;;  %2791 = vmatprep.mubr.msk.bf16.mxu1 %vm3052_vm0, %v3051_v0 }
0x11b0   :  { %2782 = vmatpush3.bf16.msra.mxu0 %v3308_v55 }
0x11b1   :  { %2795 = vmatprep.subr.bf16.mxu0 %v3051_v0  ;;  %2790 = vmatpush3.bf16.msra.mxu1 %v3236_v51 }
0x11b2   :  { %2803 = vmatprep.subr.bf16.mxu1 %v3051_v0 }
0x11ba   :  { %v1381_v36 = vpop.permute.xlu1 %1380 }
0x11bb   :  { %2784 = vmatmul.mubr.msk.bf16.vlgmr.msra.gmra.mxu0 %vm117_vm2, %v1381_v36 }
0x11bc   :  { %2796 = vmatpush3.bf16.msra.mxu0 %v3275_v45  ;;  %2799 = vmatprep.mubr.msk.bf16.mxu0 %vm3052_vm0, %v3051_v0 }
0x11bd   :  { %2797 = vmatprep.subr.bf16.mxu0 %v3051_v0 }
0x11c0   :  { %2798 = vmatpush3.bf16.msra.mxu0 %v3282_v46 }
0x11c1   :  { %2811 = vmatprep.subr.bf16.mxu0 %v3051_v0 }
0x126b   :  { %v1332_v49 = vpop.f32.mrf.mxu0  ;;  %v1372_v38 = vpop.f32.mrf.mxu1 }
0x126c   :  { %v1333_v51 = vadd.f32 %v3260_v25, %v1332_v49  ;;  %v1373_v52 = vadd.f32 %v3334_v10, %v1372_v38 }
0x126d   :  { %v2769_v39 = vpop.f32.mrf.mxu0  ;;  %v2777_v40 = vpop.f32.mrf.mxu1 }
0x126e   :  { %1470 = vrot.lane.b32.xlu0 %v1333_v51, %s3054_s27  ;;  %v1462_v59 = vadd.f32 %v1461_v58, %v1333_v51 }
0x126f   :  { %v1335_v42 = vpop.f32.mrf.mxu0  ;;  %v1375_v43 = vpop.f32.mrf.mxu1 }
0x1270   :  { %v2504_v60 = vmul.f32 -1.442695, %v1462_v59 }
0x1271   :  { %v2770_v44 = vpop.f32.mrf.mxu0  ;;  %v2778_v47 = vpop.f32.mrf.mxu1 }
0x1272   :  { %2950 = vpow2.f32 %v2504_v60 }
0x127b   :  { %v1419_v48 = vpop.f32.mrf.mxu0 }
0x127c   :  { %v1420_v50 = vadd.f32 %v3327_v1, %v1419_v48 }
0x127d   :  { %v2785_v53 = vpop.f32.mrf.mxu0 }
0x127e   :  { %1433 = vrot.lane.b32.xlu1 %v1420_v50, %s3054_s27  ;;  %v1425_v61 = vadd.f32 %v1420_v50, %v1373_v52 }
0x127f   :  { %v1422_v56 = vpop.f32.mrf.mxu0  ;;  %v2951_v63 = vpop.eup %2950 }
0x1280   :  { %v2502_v62 = vmul.f32 -1.442695, %v1425_v61  ;;  %v1466_v2 = vadd.f32 1.0, %v2951_v63  ;;  %v1661_v56 = vld [vmem:[#allocation2 + $0x30] sm:$0xff] }
0x1281   :  { %v2786_v57 = vpop.f32.mrf.mxu0 }
0x1282   :  { %2952 = vpow2.f32 %v2502_v62 }
0x1283   :  { %2954 = vrcp.f32 %v1466_v2 }
0x128f   :  { %v2953_v3 = vpop.eup %2952 }
0x1290   :  { %v1429_v4 = vadd.f32 1.0, %v2953_v3  ;;  %v2955_v5 = vpop.eup %2954 }
0x1292   :  { %2956 = vrcp.f32 %v1429_v4 }
0x129f   :  { %v2957_v8 = vpop.eup %2956 }
0x12e0   :  { %v1471_v6 = vpop.permute.xlu0 %1470 }
0x12e1   :  { %v1473_v7 = vmul.f32 %v2955_v5, %v1471_v6 }
0x12e3   :  { %1475 = vrot.lane.b32.xlu0 %v1473_v7, %s3054_s27 }
0x12f0   :  { %v1434_v9 = vpop.permute.xlu1 %1433 }
0x12f1   :  { %v1436_v11 = vmul.f32 %v2957_v8, %v1434_v9 }
0x12f3   :  { %1438 = vrot.lane.b32.xlu1 %v1436_v11, %s3054_s27 }
0x1355   :  { %v1476_v12 = vpop.permute.xlu0 %1475 }
0x1356   :  { %v1478_v13 = vadd.f32 %v1476_v12, %v1461_v58 }
0x1358   :  { %2958 = vtanh.f32 %v1478_v13 }
0x1365   :  { %v2959_v14 = vpop.eup %2958  ;;  %v1439_v15 = vpop.permute.xlu1 %1438 }
0x1366   :  { %v1441_v16 = vadd.f32 %v1439_v15, %v1373_v52  ;;  %v1480_v17 = vsub.f32 %v3476_v29, %v2959_v14 }
0x1368   :  { %2960 = vtanh.f32 %v1441_v16  ;;  %1482 = vrot.lane.b32.xlu0 %v1480_v17, %s3055_s1 }
0x1375   :  { %v2961_v18 = vpop.eup %2960 }
0x1376   :  { %v1443_v19 = vsub.f32 %v3481_v32, %v2961_v18 }
0x1378   :  { %1445 = vrot.lane.b32.xlu1 %v1443_v19, %s3055_s1 }
0x13da   :  { %v1483_v20 = vpop.permute.xlu0 %1482 }
0x13db   :  { %v1485_v21 = vmul.f32 %v2955_v5, %v1483_v20 }
0x13dd   :  { %1487 = vrot.lane.b32.xlu0 %v1485_v21, %s3056_s28 }
0x13ea   :  { %v1446_v22 = vpop.permute.xlu1 %1445 }
0x13eb   :  { %v1448_v23 = vmul.f32 %v2957_v8, %v1446_v22 }
0x13ed   :  { %1450 = vrot.lane.b32.xlu1 %v1448_v23, %s3056_s28 }
0x144f   :  { %v1488_v24 = vpop.permute.xlu0 %1487 }
0x1450   :  { %v3520_v26 = vadd.f32 %v2959_v14, %v1488_v24 }
0x1452   :  { %v1491_v27 = vpack.c.bf16 %v3520_v26, %v3520_v26 }
0x1454   :  { %1493 = vrot.lane.b32.xlu0 %v1491_v27, %s3054_s27 }
0x145f   :  { %v1451_v28 = vpop.permute.xlu1 %1450 }
0x1460   :  { %v3525_v29 = vadd.f32 %v2961_v18, %v1451_v28 }
0x1462   :  { %v1578_v30 = vpack.c.bf16 %v3525_v29, %v3525_v29 }
0x1464   :  { %1580 = vrot.lane.b32.xlu1 %v1578_v30, %s3054_s27  ;;  %v3602_v30 = vld [vmem:[%s3944_s11 + $0x8] sm:$0xff]  }
0x14c6   :  { %v1494_v31 = vpop.permute.xlu0 %1493 }
0x14c7   :  { %2792 = vmatmul.mubr.msk.bf16.vlgmr.msra.gmra.mxu1 %vm117_vm2, %v1494_v31  ;;  %2800 = vmatmul.mubr.msk.bf16.vlgmr.msra.gmra.mxu0 %vm117_vm2, %v1494_v31 }
0x14c8   :  { %2804 = vmatpush3.bf16.msra.mxu1 %v3300_v54  ;;  %2807 = vmatprep.mubr.msk.bf16.mxu1 %vm3052_vm0, %v3051_v0 }
0x14c9   :  { %2805 = vmatprep.subr.bf16.mxu1 %v3051_v0  ;;  %2812 = vmatpush3.bf16.msra.mxu0 %v3539_v33 }
0x14ca   :  { %2813 = vmatprep.subr.bf16.mxu0 %v3051_v0  ;;  %2815 = vmatprep.mubr.msk.bf16.mxu0 %vm3052_vm0, %v3051_v0 }
0x14cc   :  { %2806 = vmatpush3.bf16.msra.mxu1 %v3308_v55 }
0x14cd   :  { %2819 = vmatprep.subr.bf16.mxu1 %v3051_v0  ;;  %2814 = vmatpush3.bf16.msra.mxu0 %v3550_v35 }
0x14ce   :  { %2827 = vmatprep.subr.bf16.mxu0 %v3051_v0 }
0x14d6   :  { %v1581_v36 = vpop.permute.xlu1 %1580 }
0x14d7   :  { %2808 = vmatmul.mubr.msk.bf16.vlgmr.msra.gmra.mxu1 %vm117_vm2, %v1581_v36 }
0x14d8   :  { %2820 = vmatpush3.bf16.msra.mxu1 %v3275_v45  ;;  %2823 = vmatprep.mubr.msk.bf16.mxu1 %vm3052_vm0, %v3051_v0 }
0x14d9   :  { %2821 = vmatprep.subr.bf16.mxu1 %v3051_v0 }
0x14dc   :  { %2822 = vmatpush3.bf16.msra.mxu1 %v3282_v46 }
0x14dd   :  { %2835 = vmatprep.subr.bf16.mxu1 %v3051_v0 }
0x1587   :  { %v1532_v49 = vpop.f32.mrf.mxu1  ;;  %v1572_v38 = vpop.f32.mrf.mxu0 }
0x1588   :  { %v1533_v51 = vadd.f32 %v3260_v25, %v1532_v49  ;;  %v1573_v25 = vadd.f32 %v3334_v10, %v1572_v38 }
0x1589   :  { %v2793_v39 = vpop.f32.mrf.mxu1  ;;  %v2801_v40 = vpop.f32.mrf.mxu0 }
0x158a   :  { %1670 = vrot.lane.b32.xlu0 %v1533_v51, %s3054_s27  ;;  %v1662_v57 = vadd.f32 %v1661_v56, %v1533_v51 }
0x158b   :  { %v1535_v42 = vpop.f32.mrf.mxu1  ;;  %v1575_v43 = vpop.f32.mrf.mxu0 }
0x158c   :  { %v2510_v58 = vmul.f32 -1.442695, %v1662_v57 }
0x158d   :  { %v2794_v45 = vpop.f32.mrf.mxu1  ;;  %v2802_v44 = vpop.f32.mrf.mxu0 }
0x158e   :  { %2962 = vpow2.f32 %v2510_v58 }
0x1597   :  { %v1619_v47 = vpop.f32.mrf.mxu1 }
0x1598   :  { %v1620_v48 = vadd.f32 %v3327_v1, %v1619_v47 }
0x1599   :  { %v2809_v50 = vpop.f32.mrf.mxu1 }
0x159a   :  { %1633 = vrot.lane.b32.xlu1 %v1620_v48, %s3054_s27  ;;  %v1625_v59 = vadd.f32 %v1620_v48, %v1573_v25  ;;  %v1861_v50 = vld [vmem:[#allocation2 + $0x38] sm:$0xff] }
0x159b   :  { %v1622_v46 = vpop.f32.mrf.mxu1  ;;  %v2963_v52 = vpop.eup %2962 }
0x159c   :  { %v2508_v60 = vmul.f32 -1.442695, %v1625_v59  ;;  %v1666_v61 = vadd.f32 1.0, %v2963_v52 }
0x159d   :  { %v2810_v53 = vpop.f32.mrf.mxu1 }
0x159e   :  { %2964 = vpow2.f32 %v2508_v60 }
0x159f   :  { %2966 = vrcp.f32 %v1666_v61 }
0x15ab   :  { %v2965_v62 = vpop.eup %2964 }
0x15ac   :  { %v1629_v63 = vadd.f32 1.0, %v2965_v62  ;;  %v2967_v2 = vpop.eup %2966 }
0x15ae   :  { %2968 = vrcp.f32 %v1629_v63 }
0x15bb   :  { %v2969_v5 = vpop.eup %2968 }
0x15fc   :  { %v1671_v3 = vpop.permute.xlu0 %1670 }
0x15fd   :  { %v1673_v4 = vmul.f32 %v2967_v2, %v1671_v3 }
0x15ff   :  { %1675 = vrot.lane.b32.xlu0 %v1673_v4, %s3054_s27 }
0x160c   :  { %v1634_v6 = vpop.permute.xlu1 %1633 }
0x160d   :  { %v1636_v7 = vmul.f32 %v2969_v5, %v1634_v6 }
0x160f   :  { %1638 = vrot.lane.b32.xlu1 %v1636_v7, %s3054_s27 }
0x1671   :  { %v1676_v8 = vpop.permute.xlu0 %1675 }
0x1672   :  { %v1678_v9 = vadd.f32 %v1676_v8, %v1661_v56 }
0x1674   :  { %2970 = vtanh.f32 %v1678_v9 }
0x1681   :  { %v2971_v11 = vpop.eup %2970  ;;  %v1639_v12 = vpop.permute.xlu1 %1638 }
0x1682   :  { %v1641_v13 = vadd.f32 %v1639_v12, %v1573_v25  ;;  %v1680_v14 = vsub.f32 %v3520_v26, %v2971_v11 }
0x1684   :  { %2972 = vtanh.f32 %v1641_v13  ;;  %1682 = vrot.lane.b32.xlu0 %v1680_v14, %s3055_s1 }
0x1691   :  { %v2973_v15 = vpop.eup %2972 }
0x1692   :  { %v1643_v16 = vsub.f32 %v3525_v29, %v2973_v15 }
0x1694   :  { %1645 = vrot.lane.b32.xlu1 %v1643_v16, %s3055_s1 }
0x16f6   :  { %v1683_v17 = vpop.permute.xlu0 %1682 }
0x16f7   :  { %v1685_v18 = vmul.f32 %v2967_v2, %v1683_v17 }
0x16f9   :  { %1687 = vrot.lane.b32.xlu0 %v1685_v18, %s3056_s28 }
0x1706   :  { %v1646_v19 = vpop.permute.xlu1 %1645 }
0x1707   :  { %v1648_v20 = vmul.f32 %v2969_v5, %v1646_v19 }
0x1709   :  { %1650 = vrot.lane.b32.xlu1 %v1648_v20, %s3056_s28 }
0x176b   :  { %v1688_v21 = vpop.permute.xlu0 %1687 }
0x176c   :  { %v3574_v22 = vadd.f32 %v2971_v11, %v1688_v21 }
0x176e   :  { %v1691_v23 = vpack.c.bf16 %v3574_v22, %v3574_v22 }
0x1770   :  { %1693 = vrot.lane.b32.xlu0 %v1691_v23, %s3054_s27  ;;  %v3045_v23 = vld [vmem:[%s3945_s12 + $0x8] sm:$0xff]  }
0x177b   :  { %v1651_v24 = vpop.permute.xlu1 %1650 }
0x177c   :  { %v3579_v26 = vadd.f32 %v2973_v15, %v1651_v24  ;;  %v3046_v24 = vld [vmem:[%s3945_s12] sm:$0xff]  }
0x177e   :  { %v1778_v27 = vpack.c.bf16 %v3579_v26, %v3579_v26 }
0x1780   :  { %1780 = vrot.lane.b32.xlu1 %v1778_v27, %s3054_s27 }
0x17e2   :  { %v1694_v28 = vpop.permute.xlu0 %1693 }
0x17e3   :  { %2816 = vmatmul.mubr.msk.bf16.vlgmr.msra.gmra.mxu0 %vm117_vm2, %v1694_v28  ;;  %2824 = vmatmul.mubr.msk.bf16.vlgmr.msra.gmra.mxu1 %vm117_vm2, %v1694_v28 }
0x17e4   :  { %2828 = vmatpush3.bf16.msra.mxu0 %v3300_v54  ;;  %2831 = vmatprep.mubr.msk.bf16.mxu0 %vm3052_vm0, %v3051_v0 }
0x17e5   :  { %2829 = vmatprep.subr.bf16.mxu0 %v3051_v0  ;;  %2836 = vmatpush3.bf16.msra.mxu1 %v3539_v33 }
0x17e6   :  { %2837 = vmatprep.subr.bf16.mxu1 %v3051_v0  ;;  %2839 = vmatprep.mubr.msk.bf16.mxu1 %vm3052_vm0, %v3051_v0 }
0x17e8   :  { %2830 = vmatpush3.bf16.msra.mxu0 %v3308_v55  ;;  %v3611_v55 = vld [vmem:[%s3944_s11] sm:$0xff]  }
0x17e9   :  { %2843 = vmatprep.subr.bf16.mxu0 %v3051_v0  ;;  %2838 = vmatpush3.bf16.msra.mxu1 %v3550_v35  ;;  %v3618_v35 = vld [vmem:[%s3943_s10] ss:$0 sm:$0xff] }
0x17ea   :  { %2851 = vmatprep.subr.bf16.mxu1 %v3051_v0 }
0x17f2   :  { %v1781_v54 = vpop.permute.xlu1 %1780 }
0x17f3   :  { %2832 = vmatmul.mubr.msk.bf16.vlgmr.msra.gmra.mxu0 %vm117_vm2, %v1781_v54 }
0x17f4   :  { %2844 = vmatpush3.bf16.msra.mxu0 %v3602_v30  ;;  %2847 = vmatprep.mubr.msk.bf16.mxu0 %vm3052_vm0, %v3051_v0 }
0x17f5   :  { %2845 = vmatprep.subr.bf16.mxu0 %v3051_v0 }
0x17f8   :  { %2846 = vmatpush3.bf16.msra.mxu0 %v3611_v55 }
0x17f9   :  { %2859 = vmatprep.subr.bf16.mxu0 %v3051_v0 }
0x18a3   :  { %v1732_v31 = vpop.f32.mrf.mxu0  ;;  %v1772_v33 = vpop.f32.mrf.mxu1 }
0x18a4   :  { %v1733_v36 = vadd.f32 %v3618_v35, %v1732_v31  ;;  %v1773_v56 = vadd.f32 %v3334_v10, %v1772_v33 }
0x18a5   :  { %v2817_v49 = vpop.f32.mrf.mxu0  ;;  %v2825_v38 = vpop.f32.mrf.mxu1 }
0x18a6   :  { %1870 = vrot.lane.b32.xlu0 %v1733_v36, %s3054_s27  ;;  %v1862_v46 = vadd.f32 %v1861_v50, %v1733_v36 }
0x18a7   :  { %v1735_v51 = vpop.f32.mrf.mxu0  ;;  %v1775_v39 = vpop.f32.mrf.mxu1 }
0x18a8   :  { %v2516_v53 = vmul.f32 -1.442695, %v1862_v46  ;;  %v3669_v39 = vld [vmem:[%s3946_s14] ss:$0 sm:$0xff] }
0x18a9   :  { %v2818_v40 = vpop.f32.mrf.mxu0  ;;  %v2826_v42 = vpop.f32.mrf.mxu1 }
0x18aa   :  { %2974 = vpow2.f32 %v2516_v53 }
0x18b3   :  { %v1819_v43 = vpop.f32.mrf.mxu0 }
0x18b4   :  { %v1820_v45 = vadd.f32 %v3327_v1, %v1819_v43  ;;  %v2061_v43 = vld [vmem:[#allocation2 + $0x40] sm:$0xff] }
0x18b5   :  { %v2833_v44 = vpop.f32.mrf.mxu0 }
0x18b6   :  { %1833 = vrot.lane.b32.xlu1 %v1820_v45, %s3054_s27  ;;  %v1825_v57 = vadd.f32 %v1820_v45, %v1773_v56 }
0x18b7   :  { %v1822_v47 = vpop.f32.mrf.mxu0  ;;  %v2975_v25 = vpop.eup %2974 }
0x18b8   :  { %v2514_v58 = vmul.f32 -1.442695, %v1825_v57  ;;  %v1866_v59 = vadd.f32 1.0, %v2975_v25  ;;  %v3048_v47 = vld [vmem:[%s3947_s13] ss:$0 sm:$0xff] }
0x18b9   :  { %v2834_v48 = vpop.f32.mrf.mxu0 }
0x18ba   :  { %2976 = vpow2.f32 %v2514_v58 }
0x18bb   :  { %2978 = vrcp.f32 %v1866_v59 }
0x18c7   :  { %v2977_v60 = vpop.eup %2976 }
0x18c8   :  { %v1829_v52 = vadd.f32 1.0, %v2977_v60  ;;  %v2979_v1 = vpop.eup %2978 }
0x18ca   :  { %2980 = vrcp.f32 %v1829_v52 }
0x18d7   :  { %v2981_v63 = vpop.eup %2980 }
0x1918   :  { %v1871_v61 = vpop.permute.xlu0 %1870 }
0x1919   :  { %v1873_v62 = vmul.f32 %v2979_v1, %v1871_v61 }
0x191b   :  { %1875 = vrot.lane.b32.xlu0 %v1873_v62, %s3054_s27 }
0x1928   :  { %v1834_v2 = vpop.permute.xlu1 %1833 }
0x1929   :  { %v1836_v3 = vmul.f32 %v2981_v63, %v1834_v2 }
0x192b   :  { %1838 = vrot.lane.b32.xlu1 %v1836_v3, %s3054_s27 }
0x198d   :  { %v1876_v10 = vpop.permute.xlu0 %1875 }
0x198e   :  { %v1878_v4 = vadd.f32 %v1876_v10, %v1861_v50 }
0x1990   :  { %2982 = vtanh.f32 %v1878_v4 }
0x199d   :  { %v2983_v5 = vpop.eup %2982  ;;  %v1839_v6 = vpop.permute.xlu1 %1838 }
0x199e   :  { %v1841_v7 = vadd.f32 %v1839_v6, %v1773_v56  ;;  %v1880_v8 = vsub.f32 %v3574_v22, %v2983_v5 }
0x19a0   :  { %2984 = vtanh.f32 %v1841_v7  ;;  %1882 = vrot.lane.b32.xlu0 %v1880_v8, %s3055_s1 }
0x19ad   :  { %v2985_v9 = vpop.eup %2984 }
0x19ae   :  { %v1843_v11 = vsub.f32 %v3579_v26, %v2985_v9 }
0x19b0   :  { %1845 = vrot.lane.b32.xlu1 %v1843_v11, %s3055_s1 }
0x1a12   :  { %v1883_v12 = vpop.permute.xlu0 %1882 }
0x1a13   :  { %v1885_v13 = vmul.f32 %v2979_v1, %v1883_v12 }
0x1a15   :  { %1887 = vrot.lane.b32.xlu0 %v1885_v13, %s3056_s28 }
0x1a22   :  { %v1846_v14 = vpop.permute.xlu1 %1845 }
0x1a23   :  { %v1848_v15 = vmul.f32 %v2981_v63, %v1846_v14 }
0x1a25   :  { %1850 = vrot.lane.b32.xlu1 %v1848_v15, %s3056_s28 }
0x1a87   :  { %v1888_v16 = vpop.permute.xlu0 %1887 }
0x1a88   :  { %v3633_v17 = vadd.f32 %v2983_v5, %v1888_v16 }
0x1a8a   :  { %v1891_v18 = vpack.c.bf16 %v3633_v17, %v3633_v17 }
0x1a8c   :  { %1893 = vrot.lane.b32.xlu0 %v1891_v18, %s3054_s27 }
0x1a97   :  { %v1851_v19 = vpop.permute.xlu1 %1850 }
0x1a98   :  { %v3638_v20 = vadd.f32 %v2985_v9, %v1851_v19 }
0x1a9a   :  { %v1978_v21 = vpack.c.bf16 %v3638_v20, %v3638_v20 }
0x1a9c   :  { %1980 = vrot.lane.b32.xlu1 %v1978_v21, %s3054_s27 }
0x1afe   :  { %v1894_v22 = vpop.permute.xlu0 %1893 }
0x1aff   :  { %2840 = vmatmul.mubr.msk.bf16.vlgmr.msra.gmra.mxu1 %vm117_vm2, %v1894_v22  ;;  %2848 = vmatmul.mubr.msk.bf16.vlgmr.msra.gmra.mxu0 %vm117_vm2, %v1894_v22 }
0x1b00   :  { %2852 = vmatpush3.bf16.msra.mxu1 %v3045_v23  ;;  %2855 = vmatprep.mubr.msk.bf16.mxu1 %vm3052_vm0, %v3051_v0 }
0x1b01   :  { %2853 = vmatprep.subr.bf16.mxu1 %v3051_v0  ;;  %2860 = vmatpush3.bf16.msra.mxu0 %v3602_v30 }
0x1b02   :  { %2861 = vmatprep.subr.bf16.mxu0 %v3051_v0  ;;  %2863 = vmatprep.mubr.msk.bf16.mxu0 %vm3052_vm0, %v3051_v0 }
0x1b04   :  { %2854 = vmatpush3.bf16.msra.mxu1 %v3046_v24 }
0x1b05   :  { %2862 = vmatpush3.bf16.msra.mxu0 %v3611_v55  ;;  %2867 = vmatprep.subr.bf16.mxu1 %v3051_v0 }
0x1b0e   :  { %v1981_v27 = vpop.permute.xlu1 %1980 }
0x1b0f   :  { %2856 = vmatmul.mubr.msk.bf16.vlgmr.msra.gmra.mxu1 %vm117_vm2, %v1981_v27 }
0x1b10   :  { %2868 = vmatpush3.bf16.msra.mxu1 %v3045_v23  ;;  %2871 = vmatprep.mubr.msk.bf16.mxu1 %vm3052_vm0, %v3051_v0 }
0x1b11   :  { %2869 = vmatprep.subr.bf16.mxu1 %v3051_v0 }
0x1b14   :  { %2870 = vmatpush3.bf16.msra.mxu1 %v3046_v24 }
0x1bbf   :  { %v1932_v28 = vpop.f32.mrf.mxu1  ;;  %v1972_v54 = vpop.f32.mrf.mxu0 }
0x1bc0   :  { %v1933_v30 = vadd.f32 %v3618_v35, %v1932_v28  ;;  %v1973_v48 = vadd.f32 %v3048_v47, %v1972_v54 }
0x1bc1   :  { %v2841_v31 = vpop.f32.mrf.mxu1  ;;  %v2849_v33 = vpop.f32.mrf.mxu0 }
0x1bc2   :  { %2070 = vrot.lane.b32.xlu1 %v1933_v30, %s3054_s27  ;;  %v2062_v45 = vadd.f32 %v2061_v43, %v1933_v30 }
0x1bc3   :  { %v1935_v55 = vpop.f32.mrf.mxu1  ;;  %v1975_v36 = vpop.f32.mrf.mxu0 }
0x1bc4   :  { %v2522_v44 = vmul.f32 -1.442695, %v2062_v45 }
0x1bc5   :  { %v2842_v49 = vpop.f32.mrf.mxu1  ;;  %v2850_v38 = vpop.f32.mrf.mxu0 }
0x1bc6   :  { %2986 = vpow2.f32 %v2522_v44 }
0x1bcf   :  { %v2019_v51 = vpop.f32.mrf.mxu1 }
0x1bd0   :  { %v2020_v0 = vadd.f32 %v3669_v39, %v2019_v51 }
0x1bd1   :  { %v2857_v40 = vpop.f32.mrf.mxu1 }
0x1bd2   :  { %2033 = vrot.lane.b32.xlu0 %v2020_v0, %s3054_s27  ;;  %v2025_v50 = vadd.f32 %v2020_v0, %v1973_v48 }
0x1bd3   :  { %v2022_v35 = vpop.f32.mrf.mxu1  ;;  %v2987_v53 = vpop.eup %2986 }
0x1bd4   :  { %v2520_v46 = vmul.f32 -1.442695, %v2025_v50  ;;  %v2066_v56 = vadd.f32 1.0, %v2987_v53 }
0x1bd5   :  { %v2858_v42 = vpop.f32.mrf.mxu1 }
0x1bd6   :  { %2988 = vpow2.f32 %v2520_v46 }
0x1bd7   :  { %2990 = vrcp.f32 %v2066_v56 }
0x1be3   :  { %v2989_v57 = vpop.eup %2988 }
0x1be4   :  { %v2029_v58 = vadd.f32 1.0, %v2989_v57  ;;  %v2991_v25 = vpop.eup %2990 }
0x1be6   :  { %2992 = vrcp.f32 %v2029_v58 }
0x1bf3   :  { %v2993_v52 = vpop.eup %2992 }
0x1c34   :  { %v2071_v59 = vpop.permute.xlu1 %2070 }
0x1c35   :  { %v2073_v60 = vmul.f32 %v2991_v25, %v2071_v59 }
0x1c37   :  { %2075 = vrot.lane.b32.xlu1 %v2073_v60, %s3054_s27 }
0x1c44   :  { %v2034_v1 = vpop.permute.xlu0 %2033 }
0x1c45   :  { %v2036_v61 = vmul.f32 %v2993_v52, %v2034_v1 }
0x1c47   :  { %2038 = vrot.lane.b32.xlu0 %v2036_v61, %s3054_s27 }
0x1ca9   :  { %v2076_v62 = vpop.permute.xlu1 %2075 }
0x1caa   :  { %v2078_v63 = vadd.f32 %v2076_v62, %v2061_v43 }
0x1cac   :  { %2994 = vtanh.f32 %v2078_v63 }
0x1cb9   :  { %v2995_v2 = vpop.eup %2994  ;;  %v2039_v3 = vpop.permute.xlu0 %2038 }
0x1cba   :  { %v2041_v10 = vadd.f32 %v2039_v3, %v1973_v48  ;;  %v2080_v4 = vsub.f32 %v3633_v17, %v2995_v2 }
0x1cbc   :  { %2996 = vtanh.f32 %v2041_v10  ;;  %2082 = vrot.lane.b32.xlu1 %v2080_v4, %s3055_s1 }
0x1cc9   :  { %v2997_v5 = vpop.eup %2996 }
0x1cca   :  { %v2043_v6 = vsub.f32 %v3638_v20, %v2997_v5 }
0x1ccc   :  { %2045 = vrot.lane.b32.xlu0 %v2043_v6, %s3055_s1 }
0x1d2e   :  { %v2083_v7 = vpop.permute.xlu1 %2082 }
0x1d2f   :  { %v2085_v8 = vmul.f32 %v2991_v25, %v2083_v7 }
0x1d31   :  { %2087 = vrot.lane.b32.xlu1 %v2085_v8, %s3056_s28 }
0x1d3e   :  { %v2046_v9 = vpop.permute.xlu0 %2045 }
0x1d3f   :  { %v2048_v11 = vmul.f32 %v2993_v52, %v2046_v9 }
0x1d41   :  { %2050 = vrot.lane.b32.xlu0 %v2048_v11, %s3056_s28 }
0x1da3   :  { %v2088_v12 = vpop.permute.xlu1 %2087 }
0x1da4   :  { %v3684_v13 = vadd.f32 %v2995_v2, %v2088_v12 }
0x1da6   :  { %v2091_v14 = vpack.c.bf16 %v3684_v13, %v3684_v13 }
0x1da8   :  { %2093 = vrot.lane.b32.xlu1 %v2091_v14, %s3054_s27 }
0x1db3   :  { %v2051_v15 = vpop.permute.xlu0 %2050 }
0x1db4   :  { %v2053_v16 = vadd.f32 %v2997_v5, %v2051_v15 }
0x1db6   :  { %v2138_v17 = vpack.c.bf16 %v2053_v16, %v2053_v16 }
0x1db8   :  { %2140 = vrot.lane.b32.xlu0 %v2138_v17, %s3054_s27 }
0x1e1a   :  { %v2094_v18 = vpop.permute.xlu1 %2093 }
0x1e1b   :  { %2864 = vmatmul.mubr.msk.bf16.vlgmr.msra.gmra.mxu0 %vm117_vm2, %v2094_v18 }
0x1e2a   :  { %v2141_v19 = vpop.permute.xlu0 %2140 }
0x1e2b   :  { %2872 = vmatmul.mubr.msk.bf16.vlgmr.msra.gmra.mxu1 %vm117_vm2, %v2141_v19 }
0x1edb   :  { %v2132_v21 = vpop.f32.mrf.mxu0 }
0x1edc   :  { %v2133_v33 = vadd.f32 %v3048_v47, %v2132_v21 }
0x1edd   :  { %v2865_v22 = vpop.f32.mrf.mxu0 }
0x1edf   :  { %v2135_v23 = vpop.f32.mrf.mxu0 }
0x1ee1   :  { %v2866_v24 = vpop.f32.mrf.mxu0 }
0x1eeb   :  { %v2179_v27 = vpop.f32.mrf.mxu1 }
0x1eec   :  { %v2180_v28 = vadd.f32 %v3669_v39, %v2179_v27 }
0x1eed   :  { %v2873_v54 = vpop.f32.mrf.mxu1 }
0x1eee   :  { %2193 = vrot.lane.b32.xlu0 %v2180_v28, %s3054_s27  ;;  %v2185_v55 = vadd.f32 %v2180_v28, %v2133_v33 }
0x1eef   :  { %v2182_v30 = vpop.f32.mrf.mxu1 }
0x1ef0   :  { %v2525_v36 = vmul.f32 -1.442695, %v2185_v55 }
0x1ef1   :  { %v2874_v31 = vpop.f32.mrf.mxu1 }
0x1ef2   :  { %2998 = vpow2.f32 %v2525_v36 }
0x1eff   :  { %v2999_v49 = vpop.eup %2998 }
0x1f00   :  { %v2189_v38 = vadd.f32 1.0, %v2999_v49 }
0x1f02   :  { %3000 = vrcp.f32 %v2189_v38 }
0x1f0f   :  { %v3001_v51 = vpop.eup %3000 }
0x1f60   :  { %v2194_v0 = vpop.permute.xlu0 %2193 }
0x1f61   :  { %v2196_v40 = vmul.f32 %v3001_v51, %v2194_v0 }
0x1f63   :  { %2198 = vrot.lane.b32.xlu1 %v2196_v40, %s3054_s27 }
0x1fd5   :  { %v2199_v35 = vpop.permute.xlu1 %2198 }
0x1fd6   :  { %v2201_v42 = vadd.f32 %v2199_v35, %v2133_v33 }
0x1fd8   :  { %3002 = vtanh.f32 %v2201_v42 }
0x1fe5   :  { %v3003_v39 = vpop.eup %3002 }
0x1fe6   :  { %v2203_v43 = vsub.f32 %v2053_v16, %v3003_v39 }
0x1fe8   :  { %2205 = vrot.lane.b32.xlu0 %v2203_v43, %s3055_s1 }
0x1fec   :  { %656 = vrot.lane.b32.xlu0 %v3349_v41, %s3054_s27 }
0x1ff0   :  { %1055 = vrot.lane.b32.xlu0 %v3437_v34, %s3054_s27 }
0x1ff4   :  { %1455 = vrot.lane.b32.xlu0 %v3525_v29, %s3054_s27 }
0x1ff8   :  { %1855 = vrot.lane.b32.xlu0 %v3638_v20, %s3054_s27 }
0x205a   :  { %v2206_v45 = vpop.permute.xlu0 %2205 }
0x205b   :  { %v2208_v44 = vmul.f32 %v3001_v51, %v2206_v45 }
0x205d   :  { %2210 = vrot.lane.b32.xlu1 %v2208_v44, %s3056_s28 }
0x205e   :  { %v657_v47 = vpop.permute.xlu0 %656 }
0x205f   :  { %659 = vst.msk [vmem:[%s3948_s15] sm:$0xff] %vm117_vm2, %v657_v47 }
0x2061   :  { %855 = vrot.lane.b32.xlu1 %v3393_v37, %s3054_s27 }
0x2062   :  { %v1056_v41 = vpop.permute.xlu0 %1055 }
0x2063   :  { %2491 = vst.msk [vmem:[%s3948_s15 + $0x10] sm:$0xff] %vm117_vm2, %v1056_v41 }
0x2065   :  { %1255 = vrot.lane.b32.xlu1 %v3481_v32, %s3054_s27 }
0x2066   :  { %v1456_v34 = vpop.permute.xlu0 %1455  ;;  %v2220_v37 = vld [vmem:[%s3948_s15] sm:$0xff] }
0x2067   :  { %2503 = vst.msk [vmem:[%s3948_s15 + $0x20] sm:$0xff] %vm117_vm2, %v1456_v34  ;;  %v2229_v32 = vsel %vm117_vm2, %v2220_v37, 0.0 }
0x2069   :  { %1655 = vrot.lane.b32.xlu1 %v3579_v26, %s3054_s27 }
0x206a   :  { %v1856_v29 = vpop.permute.xlu0 %1855  ;;  %v2222_v61 = vld [vmem:[%s3948_s15 + $0x10] sm:$0xff] }
0x206b   :  { %2515 = vst.msk [vmem:[%s3948_s15 + $0x30] sm:$0xff] %vm117_vm2, %v1856_v29  ;;  %v2235_v62 = vsel %vm117_vm2, %v2222_v61, 0.0 }
0x206d   :  { %2055 = vrot.lane.b32.xlu1 %v2053_v16, %s3054_s27 }
0x206e   :  { %v2224_v63 = vld [vmem:[%s3948_s15 + $0x20] sm:$0xff] }
0x206f   :  { %v2241_v2 = vsel %vm117_vm2, %v2224_v63, 0.0 }
0x2072   :  { %v2226_v3 = vld [vmem:[%s3948_s15 + $0x30] sm:$0xff] }
0x2073   :  { %v2247_v10 = vsel %vm117_vm2, %v2226_v3, 0.0 }
0x2091   :  { %2230 = vadd.xlane.f32.xlu1 %v2229_v32 }
0x20cf   :  { %v2211_v20 = vpop.permute.xlu1 %2210 }
0x20d0   :  { %v2213_v48 = vadd.f32 %v3003_v39, %v2211_v20 }
0x20d2   :  { %2215 = vrot.lane.b32.xlu0 %v2213_v48, %s3054_s27 }
0x20d3   :  { %v856_v26 = vpop.permute.xlu1 %855 }
0x20d4   :  { %2485 = vst.msk [vmem:[%s3948_s15 + $0x8] sm:$0xff] %vm117_vm2, %v856_v26 }
0x20d7   :  { %v1256_v50 = vpop.permute.xlu1 %1255 }
0x20d8   :  { %2497 = vst.msk [vmem:[%s3948_s15 + $0x18] sm:$0xff] %vm117_vm2, %v1256_v50 }
0x20db   :  { %v1656_v46 = vpop.permute.xlu1 %1655  ;;  %v2221_v52 = vld [vmem:[%s3948_s15 + $0x8] sm:$0xff] }
0x20dc   :  { %2509 = vst.msk [vmem:[%s3948_s15 + $0x28] sm:$0xff] %vm117_vm2, %v1656_v46  ;;  %v2232_v1 = vsel %vm117_vm2, %v2221_v52, 0.0 }
0x20df   :  { %v2056_v53 = vpop.permute.xlu1 %2055  ;;  %v2223_v56 = vld [vmem:[%s3948_s15 + $0x18] sm:$0xff] }
0x20e0   :  { %2521 = vst.msk [vmem:[%s3948_s15 + $0x38] sm:$0xff] %vm117_vm2, %v2056_v53  ;;  %v2238_v57 = vsel %vm117_vm2, %v2223_v56, 0.0 }
0x20e1   :  { %2239 = vadd.xlane.f32.xlu1 %v2238_v57 }
0x20e3   :  { %v2225_v58 = vld [vmem:[%s3948_s15 + $0x28] sm:$0xff] }
0x20e4   :  { %v2244_v25 = vsel %vm117_vm2, %v2225_v58, 0.0 }
0x20e5   :  { %2245 = vadd.xlane.f32.xlu1 %v2244_v25 }
0x20e7   :  { %v2227_v59 = vld [vmem:[%s3948_s15 + $0x38] sm:$0xff] }
0x20e8   :  { %v2250_v60 = vsel %vm117_vm2, %v2227_v59, 0.0 }
0x20e9   :  { %2251 = vadd.xlane.f32.xlu1 %v2250_v60  ;;  %v3844_v60 = vld [vmem:[%s3941_s5] ss:$0 sm:$0xff] }
0x20f1   :  { %2233 = vadd.xlane.f32.xlu0 %v2232_v1 }
0x20f5   :  { %2236 = vadd.xlane.f32.xlu0 %v2235_v62 }
0x20f9   :  { %2242 = vadd.xlane.f32.xlu0 %v2241_v2 }
0x20fd   :  { %2248 = vadd.xlane.f32.xlu0 %v2247_v10 }
0x211a   :  { %v2231_v4 = vpop.xlane.xlu1 %2230 }
0x211b   :  { %v2256_v5 = vmul.f32 0.03125, %v2231_v4 }
0x211d   :  { %v3777_v6 = vsub.f32 %v2220_v37, %v2256_v5 }
0x211f   :  { %v2274_v7 = vmul.f32 %v3777_v6, %v3777_v6 }
0x2121   :  { %v2283_v8 = vsel %vm117_vm2, %v2274_v7, 0.0 }
0x2122   :  { %2284 = vadd.xlane.f32.xlu1 %v2283_v8 }
0x2144   :  { %v2216_v9 = vpop.permute.xlu0 %2215 }
0x2145   :  { %2526 = vst.msk [vmem:[%s3948_s15 + $0x40] sm:$0xff] %vm117_vm2, %v2216_v9  ;;  %2527 = vst.msk [vmem:[%s3949_s16 + $0x8] sm:$0xff] %vm117_vm2, %v2216_v9 }
0x214c   :  { %v3793_v11 = vld [vmem:[%s3948_s15 + $0x40] sm:$0xff] }
0x214d   :  { %v2253_v12 = vsel %vm117_vm2, %v3793_v11, 0.0 }
0x214e   :  { %2254 = vadd.xlane.f32.xlu0 %v2253_v12 }
0x216a   :  { %v2240_v14 = vpop.xlane.xlu1 %2239 }
0x216b   :  { %v2259_v15 = vmul.f32 0.03125, %v2240_v14 }
0x216d   :  { %v3797_v19 = vsub.f32 %v2223_v56, %v2259_v15 }
0x216e   :  { %v2246_v16 = vpop.xlane.xlu1 %2245 }
0x216f   :  { %v2261_v21 = vmul.f32 0.03125, %v2246_v16  ;;  %v2277_v54 = vmul.f32 %v3797_v19, %v3797_v19 }
0x2171   :  { %v3805_v30 = vsub.f32 %v2225_v58, %v2261_v21  ;;  %v2292_v51 = vsel %vm117_vm2, %v2277_v54, 0.0  ;;  %v3837_v58 = vld [vmem:[%s3940_s4] ss:$0 sm:$0xff] }
0x2172   :  { %v2252_v23 = vpop.xlane.xlu1 %2251 }
0x2173   :  { %v2263_v31 = vmul.f32 0.03125, %v2252_v23  ;;  %v2279_v42 = vmul.f32 %v3805_v30, %v3805_v30 }
0x2175   :  { %v3813_v0 = vsub.f32 %v2227_v59, %v2263_v31  ;;  %v2298_v47 = vsel %vm117_vm2, %v2279_v42, 0.0 }
0x2177   :  { %v2281_v34 = vmul.f32 %v3813_v0, %v3813_v0 }
0x2179   :  { %v2304_v37 = vsel %vm117_vm2, %v2281_v34, 0.0 }
0x217a   :  { %v2234_v17 = vpop.xlane.xlu0 %2233 }
0x217b   :  { %v2257_v18 = vmul.f32 0.03125, %v2234_v17 }
0x217d   :  { %v3799_v22 = vsub.f32 %v2221_v52, %v2257_v18 }
0x217e   :  { %v2237_v24 = vpop.xlane.xlu0 %2236 }
0x217f   :  { %v2258_v27 = vmul.f32 0.03125, %v2237_v24  ;;  %v2275_v28 = vmul.f32 %v3799_v22, %v3799_v22 }
0x2181   :  { %v3807_v33 = vsub.f32 %v2222_v61, %v2258_v27  ;;  %v2286_v55 = vsel %vm117_vm2, %v2275_v28, 0.0 }
0x2182   :  { %2287 = vadd.xlane.f32.xlu0 %v2286_v55  ;;  %v2243_v36 = vpop.xlane.xlu0 %2242 }
0x2183   :  { %v2260_v49 = vmul.f32 0.03125, %v2243_v36  ;;  %v2276_v38 = vmul.f32 %v3807_v33, %v3807_v33 }
0x2185   :  { %v3815_v40 = vsub.f32 %v2224_v63, %v2260_v49  ;;  %v2289_v35 = vsel %vm117_vm2, %v2276_v38, 0.0 }
0x2186   :  { %2293 = vadd.xlane.f32.xlu0 %v2292_v51  ;;  %2290 = vadd.xlane.f32.xlu1 %v2289_v35  ;;  %v2249_v39 = vpop.xlane.xlu0 %2248 }
0x2187   :  { %v2262_v43 = vmul.f32 0.03125, %v2249_v39  ;;  %v2278_v45 = vmul.f32 %v3815_v40, %v3815_v40 }
0x2189   :  { %v3822_v44 = vsub.f32 %v2226_v3, %v2262_v43  ;;  %v2295_v41 = vsel %vm117_vm2, %v2278_v45, 0.0 }
0x218a   :  { %2299 = vadd.xlane.f32.xlu0 %v2298_v47  ;;  %2296 = vadd.xlane.f32.xlu1 %v2295_v41 }
0x218b   :  { %v2280_v29 = vmul.f32 %v3822_v44, %v3822_v44 }
0x218d   :  { %v2301_v32 = vsel %vm117_vm2, %v2280_v29, 0.0 }
0x218e   :  { %2305 = vadd.xlane.f32.xlu0 %v2304_v37  ;;  %2302 = vadd.xlane.f32.xlu1 %v2301_v32 }
0x21a4   :  { %2437 = vrot.lane.b32.xlu0 %v3684_v13, %s3054_s27  ;;  %v2319_v13 = vmul.f32 %v3837_v58, %v3777_v6 }
0x21ab   :  { %v2285_v20 = vpop.xlane.xlu1 %2284 }
0x21ac   :  { %v2310_v48 = vmul.f32 0.032258064, %v2285_v20 }
0x21ae   :  { %3004 = vrsqrt.f32 %v2310_v48  ;;  %vm2330_vm6 = vcmp.eq.f32.partialorder %v2310_v48, inf  ;;  %v2333_v46 = vand.u32 2147483648, %v2310_v48  ;;  %vm2332_vm7 = vcmp.eq.f32.partialorder %v2310_v48, 0.0 }
0x21bb   :  { %v3005_v26 = vpop.eup %3004 }
0x21bc   :  { %v2329_v50 = vmul.f32 %v3005_v26, %v2310_v48 }
0x21be   :  { %v2331_v53 = vsel %vm2330_vm6, %v2310_v48, %v2329_v50 }
0x21bf   :  { %v2334_v56 = vsel %vm2332_vm7, %v2333_v46, %v2331_v53 }
0x21c0   :  { %v2391_v57 = vadd.f32 1e-06, %v2334_v56 }
0x21c2   :  { %3006 = vrcp.f32 %v2391_v57 }
0x21cf   :  { %v3007_v25 = vpop.eup %3006 }
0x21d0   :  { %v2401_v59 = vmul.f32 %v3007_v25, %v2319_v13 }
0x21d2   :  { %v2418_v52 = vadd.f32 %v3844_v60, %v2401_v59 }
0x21d4   :  { %2427 = vst.msk [vmem:[%s3948_s15] sm:$0xff] %vm117_vm2, %v2418_v52 }
0x21d7   :  { %v2255_v1 = vpop.xlane.xlu0 %2254 }
0x21d8   :  { %v2264_v61 = vmul.f32 0.03125, %v2255_v1 }
0x21da   :  { %v3852_v62 = vsub.f32 %v3793_v11, %v2264_v61 }
0x21dc   :  { %v2282_v63 = vmul.f32 %v3852_v62, %v3852_v62 }
0x21de   :  { %v2307_v2 = vsel %vm117_vm2, %v2282_v63, 0.0 }
0x21df   :  { %2308 = vadd.xlane.f32.xlu1 %v2307_v2 }
0x220b   :  { %v2288_v3 = vpop.xlane.xlu0 %2287 }
0x220c   :  { %v2311_v10 = vmul.f32 0.032258064, %v2288_v3 }
0x220e   :  { %3008 = vrsqrt.f32 %v2311_v10  ;;  %vm2337_vm8 = vcmp.eq.f32.partialorder %v2311_v10, inf  ;;  %v2340_v24 = vand.u32 2147483648, %v2311_v10  ;;  %vm2339_vm9 = vcmp.eq.f32.partialorder %v2311_v10, 0.0 }
0x220f   :  { %v2291_v4 = vpop.xlane.xlu1 %2290  ;;  %v2294_v5 = vpop.xlane.xlu0 %2293 }
0x2210   :  { %v2312_v6 = vmul.f32 0.032258064, %v2291_v4  ;;  %v2313_v7 = vmul.f32 0.032258064, %v2294_v5  ;;  %v2320_v5 = vmul.f32 %v3837_v58, %v3799_v22 }
0x2212   :  { %3010 = vrsqrt.f32 %v2312_v6  ;;  %vm2344_vm10 = vcmp.eq.f32.partialorder %v2312_v6, inf  ;;  %vm2346_vm11 = vcmp.eq.f32.partialorder %v2312_v6, 0.0  ;;  %v2347_v49 = vand.u32 2147483648, %v2312_v6 }
0x2213   :  { %3012 = vrsqrt.f32 %v2313_v7  ;;  %v2297_v8 = vpop.xlane.xlu1 %2296  ;;  %v2300_v9 = vpop.xlane.xlu0 %2299  ;;  %vm2351_vm12 = vcmp.eq.f32.partialorder %v2313_v7, inf  ;;  %v2354_v35 = vand.u32 2147483648, %v2313_v7  ;;  %vm2353_vm13 = vcmp.eq.f32.partialorder %v2313_v7, 0.0 }
0x2214   :  { %v2314_v12 = vmul.f32 0.032258064, %v2297_v8  ;;  %v2315_v11 = vmul.f32 0.032258064, %v2300_v9  ;;  %v2321_v8 = vmul.f32 %v3837_v58, %v3807_v33 }
0x2216   :  { %3014 = vrsqrt.f32 %v2314_v12  ;;  %vm2358_vm14 = vcmp.eq.f32.partialorder %v2314_v12, inf  ;;  %vm2360_vm15 = vcmp.eq.f32.partialorder %v2314_v12, 0.0  ;;  %v2361_v37 = vand.u32 2147483648, %v2314_v12 }
0x2217   :  { %3016 = vrsqrt.f32 %v2315_v11  ;;  %v2303_v14 = vpop.xlane.xlu1 %2302  ;;  %v2306_v15 = vpop.xlane.xlu0 %2305  ;;  %vm2365_vm0 = vcmp.eq.f32.partialorder %v2315_v11, inf  ;;  %v2368_v48 = vand.u32 2147483648, %v2315_v11  ;;  %vm2367_vm1 = vcmp.eq.f32.partialorder %v2315_v11, 0.0 }
0x2218   :  { %v3857_v16 = vmul.f32 0.032258064, %v2303_v14  ;;  %v3859_v17 = vmul.f32 0.032258064, %v2306_v15 }
0x221a   :  { %3018 = vrsqrt.f32 %v3857_v16  ;;  %vm2372_vm3 = vcmp.eq.f32.partialorder %v3857_v16, inf  ;;  %vm2374_vm4 = vcmp.eq.f32.partialorder %v3857_v16, 0.0  ;;  %v2375_v59 = vand.u32 2147483648, %v3857_v16 }
0x221b   :  { %v3009_v18 = vpop.eup %3008  ;;  %3020 = vrsqrt.f32 %v3859_v17  ;;  %v2438_v21 = vpop.permute.xlu0 %2437  ;;  %vm2379_vm5 = vcmp.eq.f32.partialorder %v3859_v17, inf  ;;  %v2382_v61 = vand.u32 2147483648, %v3859_v17  ;;  %vm2381_vm6 = vcmp.eq.f32.partialorder %v3859_v17, 0.0 }
0x221c   :  { %v2336_v23 = vmul.f32 %v3009_v18, %v2311_v10  ;;  %2440 = vst.msk [vmem:[%s3949_s16] sm:$0xff] %vm117_vm2, %v2438_v21  ;;  %v2324_v18 = vmul.f32 %v3837_v58, %v3805_v30 }
0x221e   :  { %v2338_v27 = vsel %vm2337_vm8, %v2311_v10, %v2336_v23 }
0x221f   :  { %v3011_v28 = vpop.eup %3010  ;;  %v2341_v54 = vsel %vm2339_vm9, %v2340_v24, %v2338_v27  ;;  %v2325_v24 = vmul.f32 %v3837_v58, %v3822_v44 }
0x2220   :  { %v3013_v31 = vpop.eup %3012  ;;  %v2392_v55 = vadd.f32 1e-06, %v2341_v54  ;;  %v2343_v36 = vmul.f32 %v3011_v28, %v2312_v6  ;;  %v2326_v28 = vmul.f32 %v3837_v58, %v3813_v0 }
0x2221   :  { %v2350_v38 = vmul.f32 %v3013_v31, %v2313_v7 }
0x2222   :  { %3022 = vrcp.f32 %v2392_v55  ;;  %v2345_v51 = vsel %vm2344_vm10, %v2312_v6, %v2343_v36 }
0x2223   :  { %v3015_v42 = vpop.eup %3014  ;;  %v2348_v39 = vsel %vm2346_vm11, %v2347_v49, %v2345_v51  ;;  %v2352_v43 = vsel %vm2351_vm12, %v2313_v7, %v2350_v38 }
0x2224   :  { %v3017_v45 = vpop.eup %3016  ;;  %v2393_v47 = vadd.f32 1e-06, %v2348_v39  ;;  %v2355_v41 = vsel %vm2353_vm13, %v2354_v35, %v2352_v43  ;;  %v2357_v34 = vmul.f32 %v3015_v42, %v2314_v12 }
0x2225   :  { %v2394_v29 = vadd.f32 1e-06, %v2355_v41  ;;  %v2364_v32 = vmul.f32 %v3017_v45, %v2315_v11 }
0x2226   :  { %3024 = vrcp.f32 %v2393_v47  ;;  %v2359_v20 = vsel %vm2358_vm14, %v2314_v12, %v2357_v34  ;;  %v2327_v47 = vmul.f32 %v3837_v58, %v3852_v62 }
0x2227   :  { %v3019_v26 = vpop.eup %3018  ;;  %3026 = vrcp.f32 %v2394_v29  ;;  %v2362_v50 = vsel %vm2360_vm15, %v2361_v37, %v2359_v20  ;;  %v2366_v46 = vsel %vm2365_vm0, %v2315_v11, %v2364_v32  ;;  %v2322_v11 = vmul.f32 %v3837_v58, %v3797_v19 }
0x2228   :  { %v3021_v53 = vpop.eup %3020  ;;  %v2395_v56 = vadd.f32 1e-06, %v2362_v50  ;;  %v2369_v57 = vsel %vm2367_vm1, %v2368_v48, %v2366_v46  ;;  %v2371_v13 = vmul.f32 %v3019_v26, %v3857_v16 }
0x2229   :  { %v2396_v25 = vadd.f32 1e-06, %v2369_v57  ;;  %v2378_v52 = vmul.f32 %v3021_v53, %v3859_v17 }
0x222a   :  { %3028 = vrcp.f32 %v2395_v56  ;;  %v2373_v1 = vsel %vm2372_vm3, %v3857_v16, %v2371_v13  ;;  %v2323_v16 = vmul.f32 %v3837_v58, %v3815_v40 }
0x222b   :  { %3030 = vrcp.f32 %v2396_v25  ;;  %v2376_v63 = vsel %vm2374_vm4, %v2375_v59, %v2373_v1  ;;  %v2380_v2 = vsel %vm2379_vm5, %v3859_v17, %v2378_v52 }
0x222c   :  { %v2397_v3 = vadd.f32 1e-06, %v2376_v63  ;;  %v2383_v10 = vsel %vm2381_vm6, %v2382_v61, %v2380_v2 }
0x222d   :  { %v2398_v4 = vadd.f32 1e-06, %v2383_v10 }
0x222e   :  { %3032 = vrcp.f32 %v2397_v3 }
0x222f   :  { %v3023_v6 = vpop.eup %3022  ;;  %3034 = vrcp.f32 %v2398_v4 }
0x2230   :  { %v2403_v7 = vmul.f32 %v3023_v6, %v2320_v5 }
0x2232   :  { %v2419_v9 = vadd.f32 %v3844_v60, %v2403_v7 }
0x2233   :  { %v3025_v12 = vpop.eup %3024 }
0x2234   :  { %v3027_v14 = vpop.eup %3026  ;;  %2428 = vst.msk [vmem:[%s3948_s15 + $0x8] sm:$0xff] %vm117_vm2, %v2419_v9  ;;  %v2405_v22 = vmul.f32 %v3025_v12, %v2321_v8 }
0x2235   :  { %v2407_v15 = vmul.f32 %v3027_v14, %v2322_v11 }
0x2236   :  { %v2420_v17 = vadd.f32 %v3844_v60, %v2405_v22 }
0x2237   :  { %v3029_v33 = vpop.eup %3028  ;;  %v2421_v21 = vadd.f32 %v3844_v60, %v2407_v15 }
0x2238   :  { %v3031_v19 = vpop.eup %3030  ;;  %2429 = vst.msk [vmem:[%s3948_s15 + $0x10] sm:$0xff] %vm117_vm2, %v2420_v17  ;;  %v2409_v23 = vmul.f32 %v3029_v33, %v2323_v16 }
0x2239   :  { %2430 = vst.msk [vmem:[%s3948_s15 + $0x18] sm:$0xff] %vm117_vm2, %v2421_v21  ;;  %v2411_v40 = vmul.f32 %v3031_v19, %v2324_v18 }
0x223a   :  { %v2422_v30 = vadd.f32 %v3844_v60, %v2409_v23 }
0x223b   :  { %v3033_v27 = vpop.eup %3032  ;;  %v2423_v54 = vadd.f32 %v3844_v60, %v2411_v40 }
0x223c   :  { %v3035_v31 = vpop.eup %3034  ;;  %2431 = vst.msk [vmem:[%s3948_s15 + $0x20] sm:$0xff] %vm117_vm2, %v2422_v30  ;;  %v2413_v55 = vmul.f32 %v3033_v27, %v2325_v24 }
0x223d   :  { %2432 = vst.msk [vmem:[%s3948_s15 + $0x28] sm:$0xff] %vm117_vm2, %v2423_v54  ;;  %v2415_v44 = vmul.f32 %v3035_v31, %v2326_v28 }
0x223e   :  { %v2424_v36 = vadd.f32 %v3844_v60, %v2413_v55 }
0x223f   :  { %v2425_v49 = vadd.f32 %v3844_v60, %v2415_v44 }
0x2240   :  { %2433 = vst.msk [vmem:[%s3948_s15 + $0x30] sm:$0xff] %vm117_vm2, %v2424_v36 }
0x2241   :  { %2434 = vst.msk [vmem:[%s3948_s15 + $0x38] sm:$0xff] %vm117_vm2, %v2425_v49 }
0x2268   :  { %v2309_v0 = vpop.xlane.xlu1 %2308 }
0x2269   :  { %v2318_v38 = vmul.f32 0.032258064, %v2309_v0 }
0x226b   :  { %3036 = vrsqrt.f32 %v2318_v38  ;;  %vm2386_vm7 = vcmp.eq.f32.partialorder %v2318_v38, inf  ;;  %v2389_v42 = vand.u32 2147483648, %v2318_v38  ;;  %vm2388_vm8 = vcmp.eq.f32.partialorder %v2318_v38, 0.0 }
0x2278   :  { %v3037_v51 = vpop.eup %3036 }
0x2279   :  { %v2385_v35 = vmul.f32 %v3037_v51, %v2318_v38 }
0x227b   :  { %v2387_v39 = vsel %vm2386_vm7, %v2318_v38, %v2385_v35 }
0x227c   :  { %v2390_v43 = vsel %vm2388_vm8, %v2389_v42, %v2387_v39 }
0x227d   :  { %v2399_v45 = vadd.f32 1e-06, %v2390_v43 }
0x227f   :  { %3038 = vrcp.f32 %v2399_v45 }
0x228c   :  { %v3039_v41 = vpop.eup %3038 }
0x228d   :  { %v2417_v34 = vmul.f32 %v3039_v41, %v2327_v47 }
0x228f   :  { %v2426_v29 = vadd.f32 %v3844_v60, %v2417_v34 }
0x2291   :  { %2435 = vst.msk [vmem:[%s3948_s15 + $0x40] sm:$0xff] %vm117_vm2, %v2426_v29 }

</bundles_post_ra>
